<compile_context>
chip_gen: v7x
topology: tpu7x:2x2x1
jax: 0.10.0
libtpu: 0.0.40
codegen_flags: <defaults>
</compile_context>

<pallas_src>
import functools

import jax
import jax.numpy as jnp
from jax import lax
from jax.experimental import pallas as pl
from jax.experimental.pallas import tpu as pltpu


def _resnet_block_kernel(H, W, C, group_size, eps,
                         x_ref, tadd_ref, gmat_ref,
                         g1_ref, be1_ref, w1_ref, cb1_ref,
                         g2_ref, be2_ref, w2_ref, cb2_ref,
                         o_ref, scr_ref):
    f32 = jnp.float32
    bf16 = jnp.bfloat16
    HW = H * W

    x = x_ref[0].astype(f32)                     # (HW, C)
    gmat = gmat_ref[...]                         # (C, C) group membership, f32
    inv_n = 1.0 / float(HW * group_size)

    def swish(v):
        # v * sigmoid(v); the reciprocal runs on the EUP slot (approx is plenty).
        return v * pl.reciprocal(1.0 + jnp.exp(-v), approx=True)

    def group_norm(v, gamma, beta):
        # Per-channel spatial sums aggregated per group via a tiny (C, C)
        # membership matmul; statistics stay in f32, variance clamped >= 0.
        s = jnp.sum(v, axis=0, keepdims=True)                    # (1, C)
        s2 = jnp.sum(v * v, axis=0, keepdims=True)               # (1, C)
        gsum = jnp.dot(s, gmat, preferred_element_type=f32)
        gsum2 = jnp.dot(s2, gmat, preferred_element_type=f32)
        mean = gsum * inv_n
        var = jnp.maximum(gsum2 * inv_n - mean * mean, 0.0)
        return (v - mean) * lax.rsqrt(var + eps) * gamma + beta

    # Column masks for the horizontal (dx = +/-1) conv taps.
    col = lax.broadcasted_iota(jnp.int32, (HW, 1), 0) % W
    mask_l = (col > 0).astype(f32)        # dx == -1 valid
    mask_r = (col < W - 1).astype(f32)    # dx == +1 valid

    # Zero the W-row top/bottom halo of the staging scratch once per invocation;
    # the staging stores below never touch those rows.
    zhalo = jnp.zeros((W, 3 * C), bf16)
    scr_ref[pl.ds(0, W), :] = zhalo
    scr_ref[pl.ds(W + HW, W), :] = zhalo

    def conv3x3(v, w_ref, cb_ref):
        # v: (HW, C) f32.  w_ref: (3, 3*C, C) bf16 (dy-major, K-stacked over dx).
        # Stage the activation once: the three dx variants side by side in lanes,
        # each masked + bf16-cast exactly once (vs. 9 copies/casts previously).
        zrow = jnp.zeros((1, C), f32)
        down = jnp.concatenate([zrow, v[:HW - 1, :]], axis=0)    # in[q - 1]
        up = jnp.concatenate([v[1:, :], zrow], axis=0)           # in[q + 1]
        scr_ref[pl.ds(W, HW), 0:C] = (down * mask_l).astype(bf16)
        scr_ref[pl.ds(W, HW), C:2 * C] = v.astype(bf16)
        scr_ref[pl.ds(W, HW), 2 * C:3 * C] = (up * mask_r).astype(bf16)
        # Three back-to-back MXU matmuls, K = 3C, f32 accumulation.
        acc = jnp.zeros((HW, C), f32)
        for g in range(3):                                        # g == dy + 1
            acc = acc + jnp.dot(scr_ref[pl.ds(g * W, HW), :], w_ref[g],
                                preferred_element_type=f32)
        return acc + cb_ref[...]

    # norm1 -> swish -> conv1
    h = conv3x3(swish(group_norm(x, g1_ref[...], be1_ref[...])), w1_ref, cb1_ref)
    # + temb projection (hoisted to the wrapper), broadcast over spatial positions
    h = h + tadd_ref[0].astype(f32)
    # norm2 -> swish -> (dropout == identity in eval) -> conv2
    h = conv3x3(swish(group_norm(h, g2_ref[...], be2_ref[...])), w2_ref, cb2_ref)
    # residual
    o_ref[0] = (x + h).astype(o_ref.dtype)


def resnet_block(x_nchw, temb, params, *, num_groups=32, eps=1e-6):
    """Fused Pallas ResnetBlock forward (out_channels == in_channels, eval mode).

    Activation I/O runs in x_nchw.dtype (pass bf16 to halve HBM traffic); all
    statistics / accumulation inside the kernel stay in f32.
    """
    B, C, H, W = x_nchw.shape
    HW = H * W
    assert C % num_groups == 0
    group_size = C // num_groups
    # TODO(synk): in_channels != out_channels (nin_shortcut / conv_shortcut) path
    # not implemented; this matches the PyTorch default out_channels=None.
    assert params["conv1_w"].shape[0] == C and params["conv1_w"].shape[1] == C

    io_dtype = x_nchw.dtype
    # TODO(synk): these NCHW <-> (B, HW, C) transposes are extra HBM round trips;
    # keep the surrounding model channels-last to drop them entirely.
    x = jnp.transpose(x_nchw.reshape(B, C, HW), (0, 2, 1))

    # temb projection hoisted out of the kernel (an M=1 GEMV wastes MXU rows and
    # the (Tc, C) weight's VMEM); the kernel only adds a per-batch (1, C) vector.
    t = temb.astype(jnp.float32)
    t = t * jax.nn.sigmoid(t)
    tadd = (t @ params["temb_w"].T.astype(jnp.float32)
            + params["temb_b"].astype(jnp.float32)).reshape(B, 1, C)

    def conv_w(w):
        # (Cout, Cin, 3, 3) -> (3, 3*Cin, Cout) bf16: dy-major, K-stacked over dx
        # to match the (HW, 3C) staged patches (one K=3C matmul per dy group).
        co, ci = w.shape[0], w.shape[1]
        return jnp.transpose(w, (2, 3, 1, 0)).reshape(3, 3 * ci, co).astype(jnp.bfloat16)

    w1 = conv_w(params["conv1_w"])
    w2 = conv_w(params["conv2_w"])
    cb1 = params["conv1_b"].reshape(1, C).astype(jnp.float32)
    cb2 = params["conv2_b"].reshape(1, C).astype(jnp.float32)
    g1 = params["norm1_g"].reshape(1, C).astype(jnp.float32)
    be1 = params["norm1_b"].reshape(1, C).astype(jnp.float32)
    g2 = params["norm2_g"].reshape(1, C).astype(jnp.float32)
    be2 = params["norm2_b"].reshape(1, C).astype(jnp.float32)

    # Group-membership matrix for GroupNorm statistics.
    gid = jnp.arange(C) // group_size
    gmat = (gid[:, None] == gid[None, :]).astype(jnp.float32)     # (C, C)

    kernel = functools.partial(_resnet_block_kernel, H, W, C, group_size, eps)

    single = pl.Buffered(1)        # grid-invariant operands: no double-buffering
    vec = pl.BlockSpec((1, C), lambda b: (0, 0))
    gmat_spec = pl.BlockSpec((C, C), lambda b: (0, 0), pipeline_mode=single)
    w_spec = pl.BlockSpec((3, 3 * C, C), lambda b: (0, 0, 0), pipeline_mode=single)
    x_spec = pl.BlockSpec((1, HW, C), lambda b: (b, 0, 0))
    tadd_spec = pl.BlockSpec((1, 1, C), lambda b: (b, 0, 0))

    # Explicit VMEM budget: aliased io blocks + f32 intermediates + bf16 staging
    # scratch + weights; floored at the 32 MiB scoped default, capped under v7x 64 MiB.
    io_bytes = jnp.dtype(io_dtype).itemsize
    vmem_est = (4 * io_bytes * HW * C            # x in/out blocks (pipelined)
                + 4 * 4 * HW * C                 # f32 x, h, acc live values
                + 2 * (HW + 2 * W) * 3 * C       # bf16 padded staging scratch
                + 2 * 2 * 3 * 3 * C * C          # two K-stacked bf16 conv weights
                + 4 * C * C)                     # f32 group-membership matrix
    vmem_limit = int(min(max(2 * vmem_est, 32 * 1024 * 1024), 64 * 1024 * 1024))

    # TODO(synk): at production LDM sizes (HW=4096, C=512) add a spatial row-tile
    # grid axis + two-pass GroupNorm so the working set fits v7x's 64 MiB VMEM.
    out = pl.pallas_call(
        kernel,
        out_shape=jax.ShapeDtypeStruct((B, HW, C), io_dtype),
        grid_spec=pltpu.PrefetchScalarGridSpec(
            num_scalar_prefetch=0,
            grid=(B,),
            in_specs=[
                x_spec, tadd_spec, gmat_spec,
                vec, vec,            # norm1 gamma / beta
                w_spec, vec,         # conv1 K-stacked weight (bf16), bias
                vec, vec,            # norm2 gamma / beta
                w_spec, vec,         # conv2 K-stacked weight (bf16), bias
            ],
            out_specs=x_spec,
            scratch_shapes=[pltpu.VMEM((HW + 2 * W, 3 * C), jnp.bfloat16)],
        ),
        input_output_aliases={0: 0},             # out = x + h: reuse x's HBM buffer
        compiler_params=pltpu.CompilerParams(
            dimension_semantics=("parallel",),
            vmem_limit_bytes=vmem_limit),
    )(x, tadd, gmat, g1, be1, w1, cb1, g2, be2, w2, cb2)

    # (B, HW, C) -> NCHW
    return jnp.transpose(out, (0, 2, 1)).reshape(B, C, H, W)


def resnet_block_ref(x, temb, params, *, num_groups=32, eps=1e-6):
    """Pure-JAX (f32) reference mirroring the PyTorch ResnetBlock forward."""
    B, C, H, W = x.shape

    def swish(v):
        return v * jax.nn.sigmoid(v)

    def gn(v, g, b):
        gs = C // num_groups
        vg = v.reshape(B, num_groups, gs * H * W)
        m = jnp.mean(vg, axis=-1, keepdims=True)
        var = jnp.mean((vg - m) ** 2, axis=-1, keepdims=True)
        out = ((vg - m) / jnp.sqrt(var + eps)).reshape(B, C, H, W)
        return out * g.reshape(1, C, 1, 1) + b.reshape(1, C, 1, 1)

    def conv3(v, w, b):
        out = lax.conv_general_dilated(
            v, w, window_strides=(1, 1), padding=((1, 1), (1, 1)),
            dimension_numbers=("NCHW", "OIHW", "NCHW"))
        return out + b.reshape(1, C, 1, 1)

    h = conv3(swish(gn(x, params["norm1_g"], params["norm1_b"])),
              params["conv1_w"], params["conv1_b"])
    t = swish(temb) @ params["temb_w"].T + params["temb_b"]
    h = h + t[:, :, None, None]
    h = swish(gn(h, params["norm2_g"], params["norm2_b"]))
    h = conv3(h, params["conv2_w"], params["conv2_b"])
    return x + h


if __name__ == "__main__":
    B, C, H, W = 2, 128, 16, 16     # C must be divisible by 32 (GroupNorm groups)
    TEMB = 512
    key = jax.random.PRNGKey(0)
    ks = jax.random.split(key, 12)

    x = jax.random.normal(ks[0], (B, C, H, W), dtype=jnp.float32)
    temb = jax.random.normal(ks[1], (B, TEMB), dtype=jnp.float32)
    params = {
        "norm1_g": 1.0 + 0.1 * jax.random.normal(ks[2], (C,), dtype=jnp.float32),
        "norm1_b": 0.1 * jax.random.normal(ks[3], (C,), dtype=jnp.float32),
        "conv1_w": 0.05 * jax.random.normal(ks[4], (C, C, 3, 3), dtype=jnp.float32),
        "conv1_b": 0.05 * jax.random.normal(ks[5], (C,), dtype=jnp.float32),
        "temb_w": 0.05 * jax.random.normal(ks[6], (C, TEMB), dtype=jnp.float32),
        "temb_b": 0.05 * jax.random.normal(ks[7], (C,), dtype=jnp.float32),
        "norm2_g": 1.0 + 0.1 * jax.random.normal(ks[8], (C,), dtype=jnp.float32),
        "norm2_b": 0.1 * jax.random.normal(ks[9], (C,), dtype=jnp.float32),
        "conv2_w": 0.05 * jax.random.normal(ks[10], (C, C, 3, 3), dtype=jnp.float32),
        "conv2_b": 0.05 * jax.random.normal(ks[11], (C,), dtype=jnp.float32),
    }

    # bf16 activation I/O at the kernel boundary (halves HBM traffic).  Kernel and
    # f32 reference both consume the same bf16-rounded input so the comparison
    # measures only kernel error (bf16 MXU operands + bf16 output store).
    x_bf16 = x.astype(jnp.bfloat16)

    out = jax.block_until_ready(jax.jit(resnet_block)(x_bf16, temb, params))
    ref = jax.block_until_ready(
        resnet_block_ref(x_bf16.astype(jnp.float32), temb, params))

    assert out.shape == (B, C, H, W) and out.dtype == jnp.bfloat16
    out_f32 = out.astype(jnp.float32)
    err = float(jnp.max(jnp.abs(out_f32 - ref)))
    assert jnp.allclose(out_f32, ref, rtol=2e-2, atol=2e-2), err
    print("KERNEL_OK")
</pallas_src>

<mosaic_0001>
module attributes {stable_mosaic.version = 11 : i64} {
  func.func @_resnet_block_kernel(%arg0: i32, %arg1: memref<1x256x128xbf16, #tpu.memory_space<vmem>>, %arg2: memref<1x1x128xf32, #tpu.memory_space<vmem>>, %arg3: memref<128x128xf32, #tpu.memory_space<vmem>>, %arg4: memref<1x128xf32, #tpu.memory_space<vmem>>, %arg5: memref<1x128xf32, #tpu.memory_space<vmem>>, %arg6: memref<3x384x128xbf16, #tpu.memory_space<vmem>>, %arg7: memref<1x128xf32, #tpu.memory_space<vmem>>, %arg8: memref<1x128xf32, #tpu.memory_space<vmem>>, %arg9: memref<1x128xf32, #tpu.memory_space<vmem>>, %arg10: memref<3x384x128xbf16, #tpu.memory_space<vmem>>, %arg11: memref<1x128xf32, #tpu.memory_space<vmem>>, %arg12: memref<1x256x128xbf16, #tpu.memory_space<vmem>>, %arg13: memref<288x384xbf16, #tpu.memory_space<vmem>>) attributes {dimension_semantics = [#tpu.dimension_semantics<parallel>], iteration_bounds = array<i64: 2>, scalar_prefetch = 0 : i64, scratch_operands = 1 : i64, tpu.core_type = #tpu.core_type<tc>, window_params = [{transform_indices = @transform_0, window_bounds = array<i64: 1, 256, 128>}, {transform_indices = @transform_1, window_bounds = array<i64: 1, 1, 128>}, {pipeline_mode = #tpu.pipeline_mode<synchronous>, transform_indices = @transform_2, window_bounds = array<i64: 128, 128>}, {pipeline_mode = #tpu.pipeline_mode<synchronous>, transform_indices = @transform_3, window_bounds = array<i64: 1, 128>}, {pipeline_mode = #tpu.pipeline_mode<synchronous>, transform_indices = @transform_4, window_bounds = array<i64: 1, 128>}, {pipeline_mode = #tpu.pipeline_mode<synchronous>, transform_indices = @transform_5, window_bounds = array<i64: 3, 384, 128>}, {pipeline_mode = #tpu.pipeline_mode<synchronous>, transform_indices = @transform_6, window_bounds = array<i64: 1, 128>}, {pipeline_mode = #tpu.pipeline_mode<synchronous>, transform_indices = @transform_7, window_bounds = array<i64: 1, 128>}, {pipeline_mode = #tpu.pipeline_mode<synchronous>, transform_indices = @transform_8, window_bounds = array<i64: 1, 128>}, {pipeline_mode = #tpu.pipeline_mode<synchronous>, transform_indices = @transform_9, window_bounds = array<i64: 3, 384, 128>}, {pipeline_mode = #tpu.pipeline_mode<synchronous>, transform_indices = @transform_10, window_bounds = array<i64: 1, 128>}, {transform_indices = @transform_11, window_bounds = array<i64: 1, 256, 128>}]} {
    %c0 = arith.constant 0 : index
    %c0_0 = arith.constant 0 : index
    %c0_1 = arith.constant 0 : index
    %0 = vector.load %arg1[%c0, %c0_0, %c0_1] : memref<1x256x128xbf16, #tpu.memory_space<vmem>>, vector<1x256x128xbf16>
    %1 = vector.shape_cast %0 : vector<1x256x128xbf16> to vector<256x128xbf16>
    %2 = arith.extf %1 : vector<256x128xbf16> to vector<256x128xf32>
    %c0_2 = arith.constant 0 : index
    %c0_3 = arith.constant 0 : index
    %3 = vector.load %arg3[%c0_2, %c0_3] : memref<128x128xf32, #tpu.memory_space<vmem>>, vector<128x128xf32>
    %4 = tpu.iota {dimensions = array<i32: 0>} : vector<256x1xi32>
    %c16_i32 = arith.constant 16 : i32
    %c0_i32 = arith.constant 0 : i32
    %5 = arith.cmpi eq, %c16_i32, %c0_i32 : i32
    %c1_i32 = arith.constant 1 : i32
    %6 = arith.select %5, %c1_i32, %c16_i32 : i32
    %7 = vector.broadcast %6 : i32 to vector<256x1xi32>
    %8 = arith.remsi %4, %7 : vector<256x1xi32>
    %c0_i32_4 = arith.constant 0 : i32
    %9 = vector.broadcast %c0_i32_4 : i32 to vector<256x1xi32>
    %10 = arith.cmpi ne, %8, %9 : vector<256x1xi32>
    %c0_i32_5 = arith.constant 0 : i32
    %11 = vector.broadcast %c0_i32_5 : i32 to vector<256x1xi32>
    %12 = arith.cmpi slt, %8, %11 : vector<256x1xi32>
    %c0_i32_6 = arith.constant 0 : i32
    %13 = arith.cmpi slt, %6, %c0_i32_6 : i32
    %14 = vector.broadcast %13 : i1 to vector<256x1xi1>
    %15 = vector.broadcast %14 : vector<256x1xi1> to vector<256x1xi1>
    %16 = arith.xori %12, %15 : vector<256x1xi1>
    %17 = arith.andi %16, %10 : vector<256x1xi1>
    %18 = vector.broadcast %6 : i32 to vector<256x1xi32>
    %19 = arith.addi %8, %18 : vector<256x1xi32>
    %20 = arith.select %17, %19, %8 : vector<256x1xi1>, vector<256x1xi32>
    %c0_i32_7 = arith.constant 0 : i32
    %21 = vector.broadcast %c0_i32_7 : i32 to vector<256x1xi32>
    %22 = arith.cmpi sgt, %20, %21 : vector<256x1xi32>
    %23 = arith.extui %22 : vector<256x1xi1> to vector<256x1xi32>
    %24 = arith.sitofp %23 : vector<256x1xi32> to vector<256x1xf32>
    %c15_i32 = arith.constant 15 : i32
    %25 = vector.broadcast %c15_i32 : i32 to vector<256x1xi32>
    %26 = arith.cmpi slt, %20, %25 : vector<256x1xi32>
    %27 = arith.extui %26 : vector<256x1xi1> to vector<256x1xi32>
    %28 = arith.sitofp %27 : vector<256x1xi32> to vector<256x1xf32>
    %cst = arith.constant 0.000000e+00 : bf16
    %29 = vector.broadcast %cst : bf16 to vector<16x384xbf16>
    %c0_8 = arith.constant 0 : index
    %c0_9 = arith.constant 0 : index
    %30 = vector.load %arg13[%c0_8, %c0_9] : memref<288x384xbf16, #tpu.memory_space<vmem>>, vector<16x384xbf16>
    tpu.vector_store %arg13[%c0_8, %c0_9], %29 {strides = array<i32>} : memref<288x384xbf16, #tpu.memory_space<vmem>>, vector<16x384xbf16>,
    %c272 = arith.constant 272 : index
    %c0_10 = arith.constant 0 : index
    %31 = vector.load %arg13[%c272, %c0_10] : memref<288x384xbf16, #tpu.memory_space<vmem>>, vector<16x384xbf16>
    tpu.vector_store %arg13[%c272, %c0_10], %29 {strides = array<i32>} : memref<288x384xbf16, #tpu.memory_space<vmem>>, vector<16x384xbf16>,
    %c0_11 = arith.constant 0 : index
    %c0_12 = arith.constant 0 : index
    %32 = vector.load %arg4[%c0_11, %c0_12] : memref<1x128xf32, #tpu.memory_space<vmem>>, vector<1x128xf32>
    %c0_13 = arith.constant 0 : index
    %c0_14 = arith.constant 0 : index
    %33 = vector.load %arg5[%c0_13, %c0_14] : memref<1x128xf32, #tpu.memory_space<vmem>>, vector<1x128xf32>
    %cst_15 = arith.constant dense<0.000000e+00> : vector<128xf32>
    %34 = vector.multi_reduction <add>, %2, %cst_15 [0] : vector<256x128xf32> to vector<128xf32>
    %35 = vector.shape_cast %34 : vector<128xf32> to vector<1x128xf32>
    %36 = arith.mulf %2, %2 : vector<256x128xf32>
    %cst_16 = arith.constant dense<0.000000e+00> : vector<128xf32>
    %37 = vector.multi_reduction <add>, %36, %cst_16 [0] : vector<256x128xf32> to vector<128xf32>
    %38 = vector.shape_cast %37 : vector<128xf32> to vector<1x128xf32>
    %cst_17 = arith.constant dense<0.000000e+00> : vector<1x128xf32>
    %39 = tpu.matmul %35, %3, %cst_17 {dimension_numbers = #tpu.dot_dimension_numbers<[1], [0], [0], [1], [0, 0, 1, 1], [], []>} : vector<1x128xf32>, vector<128x128xf32>, vector<1x128xf32> -> vector<1x128xf32>
    %cst_18 = arith.constant dense<0.000000e+00> : vector<1x128xf32>
    %40 = tpu.matmul %38, %3, %cst_18 {dimension_numbers = #tpu.dot_dimension_numbers<[1], [0], [0], [1], [0, 0, 1, 1], [], []>} : vector<1x128xf32>, vector<128x128xf32>, vector<1x128xf32> -> vector<1x128xf32>
    %cst_19 = arith.constant 9.765625E-4 : f32
    %41 = vector.broadcast %cst_19 : f32 to vector<1x128xf32>
    %42 = arith.mulf %39, %41 : vector<1x128xf32>
    %cst_20 = arith.constant 9.765625E-4 : f32
    %43 = vector.broadcast %cst_20 : f32 to vector<1x128xf32>
    %44 = arith.mulf %40, %43 : vector<1x128xf32>
    %45 = arith.mulf %42, %42 : vector<1x128xf32>
    %46 = arith.subf %44, %45 : vector<1x128xf32>
    %cst_21 = arith.constant 0.000000e+00 : f32
    %47 = vector.broadcast %cst_21 : f32 to vector<1x128xf32>
    %48 = arith.maximumf %46, %47 : vector<1x128xf32>
    %49 = vector.broadcast %42 : vector<1x128xf32> to vector<256x128xf32>
    %50 = arith.subf %2, %49 : vector<256x128xf32>
    %cst_22 = arith.constant 9.99999997E-7 : f32
    %51 = vector.broadcast %cst_22 : f32 to vector<1x128xf32>
    %52 = arith.addf %48, %51 : vector<1x128xf32>
    %53 = math.rsqrt %52 : vector<1x128xf32>
    %54 = vector.broadcast %53 : vector<1x128xf32> to vector<256x128xf32>
    %55 = arith.mulf %50, %54 : vector<256x128xf32>
    %56 = vector.broadcast %32 : vector<1x128xf32> to vector<256x128xf32>
    %57 = arith.mulf %55, %56 : vector<256x128xf32>
    %58 = vector.broadcast %33 : vector<1x128xf32> to vector<256x128xf32>
    %59 = arith.addf %57, %58 : vector<256x128xf32>
    %cst_23 = arith.constant 0.000000e+00 : f32
    %60 = vector.broadcast %cst_23 : f32 to vector<256x128xf32>
    %61 = arith.subf %60, %59 : vector<256x128xf32>
    %62 = math.exp %61 : vector<256x128xf32>
    %cst_24 = arith.constant 1.000000e+00 : f32
    %63 = vector.broadcast %cst_24 : f32 to vector<256x128xf32>
    %64 = arith.addf %63, %62 : vector<256x128xf32>
    %65 = tpu.reciprocal %64 {approx = true} : vector<256x128xf32> -> vector<256x128xf32>
    %66 = arith.mulf %59, %65 : vector<256x128xf32>
    %cst_25 = arith.constant 0.000000e+00 : f32
    %67 = vector.broadcast %cst_25 : f32 to vector<1x128xf32>
    %68 = vector.extract_strided_slice %66 {offsets = [0, 0], sizes = [255, 128], strides = [1, 1]} : vector<256x128xf32> to vector<255x128xf32>
    %69 = tpu.concatenate %67, %68 in 0 : vector<1x128xf32>, vector<255x128xf32> -> vector<256x128xf32>
    %70 = vector.extract_strided_slice %66 {offsets = [1, 0], sizes = [255, 128], strides = [1, 1]} : vector<256x128xf32> to vector<255x128xf32>
    %71 = tpu.concatenate %70, %67 in 0 : vector<255x128xf32>, vector<1x128xf32> -> vector<256x128xf32>
    %72 = vector.broadcast %24 : vector<256x1xf32> to vector<256x128xf32>
    %73 = arith.mulf %69, %72 : vector<256x128xf32>
    %74 = arith.truncf %73 : vector<256x128xf32> to vector<256x128xbf16>
    %c16 = arith.constant 16 : index
    %c0_26 = arith.constant 0 : index
    %75 = vector.load %arg13[%c16, %c0_26] : memref<288x384xbf16, #tpu.memory_space<vmem>>, vector<256x128xbf16>
    tpu.vector_store %arg13[%c16, %c0_26], %74 {strides = array<i32>} : memref<288x384xbf16, #tpu.memory_space<vmem>>, vector<256x128xbf16>,
    %76 = arith.truncf %66 : vector<256x128xf32> to vector<256x128xbf16>
    %c16_27 = arith.constant 16 : index
    %c128 = arith.constant 128 : index
    %77 = vector.load %arg13[%c16_27, %c128] : memref<288x384xbf16, #tpu.memory_space<vmem>>, vector<256x128xbf16>
    tpu.vector_store %arg13[%c16_27, %c128], %76 {strides = array<i32>} : memref<288x384xbf16, #tpu.memory_space<vmem>>, vector<256x128xbf16>,
    %78 = vector.broadcast %28 : vector<256x1xf32> to vector<256x128xf32>
    %79 = arith.mulf %71, %78 : vector<256x128xf32>
    %80 = arith.truncf %79 : vector<256x128xf32> to vector<256x128xbf16>
    %c16_28 = arith.constant 16 : index
    %c256 = arith.constant 256 : index
    %81 = vector.load %arg13[%c16_28, %c256] : memref<288x384xbf16, #tpu.memory_space<vmem>>, vector<256x128xbf16>
    tpu.vector_store %arg13[%c16_28, %c256], %80 {strides = array<i32>} : memref<288x384xbf16, #tpu.memory_space<vmem>>, vector<256x128xbf16>,
    %cst_29 = arith.constant 0.000000e+00 : f32
    %82 = vector.broadcast %cst_29 : f32 to vector<256x128xf32>
    %c0_30 = arith.constant 0 : index
    %c0_31 = arith.constant 0 : index
    %83 = vector.load %arg13[%c0_30, %c0_31] : memref<288x384xbf16, #tpu.memory_space<vmem>>, vector<256x384xbf16>
    %c0_32 = arith.constant 0 : index
    %c0_33 = arith.constant 0 : index
    %c0_34 = arith.constant 0 : index
    %84 = vector.load %arg6[%c0_32, %c0_33, %c0_34] : memref<3x384x128xbf16, #tpu.memory_space<vmem>>, vector<1x384x128xbf16>
    %85 = vector.shape_cast %84 : vector<1x384x128xbf16> to vector<384x128xbf16>
    %cst_35 = arith.constant dense<0.000000e+00> : vector<256x128xf32>
    %86 = tpu.matmul %83, %85, %cst_35 {dimension_numbers = #tpu.dot_dimension_numbers<[1], [0], [0], [1], [0, 0, 1, 1], [], []>} : vector<256x384xbf16>, vector<384x128xbf16>, vector<256x128xf32> -> vector<256x128xf32>
    %87 = arith.addf %82, %86 : vector<256x128xf32>
    %c16_36 = arith.constant 16 : index
    %c0_37 = arith.constant 0 : index
    %88 = vector.load %arg13[%c16_36, %c0_37] : memref<288x384xbf16, #tpu.memory_space<vmem>>, vector<256x384xbf16>
    %c1 = arith.constant 1 : index
    %c0_38 = arith.constant 0 : index
    %c0_39 = arith.constant 0 : index
    %89 = vector.load %arg6[%c1, %c0_38, %c0_39] : memref<3x384x128xbf16, #tpu.memory_space<vmem>>, vector<1x384x128xbf16>
    %90 = vector.shape_cast %89 : vector<1x384x128xbf16> to vector<384x128xbf16>
    %cst_40 = arith.constant dense<0.000000e+00> : vector<256x128xf32>
    %91 = tpu.matmul %88, %90, %cst_40 {dimension_numbers = #tpu.dot_dimension_numbers<[1], [0], [0], [1], [0, 0, 1, 1], [], []>} : vector<256x384xbf16>, vector<384x128xbf16>, vector<256x128xf32> -> vector<256x128xf32>
    %92 = arith.addf %87, %91 : vector<256x128xf32>
    %c32 = arith.constant 32 : index
    %c0_41 = arith.constant 0 : index
    %93 = vector.load %arg13[%c32, %c0_41] : memref<288x384xbf16, #tpu.memory_space<vmem>>, vector<256x384xbf16>
    %c2 = arith.constant 2 : index
    %c0_42 = arith.constant 0 : index
    %c0_43 = arith.constant 0 : index
    %94 = vector.load %arg6[%c2, %c0_42, %c0_43] : memref<3x384x128xbf16, #tpu.memory_space<vmem>>, vector<1x384x128xbf16>
    %95 = vector.shape_cast %94 : vector<1x384x128xbf16> to vector<384x128xbf16>
    %cst_44 = arith.constant dense<0.000000e+00> : vector<256x128xf32>
    %96 = tpu.matmul %93, %95, %cst_44 {dimension_numbers = #tpu.dot_dimension_numbers<[1], [0], [0], [1], [0, 0, 1, 1], [], []>} : vector<256x384xbf16>, vector<384x128xbf16>, vector<256x128xf32> -> vector<256x128xf32>
    %97 = arith.addf %92, %96 : vector<256x128xf32>
    %c0_45 = arith.constant 0 : index
    %c0_46 = arith.constant 0 : index
    %98 = vector.load %arg7[%c0_45, %c0_46] : memref<1x128xf32, #tpu.memory_space<vmem>>, vector<1x128xf32>
    %99 = vector.broadcast %98 : vector<1x128xf32> to vector<256x128xf32>
    %100 = arith.addf %97, %99 : vector<256x128xf32>
    %c0_47 = arith.constant 0 : index
    %c0_48 = arith.constant 0 : index
    %c0_49 = arith.constant 0 : index
    %101 = vector.load %arg2[%c0_47, %c0_48, %c0_49] : memref<1x1x128xf32, #tpu.memory_space<vmem>>, vector<1x1x128xf32>
    %102 = vector.shape_cast %101 : vector<1x1x128xf32> to vector<1x128xf32>
    %103 = vector.broadcast %102 : vector<1x128xf32> to vector<256x128xf32>
    %104 = arith.addf %100, %103 : vector<256x128xf32>
    %c0_50 = arith.constant 0 : index
    %c0_51 = arith.constant 0 : index
    %105 = vector.load %arg8[%c0_50, %c0_51] : memref<1x128xf32, #tpu.memory_space<vmem>>, vector<1x128xf32>
    %c0_52 = arith.constant 0 : index
    %c0_53 = arith.constant 0 : index
    %106 = vector.load %arg9[%c0_52, %c0_53] : memref<1x128xf32, #tpu.memory_space<vmem>>, vector<1x128xf32>
    %cst_54 = arith.constant dense<0.000000e+00> : vector<128xf32>
    %107 = vector.multi_reduction <add>, %104, %cst_54 [0] : vector<256x128xf32> to vector<128xf32>
    %108 = vector.shape_cast %107 : vector<128xf32> to vector<1x128xf32>
    %109 = arith.mulf %104, %104 : vector<256x128xf32>
    %cst_55 = arith.constant dense<0.000000e+00> : vector<128xf32>
    %110 = vector.multi_reduction <add>, %109, %cst_55 [0] : vector<256x128xf32> to vector<128xf32>
    %111 = vector.shape_cast %110 : vector<128xf32> to vector<1x128xf32>
    %cst_56 = arith.constant dense<0.000000e+00> : vector<1x128xf32>
    %112 = tpu.matmul %108, %3, %cst_56 {dimension_numbers = #tpu.dot_dimension_numbers<[1], [0], [0], [1], [0, 0, 1, 1], [], []>} : vector<1x128xf32>, vector<128x128xf32>, vector<1x128xf32> -> vector<1x128xf32>
    %cst_57 = arith.constant dense<0.000000e+00> : vector<1x128xf32>
    %113 = tpu.matmul %111, %3, %cst_57 {dimension_numbers = #tpu.dot_dimension_numbers<[1], [0], [0], [1], [0, 0, 1, 1], [], []>} : vector<1x128xf32>, vector<128x128xf32>, vector<1x128xf32> -> vector<1x128xf32>
    %cst_58 = arith.constant 9.765625E-4 : f32
    %114 = vector.broadcast %cst_58 : f32 to vector<1x128xf32>
    %115 = arith.mulf %112, %114 : vector<1x128xf32>
    %cst_59 = arith.constant 9.765625E-4 : f32
    %116 = vector.broadcast %cst_59 : f32 to vector<1x128xf32>
    %117 = arith.mulf %113, %116 : vector<1x128xf32>
    %118 = arith.mulf %115, %115 : vector<1x128xf32>
    %119 = arith.subf %117, %118 : vector<1x128xf32>
    %cst_60 = arith.constant 0.000000e+00 : f32
    %120 = vector.broadcast %cst_60 : f32 to vector<1x128xf32>
    %121 = arith.maximumf %119, %120 : vector<1x128xf32>
    %122 = vector.broadcast %115 : vector<1x128xf32> to vector<256x128xf32>
    %123 = arith.subf %104, %122 : vector<256x128xf32>
    %cst_61 = arith.constant 9.99999997E-7 : f32
    %124 = vector.broadcast %cst_61 : f32 to vector<1x128xf32>
    %125 = arith.addf %121, %124 : vector<1x128xf32>
    %126 = math.rsqrt %125 : vector<1x128xf32>
    %127 = vector.broadcast %126 : vector<1x128xf32> to vector<256x128xf32>
    %128 = arith.mulf %123, %127 : vector<256x128xf32>
    %129 = vector.broadcast %105 : vector<1x128xf32> to vector<256x128xf32>
    %130 = arith.mulf %128, %129 : vector<256x128xf32>
    %131 = vector.broadcast %106 : vector<1x128xf32> to vector<256x128xf32>
    %132 = arith.addf %130, %131 : vector<256x128xf32>
    %cst_62 = arith.constant 0.000000e+00 : f32
    %133 = vector.broadcast %cst_62 : f32 to vector<256x128xf32>
    %134 = arith.subf %133, %132 : vector<256x128xf32>
    %135 = math.exp %134 : vector<256x128xf32>
    %cst_63 = arith.constant 1.000000e+00 : f32
    %136 = vector.broadcast %cst_63 : f32 to vector<256x128xf32>
    %137 = arith.addf %136, %135 : vector<256x128xf32>
    %138 = tpu.reciprocal %137 {approx = true} : vector<256x128xf32> -> vector<256x128xf32>
    %139 = arith.mulf %132, %138 : vector<256x128xf32>
    %cst_64 = arith.constant 0.000000e+00 : f32
    %140 = vector.broadcast %cst_64 : f32 to vector<1x128xf32>
    %141 = vector.extract_strided_slice %139 {offsets = [0, 0], sizes = [255, 128], strides = [1, 1]} : vector<256x128xf32> to vector<255x128xf32>
    %142 = tpu.concatenate %140, %141 in 0 : vector<1x128xf32>, vector<255x128xf32> -> vector<256x128xf32>
    %143 = vector.extract_strided_slice %139 {offsets = [1, 0], sizes = [255, 128], strides = [1, 1]} : vector<256x128xf32> to vector<255x128xf32>
    %144 = tpu.concatenate %143, %140 in 0 : vector<255x128xf32>, vector<1x128xf32> -> vector<256x128xf32>
    %145 = vector.broadcast %24 : vector<256x1xf32> to vector<256x128xf32>
    %146 = arith.mulf %142, %145 : vector<256x128xf32>
    %147 = arith.truncf %146 : vector<256x128xf32> to vector<256x128xbf16>
    %c16_65 = arith.constant 16 : index
    %c0_66 = arith.constant 0 : index
    %148 = vector.load %arg13[%c16_65, %c0_66] : memref<288x384xbf16, #tpu.memory_space<vmem>>, vector<256x128xbf16>
    tpu.vector_store %arg13[%c16_65, %c0_66], %147 {strides = array<i32>} : memref<288x384xbf16, #tpu.memory_space<vmem>>, vector<256x128xbf16>,
    %149 = arith.truncf %139 : vector<256x128xf32> to vector<256x128xbf16>
    %c16_67 = arith.constant 16 : index
    %c128_68 = arith.constant 128 : index
    %150 = vector.load %arg13[%c16_67, %c128_68] : memref<288x384xbf16, #tpu.memory_space<vmem>>, vector<256x128xbf16>
    tpu.vector_store %arg13[%c16_67, %c128_68], %149 {strides = array<i32>} : memref<288x384xbf16, #tpu.memory_space<vmem>>, vector<256x128xbf16>,
    %151 = vector.broadcast %28 : vector<256x1xf32> to vector<256x128xf32>
    %152 = arith.mulf %144, %151 : vector<256x128xf32>
    %153 = arith.truncf %152 : vector<256x128xf32> to vector<256x128xbf16>
    %c16_69 = arith.constant 16 : index
    %c256_70 = arith.constant 256 : index
    %154 = vector.load %arg13[%c16_69, %c256_70] : memref<288x384xbf16, #tpu.memory_space<vmem>>, vector<256x128xbf16>
    tpu.vector_store %arg13[%c16_69, %c256_70], %153 {strides = array<i32>} : memref<288x384xbf16, #tpu.memory_space<vmem>>, vector<256x128xbf16>,
    %cst_71 = arith.constant 0.000000e+00 : f32
    %155 = vector.broadcast %cst_71 : f32 to vector<256x128xf32>
    %c0_72 = arith.constant 0 : index
    %c0_73 = arith.constant 0 : index
    %156 = vector.load %arg13[%c0_72, %c0_73] : memref<288x384xbf16, #tpu.memory_space<vmem>>, vector<256x384xbf16>
    %c0_74 = arith.constant 0 : index
    %c0_75 = arith.constant 0 : index
    %c0_76 = arith.constant 0 : index
    %157 = vector.load %arg10[%c0_74, %c0_75, %c0_76] : memref<3x384x128xbf16, #tpu.memory_space<vmem>>, vector<1x384x128xbf16>
    %158 = vector.shape_cast %157 : vector<1x384x128xbf16> to vector<384x128xbf16>
    %cst_77 = arith.constant dense<0.000000e+00> : vector<256x128xf32>
    %159 = tpu.matmul %156, %158, %cst_77 {dimension_numbers = #tpu.dot_dimension_numbers<[1], [0], [0], [1], [0, 0, 1, 1], [], []>} : vector<256x384xbf16>, vector<384x128xbf16>, vector<256x128xf32> -> vector<256x128xf32>
    %160 = arith.addf %155, %159 : vector<256x128xf32>
    %c16_78 = arith.constant 16 : index
    %c0_79 = arith.constant 0 : index
    %161 = vector.load %arg13[%c16_78, %c0_79] : memref<288x384xbf16, #tpu.memory_space<vmem>>, vector<256x384xbf16>
    %c1_80 = arith.constant 1 : index
    %c0_81 = arith.constant 0 : index
    %c0_82 = arith.constant 0 : index
    %162 = vector.load %arg10[%c1_80, %c0_81, %c0_82] : memref<3x384x128xbf16, #tpu.memory_space<vmem>>, vector<1x384x128xbf16>
    %163 = vector.shape_cast %162 : vector<1x384x128xbf16> to vector<384x128xbf16>
    %cst_83 = arith.constant dense<0.000000e+00> : vector<256x128xf32>
    %164 = tpu.matmul %161, %163, %cst_83 {dimension_numbers = #tpu.dot_dimension_numbers<[1], [0], [0], [1], [0, 0, 1, 1], [], []>} : vector<256x384xbf16>, vector<384x128xbf16>, vector<256x128xf32> -> vector<256x128xf32>
    %165 = arith.addf %160, %164 : vector<256x128xf32>
    %c32_84 = arith.constant 32 : index
    %c0_85 = arith.constant 0 : index
    %166 = vector.load %arg13[%c32_84, %c0_85] : memref<288x384xbf16, #tpu.memory_space<vmem>>, vector<256x384xbf16>
    %c2_86 = arith.constant 2 : index
    %c0_87 = arith.constant 0 : index
    %c0_88 = arith.constant 0 : index
    %167 = vector.load %arg10[%c2_86, %c0_87, %c0_88] : memref<3x384x128xbf16, #tpu.memory_space<vmem>>, vector<1x384x128xbf16>
    %168 = vector.shape_cast %167 : vector<1x384x128xbf16> to vector<384x128xbf16>
    %cst_89 = arith.constant dense<0.000000e+00> : vector<256x128xf32>
    %169 = tpu.matmul %166, %168, %cst_89 {dimension_numbers = #tpu.dot_dimension_numbers<[1], [0], [0], [1], [0, 0, 1, 1], [], []>} : vector<256x384xbf16>, vector<384x128xbf16>, vector<256x128xf32> -> vector<256x128xf32>
    %170 = arith.addf %165, %169 : vector<256x128xf32>
    %c0_90 = arith.constant 0 : index
    %c0_91 = arith.constant 0 : index
    %171 = vector.load %arg11[%c0_90, %c0_91] : memref<1x128xf32, #tpu.memory_space<vmem>>, vector<1x128xf32>
    %172 = vector.broadcast %171 : vector<1x128xf32> to vector<256x128xf32>
    %173 = arith.addf %170, %172 : vector<256x128xf32>
    %174 = arith.addf %2, %173 : vector<256x128xf32>
    %175 = arith.truncf %174 : vector<256x128xf32> to vector<256x128xbf16>
    %c0_92 = arith.constant 0 : index
    %c0_93 = arith.constant 0 : index
    %c0_94 = arith.constant 0 : index
    %176 = vector.load %arg12[%c0_92, %c0_93, %c0_94] : memref<1x256x128xbf16, #tpu.memory_space<vmem>>, vector<1x256x128xbf16>
    %177 = vector.shape_cast %176 : vector<1x256x128xbf16> to vector<256x128xbf16>
    %178 = vector.shape_cast %175 : vector<256x128xbf16> to vector<1x256x128xbf16>
    tpu.vector_store %arg12[%c0_92, %c0_93, %c0_94], %178 {strides = array<i32>} : memref<1x256x128xbf16, #tpu.memory_space<vmem>>, vector<1x256x128xbf16>,
    return
  }
  func.func @transform_0(%arg0: i32) -> (i32, i32, i32) {
    %c0_i32 = arith.constant 0 : i32
    %c0_i32_0 = arith.constant 0 : i32
    %c0_i32_1 = arith.constant 0 : i32
    return %arg0, %c0_i32, %c0_i32_0 : i32, i32, i32
  }
  func.func @transform_1(%arg0: i32) -> (i32, i32, i32) {
    %c0_i32 = arith.constant 0 : i32
    %c0_i32_0 = arith.constant 0 : i32
    %c0_i32_1 = arith.constant 0 : i32
    return %arg0, %c0_i32, %c0_i32_0 : i32, i32, i32
  }
  func.func @transform_2(%arg0: i32) -> (i32, i32) {
    %c0_i32 = arith.constant 0 : i32
    %c0_i32_0 = arith.constant 0 : i32
    %c0_i32_1 = arith.constant 0 : i32
    return %c0_i32, %c0_i32_0 : i32, i32
  }
  func.func @transform_3(%arg0: i32) -> (i32, i32) {
    %c0_i32 = arith.constant 0 : i32
    %c0_i32_0 = arith.constant 0 : i32
    %c0_i32_1 = arith.constant 0 : i32
    return %c0_i32, %c0_i32_0 : i32, i32
  }
  func.func @transform_4(%arg0: i32) -> (i32, i32) {
    %c0_i32 = arith.constant 0 : i32
    %c0_i32_0 = arith.constant 0 : i32
    %c0_i32_1 = arith.constant 0 : i32
    return %c0_i32, %c0_i32_0 : i32, i32
  }
  func.func @transform_5(%arg0: i32) -> (i32, i32, i32) {
    %c0_i32 = arith.constant 0 : i32
    %c0_i32_0 = arith.constant 0 : i32
    %c0_i32_1 = arith.constant 0 : i32
    %c0_i32_2 = arith.constant 0 : i32
    return %c0_i32, %c0_i32_0, %c0_i32_1 : i32, i32, i32
  }
  func.func @transform_6(%arg0: i32) -> (i32, i32) {
    %c0_i32 = arith.constant 0 : i32
    %c0_i32_0 = arith.constant 0 : i32
    %c0_i32_1 = arith.constant 0 : i32
    return %c0_i32, %c0_i32_0 : i32, i32
  }
  func.func @transform_7(%arg0: i32) -> (i32, i32) {
    %c0_i32 = arith.constant 0 : i32
    %c0_i32_0 = arith.constant 0 : i32
    %c0_i32_1 = arith.constant 0 : i32
    return %c0_i32, %c0_i32_0 : i32, i32
  }
  func.func @transform_8(%arg0: i32) -> (i32, i32) {
    %c0_i32 = arith.constant 0 : i32
    %c0_i32_0 = arith.constant 0 : i32
    %c0_i32_1 = arith.constant 0 : i32
    return %c0_i32, %c0_i32_0 : i32, i32
  }
  func.func @transform_9(%arg0: i32) -> (i32, i32, i32) {
    %c0_i32 = arith.constant 0 : i32
    %c0_i32_0 = arith.constant 0 : i32
    %c0_i32_1 = arith.constant 0 : i32
    %c0_i32_2 = arith.constant 0 : i32
    return %c0_i32, %c0_i32_0, %c0_i32_1 : i32, i32, i32
  }
  func.func @transform_10(%arg0: i32) -> (i32, i32) {
    %c0_i32 = arith.constant 0 : i32
    %c0_i32_0 = arith.constant 0 : i32
    %c0_i32_1 = arith.constant 0 : i32
    return %c0_i32, %c0_i32_0 : i32, i32
  }
  func.func @transform_11(%arg0: i32) -> (i32, i32, i32) {
    %c0_i32 = arith.constant 0 : i32
    %c0_i32_0 = arith.constant 0 : i32
    %c0_i32_1 = arith.constant 0 : i32
    return %arg0, %c0_i32, %c0_i32_0 : i32, i32, i32
  }
}

</mosaic_0001>

<bundles_post_ra>
// kernel: resnet_block.1
= control target key start
LH: loop header
LB: loop body
LE: loop exit
PB: predicated region body
PF: predicated region fallthrough
CT: control target
= control target key end

     0   :  { %s9624_s17 = smov 0   ;;  %s13180_s0 = inlined_call_operand.vmem [shape: bf16[2,256,128], index: 0, kind: input, shape index: {}, may-alias: {0,11}]   ;;  %s13181_s1 = inlined_call_operand.vmem [shape: f32[2,1,128], index: 1, kind: input, shape index: {}]   ;;  %s13182_s2 = inlined_call_operand.vmem [shape: f32[128,128], index: 2, kind: input, shape index: {}]   ;;  %s13183_s3 = inlined_call_operand.vmem [shape: f32[1,128], index: 3, kind: input, shape index: {}]   ;;  %s13184_s4 = inlined_call_operand.vmem [shape: f32[1,128], index: 4, kind: input, shape index: {}]   ;;  %s13185_s5 = inlined_call_operand.vmem [shape: bf16[3,384,128], index: 5, kind: input, shape index: {}]   ;;  %s13186_s6 = inlined_call_operand.vmem [shape: f32[1,128], index: 6, kind: input, shape index: {}]   ;;  %s13187_s7 = inlined_call_operand.vmem [shape: f32[1,128], index: 7, kind: input, shape index: {}]   ;;  %s13188_s8 = inlined_call_operand.vmem [shape: f32[1,128], index: 8, kind: input, shape index: {}]   ;;  %s13189_s9 = inlined_call_operand.vmem [shape: bf16[3,384,128], index: 9, kind: input, shape index: {}]   ;;  %s13190_s10 = inlined_call_operand.vmem [shape: f32[1,128], index: 10, kind: input, shape index: {}]   ;;  %s13191_s11 = inlined_call_operand.vmem [shape: bf16[2,256,128], index: 11, kind: output, shape index: {}, may-alias: {0,11}]  }
   0x1 LB: > { %s6780_s18 = sadd.s32 4294967295, %s9558_s17   ;;  %p6784_p0 = scmp.ge.s32.totalorder %s9558_s17, 1  ;;  %s9558_s17 = sphi %s9624_s17, %s21_s17  }
   0x2   : > { %p345_p1 = scmp.lt.s32.totalorder %s9558_s17, 3 }
   0x4   : > { %p346_p2 = pnand %p6784_p0, %p345_p1 }
   0x6   : > { %349 = sbr.rel (%p346_p2) target bundleno = 1922 (0x782), region = 64 }
   0xd   : > { %v466_v0 = vld [vmem:[%s13182_s2] sm:$0xff]  ;;  %v467_v1 = vld [vmem:[%s13182_s2 + $0x8] sm:$0xff]  ;;  %v468_v2 = vld [vmem:[%s13182_s2 + $0x10] sm:$0xff]  ;;  %v13192_v3 = vmov 0.0|0.0   ;;  %vm9561_vm0 = vmmov 0   ;;  %v13198_v6 = vmov 0.0  }
   0xe   : > { %8718 = vmatprep.subr.bf16.mxu0 %v13192_v3  ;;  %v9642_v4 = vpack.c.bf16 %v467_v1, %v466_v0  ;;  %v469_v5 = vld [vmem:[%s13182_s2 + $0x18] sm:$0xff]  ;;  %8322 = vmatprep.mubr.msk.f32.mxu0 %vm9561_vm0, %v13198_v6  ;;  %p388_p3 = scmp.lt.s32.totalorder %s6780_s18, 1  ;;  %v470_v8 = vld [vmem:[%s13182_s2 + $0x20] sm:$0xff]  ;;  %v471_v9 = vld [vmem:[%s13182_s2 + $0x28] sm:$0xff] }
   0xf   : > { %v9650_v7 = vpack.c.bf16 %v469_v5, %v468_v2  ;;  %v9670_v10 = vpack.c.bf16 %v471_v9, %v470_v8  ;;  %v472_v11 = vld [vmem:[%s13182_s2 + $0x30] sm:$0xff]  ;;  %v473_v12 = vld [vmem:[%s13182_s2 + $0x38] sm:$0xff]  ;;  %v474_v15 = vld [vmem:[%s13182_s2 + $0x40] sm:$0xff] }
  0x10   : > { %13319 = vst [vmem:[#allocation3_spill] sm:$0xff] %v9642_v4  ;;  %8720 = vmatpush3.bf16.msra.mxu0 %v9642_v4  ;;  %s13591_s18 = smov (!%p388_p3, %s6780_s18), 1  ;;  %v9681_v14 = vpack.c.bf16 %v473_v12, %v472_v11  ;;  %v475_v17 = vld [vmem:[%s13182_s2 + $0x48] sm:$0xff]  ;;  %v476_v21 = vld [vmem:[%s13182_s2 + $0x50] sm:$0xff]  ;;  %v477_v22 = vld [vmem:[%s13182_s2 + $0x58] sm:$0xff] }
  0x11   : > { %13320 = vst [vmem:[#allocation4_spill] sm:$0xff] %v9650_v7  ;;  %8721 = vmatprep.subr.bf16.mxu0 %v13192_v3  ;;  %s7198_s12 = sshll.u32 %s13591_s18, 7  ;;  %13321 = vst [vmem:[#allocation5_spill] sm:$0xff] %v9670_v10  ;;  %v9705_v24 = vpack.c.bf16 %v475_v17, %v474_v15  ;;  %v478_v28 = vld [vmem:[%s13182_s2 + $0x60] sm:$0xff]  ;;  %v479_v29 = vld [vmem:[%s13182_s2 + $0x68] sm:$0xff]  ;;  %v9723_v32 = vpack.c.bf16 %v477_v22, %v476_v21  ;;  %s395_s14 = scalar_lea.vmem %s13181_s1, %s13591_s18 }
  0x12   : > { %s9667_s15 = scalar_lea.vmem %s13180_s0, %s7198_s12  ;;  %13322 = vst [vmem:[#allocation6_spill] sm:$0xff] %v9681_v14  ;;  %v480_v38 = vld [vmem:[%s13182_s2 + $0x70] sm:$0xff]  ;;  %v481_v39 = vld [vmem:[%s13182_s2 + $0x78] sm:$0xff]  ;;  %v9744_v42 = vpack.c.bf16 %v479_v29, %v478_v28  ;;  %s13073_s27 = scalar_lea.vmem %s13191_s11, %s7198_s12 }
  0x13   : > { %v7233_v13 = vld [vmem:[%s9667_s15] sm:$0xff]   ;;  %v7376_v16 = vld [vmem:[%s9667_s15 + $0x8] sm:$0xff]   ;;  %v7377_v20 = vld [vmem:[%s9667_s15 + $0x10] sm:$0xff]   ;;  %13326 = vst [vmem:[#allocation10_spill] sm:$0xff] %v9705_v24  ;;  %v9759_v51 = vpack.c.bf16 %v481_v39, %v480_v38 }
  0x14   : > { %8723 = vmatpush3.bf16.msra.mxu0 %v9650_v7  ;;  %v9691_v18 = vunpack.c.l.bf16 %v7233_v13  ;;  %v9693_v19 = vunpack.c.h.bf16 %v7233_v13  ;;  %v9702_v23 = vunpack.c.l.bf16 %v7376_v16  ;;  %v9708_v25 = vunpack.c.h.bf16 %v7376_v16  ;;  %v7378_v27 = vld [vmem:[%s9667_s15 + $0x18] sm:$0xff]   ;;  %13329 = vst [vmem:[#allocation13_spill] sm:$0xff] %v9723_v32  ;;  %v7379_v35 = vld [vmem:[%s9667_s15 + $0x20] sm:$0xff]   ;;  %13332 = vst [vmem:[#allocation16_spill] sm:$0xff] %v9744_v42 }
  0x15   : > { %8724 = vmatprep.subr.bf16.mxu0 %v13192_v3  ;;  %v9719_v30 = vunpack.c.l.bf16 %v7377_v20  ;;  %v9726_v33 = vunpack.c.h.bf16 %v7377_v20  ;;  %v9740_v40 = vunpack.c.l.bf16 %v7378_v27  ;;  %v9749_v44 = vunpack.c.h.bf16 %v7378_v27  ;;  %v7380_v46 = vld [vmem:[%s9667_s15 + $0x28] sm:$0xff]   ;;  %13335 = vst [vmem:[#allocation19_spill] sm:$0xff] %v9759_v51  ;;  %v7381_v56 = vld [vmem:[%s9667_s15 + $0x30] sm:$0xff]   ;;  %v7382_v1 = vld [vmem:[%s9667_s15 + $0x38] sm:$0xff]  }
  0x16   : > { %13323 = vst [vmem:[#allocation7_spill] sm:$0xff] %v9691_v18  ;;  %13324 = vst [vmem:[#allocation8_spill] sm:$0xff] %v9693_v19  ;;  %v1099_v26 = vadd.f32 %v9693_v19, %v9691_v18  ;;  %v1136_v36 = vmul.f32 %v9691_v18, %v9691_v18  ;;  %v1137_v37 = vmul.f32 %v9693_v19, %v9693_v19  ;;  %v9755_v49 = vunpack.c.l.bf16 %v7379_v35  ;;  %v7383_v16 = vld [vmem:[%s9667_s15 + $0x40] sm:$0xff]  }
  0x17   : > { %13325 = vst [vmem:[#allocation9_spill] sm:$0xff] %v9702_v23  ;;  %13327 = vst [vmem:[#allocation11_spill] sm:$0xff] %v9708_v25  ;;  %v1138_v43 = vmul.f32 %v9702_v23, %v9702_v23  ;;  %v1139_v47 = vmul.f32 %v9708_v25, %v9708_v25  ;;  %v1140_v52 = vmul.f32 %v9719_v30, %v9719_v30  ;;  %v9764_v54 = vunpack.c.h.bf16 %v7379_v35 }
  0x18   : > { %8726 = vmatpush3.bf16.msra.mxu0 %v9670_v10  ;;  %13328 = vst [vmem:[#allocation12_spill] sm:$0xff] %v9719_v30  ;;  %v1100_v31 = vadd.f32 %v9702_v23, %v1099_v26  ;;  %13330 = vst [vmem:[#allocation14_spill] sm:$0xff] %v9726_v33  ;;  %v1168_v48 = vadd.f32 %v1137_v37, %v1136_v36  ;;  %v1141_v57 = vmul.f32 %v9726_v33, %v9726_v33 }
  0x19   : > { %8727 = vmatprep.subr.bf16.mxu0 %v13192_v3  ;;  %13331 = vst [vmem:[#allocation15_spill] sm:$0xff] %v9740_v40  ;;  %13333 = vst [vmem:[#allocation17_spill] sm:$0xff] %v9749_v44  ;;  %v9770_v59 = vunpack.c.l.bf16 %v7380_v46  ;;  %v1142_v61 = vmul.f32 %v9740_v40, %v9740_v40  ;;  %v9777_v63 = vunpack.c.h.bf16 %v7380_v46  ;;  %v1143_v2 = vmul.f32 %v9749_v44, %v9749_v44 }
  0x1a   : > { %v1101_v34 = vadd.f32 %v9708_v25, %v1100_v31  ;;  %13334 = vst [vmem:[#allocation18_spill] sm:$0xff] %v9755_v49  ;;  %v1169_v53 = vadd.f32 %v1168_v48, %v1138_v43  ;;  %13336 = vst [vmem:[#allocation20_spill] sm:$0xff] %v9764_v54  ;;  %v9783_v8 = vunpack.c.l.bf16 %v7381_v56  ;;  %v1144_v11 = vmul.f32 %v9755_v49, %v9755_v49  ;;  %v7384_v31 = vld [vmem:[%s9667_s15 + $0x48] sm:$0xff]  }
  0x1b   : > { %13337 = vst [vmem:[#allocation21_spill] sm:$0xff] %v9770_v59  ;;  %13338 = vst [vmem:[#allocation22_spill] sm:$0xff] %v9777_v63  ;;  %v9788_v13 = vunpack.c.h.bf16 %v7381_v56  ;;  %v1145_v17 = vmul.f32 %v9764_v54, %v9764_v54  ;;  %v9794_v21 = vunpack.c.l.bf16 %v7382_v1  ;;  %v1146_v26 = vmul.f32 %v9770_v59, %v9770_v59 }
  0x1c   : > { %8729 = vmatpush3.bf16.msra.mxu0 %v9681_v14  ;;  %v1102_v41 = vadd.f32 %v9719_v30, %v1101_v34  ;;  %v1170_v58 = vadd.f32 %v1169_v53, %v1139_v47  ;;  %13339 = vst [vmem:[#allocation23_spill] sm:$0xff] %v9783_v8  ;;  %v9799_v28 = vunpack.c.h.bf16 %v7382_v1  ;;  %v1147_v34 = vmul.f32 %v9777_v63, %v9777_v63 }
  0x1d   : > { %8730 = vmatprep.subr.bf16.mxu0 %v13192_v3  ;;  %13340 = vst [vmem:[#allocation24_spill] sm:$0xff] %v9788_v13  ;;  %13341 = vst [vmem:[#allocation25_spill] sm:$0xff] %v9794_v21  ;;  %v9805_v36 = vunpack.c.l.bf16 %v7383_v16  ;;  %v1148_v38 = vmul.f32 %v9783_v8, %v9783_v8  ;;  %v1149_v46 = vmul.f32 %v9788_v13, %v9788_v13  ;;  %v9816_v48 = vunpack.c.l.bf16 %v7384_v31 }
  0x1e   : > { %v1103_v45 = vadd.f32 %v9726_v33, %v1102_v41  ;;  %v1171_v62 = vadd.f32 %v1170_v58, %v1140_v52  ;;  %13342 = vst [vmem:[#allocation26_spill] sm:$0xff] %v9799_v28  ;;  %v9810_v41 = vunpack.c.h.bf16 %v7383_v16  ;;  %v1150_v52 = vmul.f32 %v9794_v21, %v9794_v21 }
  0x1f   : > { %13343 = vst [vmem:[#allocation27_spill] sm:$0xff] %v9805_v36  ;;  %13345 = vst [vmem:[#allocation29_spill] sm:$0xff] %v9816_v48  ;;  %v1151_v58 = vmul.f32 %v9799_v28, %v9799_v28 }
  0x20   : > { %8732 = vmatpush3.bf16.msra.mxu0 %v9705_v24  ;;  %v1104_v50 = vadd.f32 %v9740_v40, %v1103_v45  ;;  %v1172_v5 = vadd.f32 %v1171_v62, %v1141_v57  ;;  %13344 = vst [vmem:[#allocation28_spill] sm:$0xff] %v9810_v41  ;;  %v7385_v45 = vld [vmem:[%s9667_s15 + $0x50] sm:$0xff]   ;;  %v7386_v57 = vld [vmem:[%s9667_s15 + $0x58] sm:$0xff]  }
  0x21   : > { %8733 = vmatprep.subr.bf16.mxu0 %v13192_v3 }
  0x22   : > { %v1105_v55 = vadd.f32 %v9749_v44, %v1104_v50  ;;  %v1173_v12 = vadd.f32 %v1172_v5, %v1142_v61  ;;  %v9827_v61 = vunpack.c.l.bf16 %v7385_v45 }
  0x24   : > { %8735 = vmatpush3.bf16.msra.mxu0 %v9723_v32  ;;  %v1106_v60 = vadd.f32 %v9755_v49, %v1105_v55  ;;  %v1174_v20 = vadd.f32 %v1173_v12, %v1143_v2  ;;  %v9821_v55 = vunpack.c.h.bf16 %v7384_v31  ;;  %13347 = vst [vmem:[#allocation31_spill] sm:$0xff] %v9827_v61  ;;  %v9832_v2 = vunpack.c.h.bf16 %v7385_v45  ;;  %v7389_v45 = vld [vmem:[%s9667_s15 + $0x70] sm:$0xff]  }
  0x25   : > { %8736 = vmatprep.subr.bf16.mxu0 %v13192_v3 }
  0x26   : > { %v1107_v0 = vadd.f32 %v9764_v54, %v1106_v60  ;;  %v1175_v27 = vadd.f32 %v1174_v20, %v1144_v11  ;;  %13346 = vst [vmem:[#allocation30_spill] sm:$0xff] %v9821_v55  ;;  %13348 = vst [vmem:[#allocation32_spill] sm:$0xff] %v9832_v2  ;;  %v1153_v11 = vmul.f32 %v9810_v41, %v9810_v41 }
  0x28   : > { %8738 = vmatpush3.bf16.msra.mxu0 %v9744_v42  ;;  %v1108_v9 = vadd.f32 %v9770_v59, %v1107_v0  ;;  %v1176_v35 = vadd.f32 %v1175_v27, %v1145_v17  ;;  %v1152_v0 = vmul.f32 %v9805_v36, %v9805_v36  ;;  %v1154_v17 = vmul.f32 %v9816_v48, %v9816_v48  ;;  %v7388_v27 = vld [vmem:[%s9667_s15 + $0x68] sm:$0xff]  }
  0x29   : > { %8739 = vmatprep.subr.bf16.mxu0 %v13192_v3 }
  0x2a   : > { %v1109_v15 = vadd.f32 %v9777_v63, %v1108_v9  ;;  %v1177_v39 = vadd.f32 %v1176_v35, %v1146_v26  ;;  %v7387_v9 = vld [vmem:[%s9667_s15 + $0x60] sm:$0xff]  }
  0x2c   : > { %8741 = vmatpush3.bf16.msra.mxu0 %v9759_v51  ;;  %v1110_v22 = vadd.f32 %v9783_v8, %v1109_v15  ;;  %v1178_v47 = vadd.f32 %v1177_v39, %v1147_v34  ;;  %v9838_v15 = vunpack.c.l.bf16 %v7386_v57  ;;  %v9849_v34 = vunpack.c.l.bf16 %v7387_v9 }
  0x2d   : > { %8742 = vmatprep.subr.bf16.mxu0 %v13192_v3  ;;  %v9854_v39 = vunpack.c.h.bf16 %v7387_v9 }
  0x2e   : > { %v1111_v29 = vadd.f32 %v9788_v13, %v1110_v22  ;;  %v1179_v53 = vadd.f32 %v1178_v47, %v1148_v38  ;;  %13349 = vst [vmem:[#allocation33_spill] sm:$0xff] %v9838_v15  ;;  %v9843_v22 = vunpack.c.h.bf16 %v7386_v57  ;;  %13351 = vst [vmem:[#allocation35_spill] sm:$0xff] %v9849_v34  ;;  %v9865_v57 = vunpack.c.h.bf16 %v7388_v27 }
  0x2f   : > { %13352 = vst [vmem:[#allocation36_spill] sm:$0xff] %v9854_v39  ;;  %v1160_v9 = vmul.f32 %v9849_v34, %v9849_v34 }
  0x30   : > { %v1112_v37 = vadd.f32 %v9794_v21, %v1111_v29  ;;  %v1180_v60 = vadd.f32 %v1179_v53, %v1149_v46  ;;  %13350 = vst [vmem:[#allocation34_spill] sm:$0xff] %v9843_v22  ;;  %v1155_v29 = vmul.f32 %v9821_v55, %v9821_v55  ;;  %v1157_v46 = vmul.f32 %v9832_v2, %v9832_v2 }
  0x31   : > { %v1158_v53 = vmul.f32 %v9838_v15, %v9838_v15  ;;  %13354 = vst [vmem:[#allocation38_spill] sm:$0xff] %v9865_v57 }
  0x32   : > { %v1113_v43 = vadd.f32 %v9799_v28, %v1112_v37  ;;  %v1181_v1 = vadd.f32 %v1180_v60, %v1150_v52  ;;  %v1156_v37 = vmul.f32 %v9827_v61, %v9827_v61  ;;  %v7390_v60 = vld [vmem:[%s9667_s15 + $0x78] sm:$0xff]  }
  0x34   : > { %v1114_v50 = vadd.f32 %v9805_v36, %v1113_v43  ;;  %v1182_v12 = vadd.f32 %v1181_v1, %v1151_v58  ;;  %v9871_v1 = vunpack.c.l.bf16 %v7389_v45 }
  0x36   : > { %v1115_v56 = vadd.f32 %v9810_v41, %v1114_v50  ;;  %v1183_v20 = vadd.f32 %v1182_v12, %v1152_v0  ;;  %v9860_v50 = vunpack.c.l.bf16 %v7388_v27  ;;  %13355 = vst [vmem:[#allocation39_spill] sm:$0xff] %v9871_v1  ;;  %v9876_v12 = vunpack.c.h.bf16 %v7389_v45 }
  0x38   : > { %v1116_v62 = vadd.f32 %v9816_v48, %v1115_v56  ;;  %v1184_v31 = vadd.f32 %v1183_v20, %v1153_v11  ;;  %13353 = vst [vmem:[#allocation37_spill] sm:$0xff] %v9860_v50  ;;  %13356 = vst [vmem:[#allocation40_spill] sm:$0xff] %v9876_v12 }
  0x3a   : > { %v1117_v5 = vadd.f32 %v9821_v55, %v1116_v62  ;;  %v1185_v38 = vadd.f32 %v1184_v31, %v1154_v17  ;;  %v1159_v62 = vmul.f32 %v9843_v22, %v9843_v22  ;;  %v1161_v17 = vmul.f32 %v9854_v39, %v9854_v39 }
  0x3c   : > { %v1118_v16 = vadd.f32 %v9827_v61, %v1117_v5  ;;  %v1186_v47 = vadd.f32 %v1185_v38, %v1155_v29  ;;  %v1162_v29 = vmul.f32 %v9860_v50, %v9860_v50  ;;  %v1163_v38 = vmul.f32 %v9865_v57, %v9865_v57 }
  0x3e   : > { %v1119_v26 = vadd.f32 %v9832_v2, %v1118_v16  ;;  %v1187_v56 = vadd.f32 %v1186_v47, %v1156_v37 }
  0x40   : > { %v1120_v35 = vadd.f32 %v9838_v15, %v1119_v26  ;;  %v1188_v0 = vadd.f32 %v1187_v56, %v1157_v46  ;;  %v9881_v26 = vunpack.c.l.bf16 %v7390_v60  ;;  %v1164_v46 = vmul.f32 %v9871_v1, %v9871_v1 }
  0x42   : > { %v1121_v43 = vadd.f32 %v9843_v22, %v1120_v35  ;;  %v1189_v11 = vadd.f32 %v1188_v0, %v1158_v53  ;;  %13357 = vst [vmem:[#allocation41_spill] sm:$0xff] %v9881_v26  ;;  %v9886_v35 = vunpack.c.h.bf16 %v7390_v60  ;;  %v1165_v53 = vmul.f32 %v9876_v12, %v9876_v12 }
  0x43   : > { %v1166_v60 = vmul.f32 %v9881_v26, %v9881_v26 }
  0x44   : > { %v1122_v52 = vadd.f32 %v9849_v34, %v1121_v43  ;;  %v1190_v20 = vadd.f32 %v1189_v11, %v1159_v62  ;;  %13358 = vst [vmem:[#allocation42_spill] sm:$0xff] %v9886_v35 }
  0x46   : > { %v1123_v58 = vadd.f32 %v9854_v39, %v1122_v52  ;;  %v1191_v31 = vadd.f32 %v1190_v20, %v1160_v9 }
  0x48   : > { %v1124_v5 = vadd.f32 %v9860_v50, %v1123_v58  ;;  %v1192_v43 = vadd.f32 %v1191_v31, %v1161_v17 }
  0x4a   : > { %v1125_v16 = vadd.f32 %v9865_v57, %v1124_v5  ;;  %v1193_v47 = vadd.f32 %v1192_v43, %v1162_v29  ;;  %v1167_v5 = vmul.f32 %v9886_v35, %v9886_v35 }
  0x4c   : > { %v1126_v27 = vadd.f32 %v9871_v1, %v1125_v16  ;;  %v1194_v56 = vadd.f32 %v1193_v47, %v1163_v38  ;;  %v9146_v47 = vld [vmem:[%s13185_s5 + $0x100] sm:$0xff]  }
  0x4e   : > { %v1127_v37 = vadd.f32 %v9876_v12, %v1126_v27  ;;  %v1195_v62 = vadd.f32 %v1194_v56, %v1164_v46  ;;  %v9149_v56 = vld [vmem:[%s13185_s5 + $0x108] sm:$0xff]  }
  0x50   : > { %v1128_v45 = vadd.f32 %v9881_v26, %v1127_v37  ;;  %v1196_v9 = vadd.f32 %v1195_v62, %v1165_v53  ;;  %v9148_v53 = vld [vmem:[%s13185_s5 + $0xc0] sm:$0xff]   ;;  %v9152_v62 = vld [vmem:[%s13185_s5 + $0x110] sm:$0xff]  }
  0x52   : > { %v1129_v52 = vadd.f32 %v9886_v35, %v1128_v45  ;;  %v1197_v16 = vadd.f32 %v1196_v9, %v1166_v60  ;;  %v9151_v60 = vld [vmem:[%s13185_s5 + $0xc8] sm:$0xff]   ;;  %v9155_v9 = vld [vmem:[%s13185_s5 + $0x118] sm:$0xff]  }
  0x54   : > { %v1130_v58 = vrot.slane %v1129_v52, 4  ;;  %v1198_v20 = vadd.f32 %v1197_v16, %v1167_v5  ;;  %v9154_v5 = vld [vmem:[%s13185_s5 + $0xd0] sm:$0xff]   ;;  %v9157_v16 = vld [vmem:[%s13185_s5 + $0xd8] sm:$0xff]  }
  0x56   : > { %v1131_v0 = vadd.f32 %v1130_v58, %v1129_v52  ;;  %v1199_v29 = vrot.slane %v1198_v20, 4  ;;  %v9147_v52 = vld [vmem:[%s13185_s5 + $0x140] sm:$0xff]   ;;  %v9150_v58 = vld [vmem:[%s13185_s5 + $0x148] sm:$0xff]  }
  0x57   : > { %8360 = vmatprep.subr.bf16.mxu1 %v9147_v52 }
  0x58   : > { %v1132_v11 = vrot.slane %v1131_v0, 2  ;;  %v1200_v37 = vadd.f32 %v1199_v29, %v1198_v20  ;;  %8361 = vmatpush3.bf16.msra.mxu1 %v9147_v52  ;;  %v9159_v20 = vld [vmem:[%s13185_s5 + $0x160] sm:$0xff]   ;;  %v9161_v29 = vld [vmem:[%s13185_s5 + $0x128] sm:$0xff]   ;;  %v9169_v52 = vld [vmem:[%s13185_s5 + $0xf8] sm:$0xff]  }
  0x59   : > { %8362 = vmatprep.subr.bf16.mxu1 %v9150_v58 }
  0x5a   : > { %v1133_v17 = vadd.f32 %v1132_v11, %v1131_v0  ;;  %v1201_v38 = vrot.slane %v1200_v37, 2  ;;  %v9153_v0 = vld [vmem:[%s13185_s5 + $0x150] sm:$0xff]   ;;  %v9156_v11 = vld [vmem:[%s13185_s5 + $0x158] sm:$0xff]  }
  0x5c   : > { %v1134_v27 = vrot.slane %v1133_v17, 1  ;;  %v1202_v43 = vadd.f32 %v1201_v38, %v1200_v37  ;;  %8363 = vmatpush3.bf16.msra.mxu1 %v9150_v58  ;;  %v9163_v37 = vld [vmem:[%s13185_s5 + $0xe8] sm:$0xff]   ;;  %v9164_v38 = vld [vmem:[%s13185_s5 + $0x130] sm:$0xff]  }
  0x5d   : > { %8364 = vmatprep.subr.bf16.mxu1 %v9153_v0 }
  0x5e   : > { %v1135_v31 = vadd.f32 %v1134_v27, %v1133_v17  ;;  %v1203_v45 = vrot.slane %v1202_v43, 1  ;;  %v9158_v17 = vld [vmem:[%s13185_s5 + $0x120] sm:$0xff]  }
  0x5f   : > { %v9160_v27 = vld [vmem:[%s13185_s5 + $0xe0] sm:$0xff]  }
  0x60   : > { %8323 = vmatmul.mubr.f32.vlgmr.msra.gmra.mrb[0].mxu0 %v1135_v31  ;;  %v1204_v46 = vadd.f32 %v1203_v45, %v1202_v43  ;;  %8365 = vmatpush3.bf16.msra.mxu1 %v9153_v0  ;;  %v9162_v31 = vld [vmem:[%s13185_s5 + $0x168] sm:$0xff]   ;;  %v9165_v43 = vld [vmem:[%s13185_s5 + $0x170] sm:$0xff]  }
  0x61   : > { %8744 = vmatpush3.bf16.msra.mxu0 %v9642_v4  ;;  %8357 = vmatprep.mubr.msk.f32.mxu0 %vm9561_vm0, %v13198_v6  ;;  %v9166_v45 = vld [vmem:[%s13185_s5 + $0xf0] sm:$0xff]  }
  0x62   : > { %8745 = vmatprep.subr.bf16.mxu0 %v13192_v3  ;;  %8366 = vmatprep.subr.bf16.mxu1 %v9156_v11 }
  0x64   : > { %8367 = vmatpush3.bf16.msra.mxu1 %v9156_v11 }
  0x65   : > { %8747 = vmatpush3.bf16.msra.mxu0 %v9650_v7  ;;  %8368 = vmatprep.subr.bf16.mxu1 %v9159_v20 }
  0x66   : > { %8748 = vmatprep.subr.bf16.mxu0 %v13192_v3 }
  0x68   : > { %8369 = vmatpush3.bf16.msra.mxu1 %v9159_v20 }
  0x69   : > { %8750 = vmatpush3.bf16.msra.mxu0 %v9670_v10  ;;  %8370 = vmatprep.subr.bf16.mxu1 %v9162_v31 }
  0x6a   : > { %8751 = vmatprep.subr.bf16.mxu0 %v13192_v3 }
  0x6c   : > { %8371 = vmatpush3.bf16.msra.mxu1 %v9162_v31 }
  0x6d   : > { %8753 = vmatpush3.bf16.msra.mxu0 %v9681_v14  ;;  %8372 = vmatprep.subr.bf16.mxu1 %v9165_v43 }
  0x6e   : > { %8754 = vmatprep.subr.bf16.mxu0 %v13192_v3 }
  0x70   : > { %8373 = vmatpush3.bf16.msra.mxu1 %v9165_v43 }
  0x71   : > { %8756 = vmatpush3.bf16.msra.mxu0 %v9705_v24 }
  0x72   : > { %8757 = vmatprep.subr.bf16.mxu0 %v13192_v3 }
  0x75   : > { %8759 = vmatpush3.bf16.msra.mxu0 %v9723_v32  ;;  %v13375_v32 = vmov 0.0  }
  0x76   : > { %8760 = vmatprep.subr.bf16.mxu0 %v13192_v3 }
  0x79   : > { %8762 = vmatpush3.bf16.msra.mxu0 %v9744_v42 }
  0x7a   : > { %8763 = vmatprep.subr.bf16.mxu0 %v13192_v3 }
  0x7d   : > { %8765 = vmatpush3.bf16.msra.mxu0 %v9759_v51 }
  0x7e   : > { %7440 = vmatprep.subr.bf16.mxu0 %v9146_v47  ;;  %v9168_v47 = vld [vmem:[%s13185_s5 + $0x178] sm:$0xff]  }
  0x7f   : > { %8374 = vmatprep.subr.bf16.mxu1 %v9168_v47 }
  0x80   : > { %8358 = vmatmul.mubr.f32.vlgmr.msra.gmra.mrb[2].mxu0 %v1204_v46  ;;  %v9167_v46 = vld [vmem:[%s13185_s5 + $0x138] sm:$0xff]   ;;  %8375 = vmatpush3.bf16.msra.mxu1 %v9168_v47 }
  0x81   : > { %7441 = vmatpush3.bf16.msra.mxu0 %v9148_v53  ;;  %v9170_v53 = vld [vmem:[%s13185_s5 + $0x40] sm:$0xff]  }
  0x82   : > { %7442 = vmatprep.subr.bf16.mxu0 %v9149_v56  ;;  %7576 = vmatprep.subr.bf16.mxu1 %v9170_v53 }
  0x85   : > { %7443 = vmatpush3.bf16.msra.mxu0 %v9151_v60  ;;  %v482_v60 = vlaneseq }
  0x86   : > { %7444 = vmatprep.subr.bf16.mxu0 %v9152_v62 }
  0x87   : > { %v9993_v62 = vshrl.u32 %v482_v60, 7 }
  0x89   : > { %7445 = vmatpush3.bf16.msra.mxu0 %v9154_v5  ;;  %13359 = vst [vmem:[#allocation43_spill] sm:$0xff] %v9993_v62  ;;  %v519_v0 = vand.u32 15, %v9993_v62  ;;  %v484_v5 = vadd.s32 8, %v9993_v62  ;;  %v488_v11 = vadd.s32 40, %v9993_v62  ;;  %v492_v20 = vadd.s32 72, %v9993_v62 }
  0x8a   : > { %7446 = vmatprep.subr.bf16.mxu0 %v9155_v9  ;;  %v486_v9 = vadd.s32 24, %v9993_v62  ;;  %v496_v31 = vadd.s32 104, %v9993_v62  ;;  %v493_v42 = vadd.s32 80, %v9993_v62 }
  0x8b   : > { %vm899_vm1 = vcmp.gt.s32.totalorder %v519_v0, 0  ;;  %v554_v43 = vand.u32 15, %v488_v11  ;;  %v582_v47 = vand.u32 15, %v492_v20 }
  0x8c   : > { %v610_v3 = vand.u32 15, %v496_v31  ;;  %v10009_v51 = vsel %vm899_vm1, 1.0, %v13198_v6  ;;  %v589_v4 = vand.u32 15, %v493_v42 }
  0x8d   : > { %7447 = vmatpush3.bf16.msra.mxu0 %v9157_v16  ;;  %v485_v16 = vadd.s32 16, %v9993_v62  ;;  %13361 = vst [vmem:[#allocation45_spill] sm:$0xff] %v10009_v51  ;;  %vm1000_vm4 = vcmp.lt.s32.totalorder %v554_v43, 15  ;;  %vm10011_vm7 = vcmp.lt.s32.totalorder %v582_v47, 15 }
  0x8e   : > { %7448 = vmatprep.subr.bf16.mxu0 %v9158_v17  ;;  %v490_v17 = vadd.s32 56, %v9993_v62  ;;  %vm1008_vm10 = vcmp.lt.s32.totalorder %v610_v3, 15  ;;  %v10042_v3 = vsel %vm10011_vm7, 1.0, %v13198_v6  ;;  %vm1821_vm7 = vcmask 1046528  }
  0x8f   : > { %13371 = vst [vmem:[#allocation51_spill] sm:$0xff] %v10042_v3  ;;  %v10053_v47 = vsel %vm1008_vm10, 1.0, %v13198_v6 }
  0x90   : > { %13374 = vst [vmem:[#allocation54_spill] sm:$0xff] %v10053_v47 }
  0x91   : > { %7449 = vmatpush3.bf16.msra.mxu0 %v9160_v27  ;;  %v487_v27 = vadd.s32 32, %v9993_v62 }
  0x92   : > { %7450 = vmatprep.subr.bf16.mxu0 %v9161_v29  ;;  %v494_v29 = vadd.s32 88, %v9993_v62 }
  0x94   : > { %v596_v60 = vand.u32 15, %v494_v29 }
  0x95   : > { %7451 = vmatpush3.bf16.msra.mxu0 %v9163_v37  ;;  %v526_v37 = vand.u32 15, %v484_v5 }
  0x96   : > { %7452 = vmatprep.subr.bf16.mxu0 %v9164_v38  ;;  %v540_v38 = vand.u32 15, %v486_v9  ;;  %v498_v9 = vadd.s32 120, %v9993_v62  ;;  %vm1006_vm9 = vcmp.lt.s32.totalorder %v596_v60, 15 }
  0x97   : > { %vm996_vm2 = vcmp.lt.s32.totalorder %v526_v37, 15 }
  0x98   : > { %vm998_vm3 = vcmp.lt.s32.totalorder %v540_v38, 15 }
  0x99   : > { %7453 = vmatpush3.bf16.msra.mxu0 %v9166_v45  ;;  %v533_v45 = vand.u32 15, %v485_v16  ;;  %v10025_v16 = vsel %vm996_vm2, 1.0, %v13198_v6  ;;  %v10028_v20 = vsel %vm998_vm3, 1.0, %v13198_v6  ;;  %vm909_vm2 = vcmp.gt.s32.totalorder %v589_v4, 0 }
  0x9a   : > { %7454 = vmatprep.subr.bf16.mxu0 %v9167_v46  ;;  %v568_v46 = vand.u32 15, %v490_v17  ;;  %13366 = vst [vmem:[#allocation46_spill] sm:$0xff] %v10025_v16  ;;  %13367 = vst [vmem:[#allocation47_spill] sm:$0xff] %v10028_v20 }
  0x9b   : > { %vm901_vm5 = vcmp.gt.s32.totalorder %v533_v45, 0 }
  0x9c   : > { %vm1002_vm6 = vcmp.lt.s32.totalorder %v568_v46, 15  ;;  %v10034_v29 = vsel %vm901_vm5, 1.0, %v13198_v6  ;;  %v10050_v46 = vsel %vm1006_vm9, 1.0, %v13198_v6 }
  0x9d   : > { %7455 = vmatpush3.bf16.msra.mxu0 %v9169_v52  ;;  %v547_v52 = vand.u32 15, %v487_v27  ;;  %v10031_v27 = vsel %vm1000_vm4, 1.0, %v13198_v6  ;;  %13369 = vst [vmem:[#allocation49_spill] sm:$0xff] %v10034_v29  ;;  %v10037_v31 = vsel %vm1002_vm6, 1.0, %v13198_v6  ;;  %13373 = vst [vmem:[#allocation53_spill] sm:$0xff] %v10050_v46  ;;  %vm1724_vm6 = vcmask 1040384  }
  0x9e   : > { %13368 = vst [vmem:[#allocation48_spill] sm:$0xff] %v10031_v27  ;;  %13370 = vst [vmem:[#allocation50_spill] sm:$0xff] %v10037_v31 }
  0x9f   : > { %vm10015_vm8 = vcmp.gt.s32.totalorder %v547_v52, 0 }
  0xa0   : > { %v10047_v45 = vsel %vm10015_vm8, 1.0, %v13198_v6  ;;  %v497_v6 = vadd.s32 112, %v9993_v62 }
  0xa1   : > { %13372 = vst [vmem:[#allocation52_spill] sm:$0xff] %v10047_v45 }
 0x133   : > { %v1271_v56 = vpop.f32.mrb[0].mxu0 }
 0x134   : > { %v8324_v58 = vpop.f32.mrb[1].mxu0  ;;  %v1345_v53 = vmul.f32 0.0009765625, %v1271_v56  ;;  %v489_v56 = vadd.s32 48, %v9993_v62 }
 0x135   : > { %v10006_v58 = vsub.s32 0, %v9993_v62 }
 0x136   : > { %v1347_v37 = vmul.f32 %v1345_v53, %v1345_v53  ;;  %v561_v52 = vand.u32 15, %v489_v56 }
 0x137   : > { %13360 = vst [vmem:[#allocation44_spill] sm:$0xff] %v10006_v58  ;;  %v10022_v11 = vrot.slane %v1345_v53, %v10006_v58  ;;  %v624_v53 = vand.u32 15, %v498_v9 }
 0x138   : > { %vm905_vm11 = vcmp.gt.s32.totalorder %v561_v52, 0 }
 0x139   : > { %vm1010_vm12 = vcmp.lt.s32.totalorder %v624_v53, 15  ;;  %v495_v53 = vadd.s32 96, %v9993_v62  ;;  %v13388_v7 = vsub.f32 %v9691_v18, %v10022_v11  ;;  %v13389_v52 = vsub.f32 %v9693_v19, %v10022_v11  ;;  %v10191_v18 = vld [vmem:[%s13184_s4] ss:$0 sm:$0xff] }
 0x13a   : > { %v13390_v4 = vsub.f32 %v9702_v23, %v10022_v11  ;;  %v13393_v19 = vsub.f32 %v9726_v33, %v10022_v11  ;;  %v13395_v23 = vsub.f32 %v9749_v44, %v10022_v11  ;;  %v13397_v1 = vsub.f32 %v9764_v54, %v10022_v11 }
 0x153   : > { %v1341_v17 = vpop.f32.mrb[2].mxu0 }
 0x154   : > { %v1346_v38 = vmul.f32 0.0009765625, %v1341_v17  ;;  %v8359_v43 = vpop.f32.mrb[3].mxu0  ;;  %v504_v17 = vadd.s32 168, %v9993_v62 }
 0x155   : > { %v500_v43 = vadd.s32 136, %v9993_v62 }
 0x156   : > { %v1348_v60 = vsub.f32 %v1346_v38, %v1347_v37  ;;  %v502_v38 = vadd.s32 152, %v9993_v62  ;;  %v10092_v37 = vsel %vm905_vm11, 1.0, %v13375_v32 }
 0x157   : > { %v638_v5 = vand.u32 15, %v500_v43  ;;  %13376 = vst [vmem:[#allocation55_spill] sm:$0xff] %v10092_v37  ;;  %v10098_v43 = vsel %vm1010_vm12, 1.0, %v13375_v32 }
 0x158   : > { %v1349_v9 = vmax.f32 %v1348_v60, 0.0  ;;  %v491_v60 = vadd.s32 64, %v9993_v62  ;;  %13377 = vst [vmem:[#allocation56_spill] sm:$0xff] %v10098_v43  ;;  %v652_v0 = vand.u32 15, %v502_v38 }
 0x159   : > { %vm1012_vm13 = vcmp.lt.s32.totalorder %v638_v5, 15  ;;  %v603_v5 = vand.u32 15, %v495_v53 }
 0x15a   : > { %v1386_v56 = vadd.f32 1e-06, %v1349_v9  ;;  %v506_v9 = vadd.s32 184, %v9993_v62  ;;  %v575_v24 = vand.u32 15, %v491_v60  ;;  %v666_v60 = vand.u32 15, %v504_v17 }
 0x15b   : > { %v10116_v14 = vsel %vm1012_vm13, 1.0, %v13375_v32  ;;  %vm1014_vm15 = vcmp.lt.s32.totalorder %v652_v0, 15  ;;  %v10130_v0 = vadd.s32 200, %v9993_v62  ;;  %vm911_vm4 = vcmp.gt.s32.totalorder %v603_v5, 0 }
 0x15c   : > { %9290 = vrsqrt.f32 %v1386_v56  ;;  %v680_v56 = vand.u32 15, %v506_v9  ;;  %vm907_vm14 = vcmp.gt.s32.totalorder %v575_v24, 0  ;;  %13378 = vst [vmem:[#allocation57_spill] sm:$0xff] %v10116_v14  ;;  %vm1016_vm1 = vcmp.lt.s32.totalorder %v666_v60, 15 }
 0x15d   : > { %v617_v9 = vand.u32 15, %v497_v6  ;;  %v10127_v53 = vsel %vm907_vm14, 1.0, %v13375_v32  ;;  %13380 = vst [vmem:[#allocation59_spill] sm:$0xff] %v10130_v0  ;;  %v10133_v17 = vsel %vm1014_vm15, 1.0, %v13375_v32  ;;  %v10138_v42 = vsel %vm1016_vm1, 1.0, %v13375_v32 }
 0x15e   : > { %13379 = vst [vmem:[#allocation58_spill] sm:$0xff] %v10127_v53  ;;  %vm1018_vm3 = vcmp.lt.s32.totalorder %v680_v56, 15  ;;  %13381 = vst [vmem:[#allocation60_spill] sm:$0xff] %v10133_v17  ;;  %v10150_v5 = vsel %vm909_vm2, 1.0, %v13375_v32  ;;  %v10160_v6 = vld [vmem:[%s13183_s3] ss:$0 sm:$0xff] }
 0x15f   : > { %vm913_vm5 = vcmp.gt.s32.totalorder %v617_v9, 0  ;;  %13382 = vst [vmem:[#allocation61_spill] sm:$0xff] %v10138_v42  ;;  %13383 = vst [vmem:[#allocation62_spill] sm:$0xff] %v10150_v5  ;;  %v10153_v9 = vsel %vm1018_vm3, 1.0, %v13375_v32  ;;  %v10164_v56 = vsel %vm911_vm4, 1.0, %v13375_v32 }
 0x160   : > { %13384 = vst [vmem:[#allocation63_spill] sm:$0xff] %v10153_v9  ;;  %13385 = vst [vmem:[#allocation64_spill] sm:$0xff] %v10164_v56  ;;  %v10170_v38 = vsel %vm913_vm5, 1.0, %v13375_v32 }
 0x161   : > { %13387 = vst [vmem:[#allocation66_spill] sm:$0xff] %v10170_v38 }
 0x166   : > { %v9291_v24 = vpop.eup %9290 }
 0x167   : > { %v10147_v10 = vrot.slane %v9291_v24, %v10006_v58  ;;  %v10167_v24 = vadd.s32 216, %v9993_v62 }
 0x169   : > { %13386 = vst [vmem:[#allocation65_spill] sm:$0xff] %v10167_v24  ;;  %v1392_v60 = vmul.f32 %v10147_v10, %v13388_v7  ;;  %v1393_v58 = vmul.f32 %v10147_v10, %v13389_v52  ;;  %v1394_v9 = vmul.f32 %v10147_v10, %v13390_v4  ;;  %v13391_v24 = vsub.f32 %v9708_v25, %v10022_v11 }
 0x16a   : > { %v13392_v7 = vsub.f32 %v9719_v30, %v10022_v11  ;;  %v1397_v4 = vmul.f32 %v10147_v10, %v13393_v19  ;;  %v13394_v25 = vsub.f32 %v9740_v40, %v10022_v11  ;;  %v1399_v38 = vmul.f32 %v10147_v10, %v13395_v23 }
 0x16b   : > { %v1395_v32 = vmul.f32 %v10147_v10, %v13391_v24  ;;  %v1430_v42 = vmul.f32 %v10160_v6, %v1392_v60  ;;  %v1431_v30 = vmul.f32 %v10160_v6, %v1393_v58 }
 0x16c   : > { %v1396_v52 = vmul.f32 %v10147_v10, %v13392_v7  ;;  %v1398_v24 = vmul.f32 %v10147_v10, %v13394_v25  ;;  %v1432_v7 = vmul.f32 %v10160_v6, %v1394_v9  ;;  %v1435_v35 = vmul.f32 %v10160_v6, %v1397_v4 }
 0x16d   : > { %v1433_v33 = vmul.f32 %v10160_v6, %v1395_v32  ;;  %v13396_v25 = vsub.f32 %v9755_v49, %v10022_v11  ;;  %v10221_v23 = vadd.f32 %v10191_v18, %v1430_v42  ;;  %v10224_v58 = vadd.f32 %v10191_v18, %v1431_v30 }
 0x16e   : > { %v1434_v19 = vmul.f32 %v10160_v6, %v1396_v52  ;;  %v1436_v40 = vmul.f32 %v10160_v6, %v1398_v24  ;;  %v10227_v60 = vadd.f32 %v10191_v18, %v1432_v7  ;;  %v10236_v52 = vadd.f32 %v10191_v18, %v1435_v35 }
 0x16f   : > { %v1400_v44 = vmul.f32 %v10147_v10, %v13396_v25  ;;  %v10230_v32 = vadd.f32 %v10191_v18, %v1433_v33  ;;  %v1437_v42 = vmul.f32 %v10160_v6, %v1399_v38  ;;  %v1500_v30 = vsub.f32 0.0, %v10221_v23 }
 0x170   : > { %v10233_v9 = vadd.f32 %v10191_v18, %v1434_v19  ;;  %v10239_v4 = vadd.f32 %v10191_v18, %v1436_v40  ;;  %v1501_v24 = vsub.f32 0.0, %v10224_v58  ;;  %v1502_v7 = vsub.f32 0.0, %v10227_v60 }
 0x171   : > { %v1503_v33 = vsub.f32 0.0, %v10230_v32  ;;  %v1505_v19 = vsub.f32 0.0, %v10236_v52  ;;  %v1438_v49 = vmul.f32 %v10160_v6, %v1400_v44  ;;  %v1532_v40 = vmul.f32 1.442695, %v1500_v30 }
 0x172   : > { %v1504_v25 = vsub.f32 0.0, %v10233_v9  ;;  %v1506_v35 = vsub.f32 0.0, %v10239_v4  ;;  %v1534_v0 = vmul.f32 1.442695, %v1501_v24  ;;  %v1536_v17 = vmul.f32 1.442695, %v1502_v7 }
 0x173   : > { %v10251_v38 = vadd.f32 %v10191_v18, %v1437_v42  ;;  %v1538_v14 = vmul.f32 1.442695, %v1503_v33  ;;  %v1542_v26 = vmul.f32 1.442695, %v1505_v19  ;;  %v10254_v12 = vadd.f32 %v10191_v18, %v1438_v49  ;;  %v9187_v42 = vld [vmem:[%s13185_s5 + $0x1c0] sm:$0xff]  }
 0x174   : > { %v1540_v43 = vmul.f32 1.442695, %v1504_v25  ;;  %9292 = vpow2.f32 %v1532_v40  ;;  %v1544_v47 = vmul.f32 1.442695, %v1506_v35  ;;  %v1401_v44 = vmul.f32 %v10147_v10, %v13397_v1  ;;  %7712 = vmatprep.subr.bf16.mxu0 %v9187_v42 }
 0x175   : > { %v1507_v56 = vsub.f32 0.0, %v10251_v38  ;;  %9294 = vpow2.f32 %v1534_v0  ;;  %v1508_v30 = vsub.f32 0.0, %v10254_v12  ;;  %v13398_v49 = vsub.f32 %v9770_v59, %v10022_v11 }
 0x176   : > { %v13399_v7 = vsub.f32 %v9777_v63, %v10022_v11  ;;  %9296 = vpow2.f32 %v1536_v17  ;;  %v1439_v1 = vmul.f32 %v10160_v6, %v1401_v44  ;;  %v13400_v19 = vsub.f32 %v9783_v8, %v10022_v11 }
 0x177   : > { %v1402_v24 = vmul.f32 %v10147_v10, %v13398_v49  ;;  %v1546_v25 = vmul.f32 1.442695, %v1507_v56  ;;  %9298 = vpow2.f32 %v1538_v14  ;;  %v1548_v35 = vmul.f32 1.442695, %v1508_v30 }
 0x178   : > { %v1403_v33 = vmul.f32 %v10147_v10, %v13399_v7  ;;  %v1404_v0 = vmul.f32 %v10147_v10, %v13400_v19  ;;  %9300 = vpow2.f32 %v1540_v43  ;;  %v10281_v54 = vadd.f32 %v10191_v18, %v1439_v1 }
 0x179   : > { %v1440_v40 = vmul.f32 %v10160_v6, %v1402_v24  ;;  %v13401_v56 = vsub.f32 %v9788_v13, %v10022_v11  ;;  %9302 = vpow2.f32 %v1542_v26  ;;  %v13402_v43 = vsub.f32 %v9794_v21, %v10022_v11 }
 0x17a   : > { %v1441_v49 = vmul.f32 %v10160_v6, %v1403_v33  ;;  %v1442_v17 = vmul.f32 %v10160_v6, %v1404_v0  ;;  %9304 = vpow2.f32 %v1544_v47  ;;  %v1509_v24 = vsub.f32 0.0, %v10281_v54 }
 0x17b   : > { %v1405_v44 = vmul.f32 %v10147_v10, %v13401_v56  ;;  %v10289_v42 = vadd.f32 %v10191_v18, %v1440_v40  ;;  %v1406_v30 = vmul.f32 %v10147_v10, %v13402_v43  ;;  %9306 = vpow2.f32 %v1546_v25 }
 0x17c   : > { %v10292_v14 = vadd.f32 %v10191_v18, %v1441_v49  ;;  %v10300_v7 = vadd.f32 %v10191_v18, %v1442_v17  ;;  %9308 = vpow2.f32 %v1548_v35  ;;  %v1550_v0 = vmul.f32 1.442695, %v1509_v24 }
 0x17d   : > { %v1443_v33 = vmul.f32 %v10160_v6, %v1405_v44  ;;  %v1510_v26 = vsub.f32 0.0, %v10289_v42  ;;  %v1444_v19 = vmul.f32 %v10160_v6, %v1406_v30  ;;  %v13403_v25 = vsub.f32 %v9799_v28, %v10022_v11 }
 0x17e   : > { %v1511_v1 = vsub.f32 0.0, %v10292_v14  ;;  %v1512_v40 = vsub.f32 0.0, %v10300_v7  ;;  %v9293_v43 = vpop.eup %9292  ;;  %9310 = vpow2.f32 %v1550_v0  ;;  %v13404_v30 = vsub.f32 %v9805_v36, %v10022_v11 }
 0x17f   : > { %v10308_v47 = vadd.f32 %v10191_v18, %v1443_v33  ;;  %v1552_v49 = vmul.f32 1.442695, %v1510_v26  ;;  %v10311_v17 = vadd.f32 %v10191_v18, %v1444_v19  ;;  %v1407_v44 = vmul.f32 %v10147_v10, %v13403_v25  ;;  %v9295_v26 = vpop.eup %9294 }
 0x180   : > { %v1554_v56 = vmul.f32 1.442695, %v1511_v1  ;;  %v1408_v24 = vmul.f32 %v10147_v10, %v13404_v30  ;;  %v10323_v33 = vadd.s32 128, %v9993_v62  ;;  %v1596_v1 = vadd.f32 1.0, %v9293_v43  ;;  %v9297_v8 = vpop.eup %9296 }
 0x181   : > { %v1513_v35 = vsub.f32 0.0, %v10308_v47  ;;  %9312 = vpow2.f32 %v1552_v49  ;;  %v1556_v19 = vmul.f32 1.442695, %v1512_v40  ;;  %v1445_v13 = vmul.f32 %v10160_v6, %v1407_v44  ;;  %v9299_v21 = vpop.eup %9298 }
 0x182   : > { %13405 = vst [vmem:[#allocation67_spill] sm:$0xff] %v10323_v33  ;;  %v1597_v25 = vadd.f32 1.0, %v9295_v26  ;;  %9314 = vpow2.f32 %v1554_v56  ;;  %v1514_v0 = vsub.f32 0.0, %v10311_v17  ;;  %v1446_v28 = vmul.f32 %v10160_v6, %v1408_v24  ;;  %v9301_v43 = vpop.eup %9300 }
 0x183   : > { %9316 = vrcp.f32 %v1596_v1  ;;  %v1598_v36 = vadd.f32 1.0, %v9297_v8  ;;  %v10328_v30 = vmul.f32 1.442695, %v1513_v35  ;;  %v10331_v63 = vadd.f32 %v10191_v18, %v1445_v13  ;;  %v9303_v24 = vpop.eup %9302 }
 0x184   : > { %9318 = vrcp.f32 %v1597_v25  ;;  %v1599_v40 = vadd.f32 1.0, %v9299_v21  ;;  %v10334_v49 = vadd.f32 %v10191_v18, %v1446_v28  ;;  %v13408_v56 = vsub.f32 %v9810_v41, %v10022_v11  ;;  %v9305_v1 = vpop.eup %9304 }
 0x185   : > { %13406 = vst [vmem:[#allocation68_spill] sm:$0xff] %v10331_v63  ;;  %9320 = vrcp.f32 %v1598_v36  ;;  %v1600_v26 = vadd.f32 1.0, %v9301_v43  ;;  %v1515_v8 = vsub.f32 0.0, %v10331_v63  ;;  %v13409_v13 = vsub.f32 %v9816_v48, %v10022_v11  ;;  %v9307_v41 = vpop.eup %9306 }
 0x186   : > { %13407 = vst [vmem:[#allocation69_spill] sm:$0xff] %v10334_v49  ;;  %v1409_v44 = vmul.f32 %v10147_v10, %v13408_v56  ;;  %9322 = vrcp.f32 %v1599_v40  ;;  %v1601_v21 = vadd.f32 1.0, %v9303_v24  ;;  %v1516_v28 = vsub.f32 0.0, %v10334_v49  ;;  %v9309_v59 = vpop.eup %9308 }
 0x187   : > { %v1410_v35 = vmul.f32 %v10147_v10, %v13409_v13  ;;  %9324 = vrcp.f32 %v1600_v26  ;;  %v1602_v56 = vadd.f32 1.0, %v9305_v1  ;;  %v10347_v36 = vmul.f32 1.442695, %v1514_v0 }
 0x188   : > { %v1447_v25 = vmul.f32 %v10160_v6, %v1409_v44  ;;  %9326 = vrcp.f32 %v1601_v21  ;;  %v1603_v48 = vadd.f32 1.0, %v9307_v41  ;;  %v10350_v13 = vmul.f32 1.442695, %v1515_v8 }
 0x189   : > { %v1448_v43 = vmul.f32 %v10160_v6, %v1410_v35  ;;  %9328 = vrcp.f32 %v1602_v56  ;;  %v1604_v24 = vadd.f32 1.0, %v9309_v59  ;;  %v13412_v0 = vsub.f32 %v9821_v55, %v10022_v11  ;;  %v9311_v35 = vpop.eup %9310 }
 0x18a   : > { %v10353_v40 = vadd.f32 %v10191_v18, %v1447_v25  ;;  %9330 = vrcp.f32 %v1603_v48  ;;  %v10362_v1 = vmul.f32 1.442695, %v1516_v28  ;;  %v13413_v8 = vsub.f32 %v9827_v61, %v10022_v11 }
 0x18b   : > { %v10356_v44 = vadd.f32 %v10191_v18, %v1448_v43  ;;  %v1411_v26 = vmul.f32 %v10147_v10, %v13412_v0  ;;  %v9313_v59 = vpop.eup %9312  ;;  %9332 = vrcp.f32 %v1604_v24  ;;  %v1605_v25 = vadd.f32 1.0, %v9311_v35 }
 0x18c   : > { %13410 = vst [vmem:[#allocation70_spill] sm:$0xff] %v10353_v40  ;;  %v1517_v41 = vsub.f32 0.0, %v10353_v40  ;;  %v1412_v21 = vmul.f32 %v10147_v10, %v13413_v8  ;;  %v9315_v55 = vpop.eup %9314  ;;  %v1606_v0 = vadd.f32 1.0, %v9313_v59  ;;  %9334 = vpow2.f32 %v1556_v19 }
 0x18d   : > { %13411 = vst [vmem:[#allocation71_spill] sm:$0xff] %v10356_v44  ;;  %v1518_v56 = vsub.f32 0.0, %v10356_v44  ;;  %v1449_v43 = vmul.f32 %v10160_v6, %v1411_v26  ;;  %v13414_v28 = vsub.f32 %v9832_v2, %v10022_v11  ;;  %v9317_v61 = vpop.eup %9316  ;;  %9336 = vrcp.f32 %v1605_v25 }
 0x18e   : > { %v1450_v48 = vmul.f32 %v10160_v6, %v1412_v21  ;;  %v1607_v8 = vadd.f32 1.0, %v9315_v55  ;;  %v10376_v62 = vmul.f32 1.442695, %v1517_v41  ;;  %v9319_v35 = vpop.eup %9318  ;;  %v1660_v26 = vmul.f32 %v9317_v61, %v10221_v23 }
 0x18f   : > { %v1413_v33 = vmul.f32 %v10147_v10, %v13414_v28  ;;  %v10379_v24 = vadd.f32 %v10191_v18, %v1449_v43  ;;  %9338 = vrcp.f32 %v1606_v0  ;;  %v10382_v19 = vmul.f32 1.442695, %v1518_v56  ;;  %v9321_v59 = vpop.eup %9320 }
 0x190   : > { %v10385_v21 = vadd.f32 %v10191_v18, %v1450_v48  ;;  %v1661_v28 = vmul.f32 %v9319_v35, %v10224_v58  ;;  %9340 = vrcp.f32 %v1607_v8  ;;  %v13415_v41 = vsub.f32 %v9838_v15, %v10022_v11  ;;  %v9323_v43 = vpop.eup %9322 }
 0x191   : > { %v1725_v61 = vrot.slane %v1660_v26, 7  ;;  %v1662_v23 = vmul.f32 %v9321_v59, %v10227_v60  ;;  %v1822_v56 = vrot.slane %v1660_v26, 1  ;;  %9342 = vpow2.f32 %v10328_v30  ;;  %v9325_v0 = vpop.eup %9324 }
 0x192   : > { %v10393_v25 = vmul.f32 %v10147_v10, %v13415_v41  ;;  %v10397_v48 = vpack.c.bf16 %v1661_v28, %v1660_v26  ;;  %v1726_v58 = vrot.slane %v1661_v28, 7  ;;  %v1823_v8 = vrot.slane %v1661_v28, 1  ;;  %v9327_v55 = vpop.eup %9326 }
 0x193   : > { %v10400_v35 = vmul.f32 %v9323_v43, %v10230_v32  ;;  %v1820_v2 = vsel %vm1724_vm6, 0.0, %v1725_v61  ;;  %v1825_v41 = vrot.slane %v1662_v23, 1  ;;  %v10404_v15 = vmul.f32 %v9325_v0, %v10233_v9  ;;  %v9329_v60 = vpop.eup %9328 }
 0x194   : > { %13416 = vst [vmem:[#allocation72_spill] sm:$0xff] %v10397_v48  ;;  %v1728_v44 = vrot.slane %v1662_v23, 7  ;;  %2402 = vmatprep.mubr.bf16.mxu0 %v10397_v48  ;;  %v1727_v30 = vsel %vm1724_vm6, %v1725_v61, %v1726_v58  ;;  %v1918_v26 = vmul.f32 %v10009_v51, %v1820_v2  ;;  %v1824_v59 = vsel %vm1821_vm7, %v1822_v56, %v1823_v8  ;;  %v9331_v28 = vpop.eup %9330 }
 0x195   : > { %v10411_v32 = vmul.f32 %v10160_v6, %v1413_v33  ;;  %v1826_v43 = vsel %vm1821_vm7, %v1823_v8, %v1825_v41  ;;  %v1827_v40 = vrot.slane %v10400_v35, 1  ;;  %v1829_v9 = vrot.slane %v10404_v15, 1  ;;  %v9333_v48 = vpop.eup %9332 }
 0x196   : > { %v10417_v0 = vmul.f32 %v9327_v55, %v10236_v52  ;;  %v10419_v49 = vpack.c.bf16 %v1727_v30, %v1918_v26  ;;  %v2015_v2 = vmul.f32 %v10025_v16, %v1826_v43  ;;  %v10423_v61 = vmul.f32 %v9329_v60, %v10239_v4  ;;  %v9335_v56 = vpop.eup %9334  ;;  %v9188_v55 = vld [vmem:[%s13185_s5 + $0x180] sm:$0xff]   ;;  %v9190_v26 = vld [vmem:[%s13185_s5 + $0x1c8] sm:$0xff]  }
 0x197   : > { %v1729_v33 = vsel %vm1724_vm6, %v1726_v58, %v1728_v44  ;;  %v10427_v8 = vpack.c.bf16 %v10400_v35, %v1662_v23  ;;  %v1830_v51 = vsel %vm1821_vm7, %v1827_v40, %v1829_v9  ;;  %v1730_v52 = vrot.slane %v10400_v35, 7  ;;  %v9337_v30 = vpop.eup %9336 }
 0x198   : > { %v1831_v63 = vrot.slane %v10417_v0, 1  ;;  %2403 = vmatmul.mubr.bf16.vlgmr.msra.gmra.mrb[4].mxu0 %v10419_v49  ;;  %v10436_v4 = vpack.c.bf16 %v2015_v2, %v1824_v59  ;;  %v2017_v58 = vmul.f32 %v10028_v20, %v1830_v51  ;;  %v1833_v23 = vrot.slane %v10423_v61, 1  ;;  %v9171_v59 = vld [vmem:[%s13185_s5] sm:$0xff]  }
 0x199   : > { %v1920_v60 = vmul.f32 %v10034_v29, %v1729_v33  ;;  %v9339_v35 = vpop.eup %9338  ;;  %2410 = vmatprep.mubr.bf16.mxu0 %v10427_v8  ;;  %v1828_v43 = vsel %vm1821_vm7, %v1825_v41, %v1827_v40  ;;  %v1731_v51 = vsel %vm1724_vm6, %v1728_v44, %v1730_v52  ;;  %v10452_v20 = vmul.f32 %v9331_v28, %v10251_v38  ;;  %v9172_v40 = vld [vmem:[%s13185_s5 + $0x48] sm:$0xff]  }
 0x19a   : > { %13417 = vst [vmem:[#allocation73_spill] sm:$0xff] %v10436_v4  ;;  %v1832_v2 = vsel %vm1821_vm7, %v1829_v9, %v1831_v63  ;;  %v9341_v33 = vpop.eup %9340  ;;  %8376 = vmatprep.mubr.bf16.mxu1 %v10436_v4  ;;  %v10455_v29 = vpack.c.bf16 %v2017_v58, %v1828_v43  ;;  %v1834_v16 = vsel %vm1821_vm7, %v1831_v63, %v1833_v23 }
 0x19b   : > { %v10463_v41 = vpack.c.bf16 %v10417_v0, %v10404_v15  ;;  %v10466_v44 = vmul.f32 %v9333_v48, %v10254_v12  ;;  %v9343_v38 = vpop.eup %9342  ;;  %v2019_v28 = vmul.f32 %v10031_v27, %v1834_v16  ;;  %v1835_v9 = vrot.slane %v10452_v20, 1  ;;  %7713 = vmatpush3.bf16.msra.mxu0 %v9188_v55 }
 0x19c   : > { %v10471_v58 = vmul.f32 %v9337_v30, %v10281_v54  ;;  %v10474_v63 = vmul.f32 %v9339_v35, %v10289_v42  ;;  %8377 = vmatmul.mubr.bf16.vlgmr.msra.gmra.mrb[0].mxu1 %v10455_v29  ;;  %v10477_v43 = vpack.c.bf16 %v1731_v51, %v1920_v60  ;;  %v1732_v12 = vrot.slane %v10404_v15, 7  ;;  %7714 = vmatprep.subr.bf16.mxu0 %v9190_v26  ;;  %v9173_v54 = vld [vmem:[%s13185_s5 + $0x8] sm:$0xff]   ;;  %v9174_v26 = vld [vmem:[%s13185_s5 + $0x50] sm:$0xff]  }
 0x19d   : > { %v1837_v4 = vrot.slane %v10466_v44, 1  ;;  %v1734_v48 = vrot.slane %v10417_v0, 7  ;;  %7577 = vmatpush3.bf16.msra.mxu1 %v9171_v59  ;;  %v10482_v16 = vpack.c.bf16 %v2019_v28, %v1832_v2  ;;  %v10491_v30 = vpack.c.bf16 %v10452_v20, %v10423_v61  ;;  %v9191_v59 = vld [vmem:[%s13185_s5 + $0x188] sm:$0xff]  }
 0x19e   : > { %v1839_v42 = vrot.slane %v10471_v58, 1  ;;  %v1841_v55 = vrot.slane %v10474_v63, 1  ;;  %7578 = vmatprep.subr.bf16.mxu1 %v9172_v40  ;;  %v1836_v15 = vsel %vm1821_vm7, %v1833_v23, %v1835_v9  ;;  %v1733_v60 = vsel %vm1724_vm6, %v1730_v52, %v1732_v12  ;;  %v9193_v52 = vld [vmem:[%s13185_s5 + $0x1d0] sm:$0xff]  }
 0x19f   : > { %v1838_v0 = vsel %vm1821_vm7, %v1835_v9, %v1837_v4  ;;  %v1608_v35 = vadd.f32 1.0, %v9335_v56  ;;  %8380 = vmatprep.mubr.bf16.mxu1 %v10482_v16  ;;  %v1735_v23 = vsel %vm1724_vm6, %v1732_v12, %v1734_v48  ;;  %v1922_v40 = vmul.f32 %v10047_v45, %v1733_v60  ;;  %v9175_v60 = vld [vmem:[%s13185_s5 + $0x10] sm:$0xff]   ;;  %7715 = vmatpush3.bf16.msra.mxu0 %v9191_v59 }
 0x1a0   : > { %v2021_v2 = vmul.f32 %v10037_v31, %v1838_v0  ;;  %v1842_v51 = vsel %vm1821_vm7, %v1839_v42, %v1841_v55  ;;  %2411 = vmatmul.mubr.bf16.gmra.mrb[8].mxu0 %v10477_v43  ;;  %v10513_v28 = vmul.f32 %v9341_v33, %v10292_v14  ;;  %v1609_v9 = vadd.f32 1.0, %v9343_v38  ;;  %v9194_v38 = vld [vmem:[%s13185_s5 + $0x190] sm:$0xff]   ;;  %7716 = vmatprep.subr.bf16.mxu0 %v9193_v52  ;;  %v9195_v52 = vld [vmem:[%s13185_s5 + $0x1d8] sm:$0xff]  }
 0x1a1   : > { %v2023_v56 = vmul.f32 %v10042_v3, %v1842_v51  ;;  %9344 = vrcp.f32 %v1608_v35  ;;  %2418 = vmatprep.mubr.bf16.mxu0 %v10463_v41  ;;  %7579 = vmatpush3.bf16.msra.mxu1 %v9173_v54  ;;  %v1840_v12 = vsel %vm1821_vm7, %v1837_v4, %v1839_v42  ;;  %v1736_v51 = vrot.slane %v10423_v61, 7  ;;  %v9176_v4 = vld [vmem:[%s13185_s5 + $0x58] sm:$0xff]  }
 0x1a2   : > { %v10516_v0 = vpack.c.bf16 %v2021_v2, %v1836_v15  ;;  %9346 = vpow2.f32 %v10347_v36  ;;  %v10524_v35 = vpack.c.bf16 %v1735_v23, %v1922_v40  ;;  %7580 = vmatprep.subr.bf16.mxu1 %v9174_v26  ;;  %v1843_v14 = vrot.slane %v10513_v28, 1 }
 0x1a3   : > { %9348 = vrcp.f32 %v1609_v9  ;;  %v1738_v33 = vrot.slane %v10452_v20, 7  ;;  %v10534_v36 = vpack.c.bf16 %v2023_v56, %v1840_v12  ;;  %v1737_v61 = vsel %vm1724_vm6, %v1734_v48, %v1736_v51  ;;  %v9177_v48 = vld [vmem:[%s13185_s5 + $0x18] sm:$0xff]   ;;  %7717 = vmatpush3.bf16.msra.mxu0 %v9194_v38 }
 0x1a4   : > { %9350 = vpow2.f32 %v10350_v13  ;;  %v1740_v54 = vrot.slane %v10466_v44, 7  ;;  %8381 = vmatmul.mubr.bf16.gmra.mrb[4].mxu1 %v10516_v0  ;;  %v10543_v20 = vsel %vm1821_vm7, %v1841_v55, %v1843_v14  ;;  %v1924_v42 = vmul.f32 %v10092_v37, %v1737_v61  ;;  %v9196_v56 = vld [vmem:[%s13185_s5 + $0x198] sm:$0xff]   ;;  %7718 = vmatprep.subr.bf16.mxu0 %v9195_v52 }
 0x1a5   : > { %v10548_v15 = vpack.c.bf16 %v10471_v58, %v10466_v44  ;;  %9352 = vpow2.f32 %v10362_v1  ;;  %8384 = vmatprep.mubr.bf16.mxu1 %v10534_v36  ;;  %7581 = vmatpush3.bf16.msra.mxu1 %v9175_v60  ;;  %v1739_v13 = vsel %vm1724_vm6, %v1736_v51, %v1738_v33  ;;  %v1742_v26 = vrot.slane %v10471_v58, 7  ;;  %v9178_v44 = vld [vmem:[%s13185_s5 + $0x60] sm:$0xff]  }
 0x1a6   : > { %9354 = vpow2.f32 %v10376_v62  ;;  %v1741_v55 = vsel %vm1724_vm6, %v1738_v33, %v1740_v54  ;;  %7582 = vmatprep.subr.bf16.mxu1 %v9176_v4  ;;  %v10566_v59 = vpack.c.bf16 %v10513_v28, %v10474_v63  ;;  %v1520_v2 = vsub.f32 0.0, %v10385_v21  ;;  %v9179_v51 = vld [vmem:[%s13185_s5 + $0x20] sm:$0xff]  }
 0x1a7   : > { %9356 = vpow2.f32 %v10382_v19  ;;  %v1926_v1 = vmul.f32 %v10127_v53, %v1741_v55  ;;  %v10569_v62 = vpack.c.bf16 %v1739_v13, %v1924_v42  ;;  %v13418_v58 = vsub.f32 0.0, %v10379_v24  ;;  %v9180_v13 = vld [vmem:[%s13185_s5 + $0x68] sm:$0xff]   ;;  %7719 = vmatpush3.bf16.msra.mxu0 %v9196_v56 }
 0x1a8   : > { %v1452_v19 = vmul.f32 %v10160_v6, %v10393_v25  ;;  %v10577_v40 = vadd.f32 %v10191_v18, %v10411_v32  ;;  %2419 = vmatmul.mubr.bf16.gmra.mrb[12].mxu0 %v10524_v35  ;;  %v1743_v9 = vsel %vm1724_vm6, %v1740_v54, %v1742_v26  ;;  %v1572_v12 = vmul.f32 1.442695, %v1520_v2  ;;  %v9198_v32 = vld [vmem:[%s13185_s5 + $0x1e0] sm:$0xff]   ;;  %v13441_v53 = vld [vmem:[#allocation56_spill] sm:$0xff] }
 0x1a9   : > { %v1570_v23 = vmul.f32 1.442695, %v13418_v58  ;;  %v1744_v60 = vrot.slane %v10474_v63, 7  ;;  %v13267_v25 = vrot.slane %v10513_v28, 7  ;;  %2426 = vmatprep.mubr.bf16.mxu0 %v10491_v30  ;;  %7583 = vmatpush3.bf16.msra.mxu1 %v9177_v48  ;;  %v13419_v63 = vsub.f32 %v9843_v22, %v10022_v11 }
 0x1aa   : > { %v10597_v33 = vadd.f32 %v10191_v18, %v1452_v19  ;;  %v1521_v4 = vsub.f32 0.0, %v10577_v40  ;;  %v10604_v54 = vpack.c.bf16 %v1743_v9, %v1926_v1  ;;  %7584 = vmatprep.subr.bf16.mxu1 %v9178_v44  ;;  %v13420_v48 = vsub.f32 %v9849_v34, %v10022_v11  ;;  %7720 = vmatprep.subr.bf16.mxu0 %v9198_v32 }
 0x1ab   : > { %9358 = vpow2.f32 %v1570_v23  ;;  %v1415_v38 = vmul.f32 %v10147_v10, %v13419_v63  ;;  %v9345_v61 = vpop.eup %9344  ;;  %v1745_v42 = vsel %vm1724_vm6, %v1742_v26, %v1744_v60  ;;  %v1747_v9 = vsel %vm1724_vm6, %v1744_v60, %v13267_v25 }
 0x1ac   : > { %9360 = vpow2.f32 %v1572_v12  ;;  %v1416_v55 = vmul.f32 %v10147_v10, %v13420_v48  ;;  %v9347_v2 = vpop.eup %9346  ;;  %v10615_v58 = vmul.f32 %v9345_v61, %v10300_v7  ;;  %v1522_v1 = vsub.f32 0.0, %v10597_v33  ;;  %v9199_v48 = vld [vmem:[%s13185_s5 + $0x1a0] sm:$0xff]  }
 0x1ad   : > { %v1574_v44 = vmul.f32 1.442695, %v1521_v4  ;;  %v1928_v23 = vmul.f32 %v10150_v5, %v1745_v42  ;;  %v9349_v26 = vpop.eup %9348  ;;  %v1610_v19 = vadd.f32 1.0, %v9347_v2  ;;  %v1453_v12 = vmul.f32 %v10160_v6, %v1415_v38  ;;  %7585 = vmatpush3.bf16.msra.mxu1 %v9179_v51  ;;  %v9181_v4 = vld [vmem:[%s13185_s5 + $0x28] sm:$0xff]   ;;  %v9182_v51 = vld [vmem:[%s13185_s5 + $0x70] sm:$0xff]   ;;  %7721 = vmatpush3.bf16.msra.mxu0 %v9199_v48 }
 0x1ae   : > { %v1454_v52 = vmul.f32 %v10160_v6, %v1416_v55  ;;  %v9351_v63 = vpop.eup %9350  ;;  %v1845_v7 = vrot.slane %v10615_v58, 1  ;;  %v10626_v61 = vmul.f32 %v9349_v26, %v10308_v47  ;;  %v1576_v56 = vmul.f32 1.442695, %v1522_v1  ;;  %7586 = vmatprep.subr.bf16.mxu1 %v9180_v13 }
 0x1af   : > { %9362 = vpow2.f32 %v1574_v44  ;;  %v9353_v42 = vpop.eup %9352  ;;  %v1611_v60 = vadd.f32 1.0, %v9351_v63  ;;  %v10632_v38 = vadd.f32 %v10191_v18, %v1453_v12  ;;  %v13421_v32 = vsub.f32 %v9854_v39, %v10022_v11  ;;  %v9200_v44 = vld [vmem:[%s13185_s5 + $0x1e8] sm:$0xff]   ;;  %v9185_v39 = vld [vmem:[%s13185_s5 + $0x38] sm:$0xff]  }
 0x1b0   : > { %9364 = vrcp.f32 %v1610_v19  ;;  %v9355_v55 = vpop.eup %9354  ;;  %v1846_v13 = vsel %vm1821_vm7, %v1843_v14, %v1845_v7  ;;  %v1612_v2 = vadd.f32 1.0, %v9353_v42  ;;  %v10647_v1 = vpack.c.bf16 %v1747_v9, %v1928_v23  ;;  %2427 = vmatmul.mubr.bf16.gmra.mrb[16].mxu0 %v10569_v62  ;;  %7722 = vmatprep.subr.bf16.mxu0 %v9200_v44 }
 0x1b1   : > { %v1417_v47 = vmul.f32 %v10147_v10, %v13421_v32  ;;  %9366 = vpow2.f32 %v1576_v56  ;;  %v9357_v26 = vpop.eup %9356  ;;  %v2025_v19 = vmul.f32 %v10050_v46, %v1846_v13  ;;  %v1613_v63 = vadd.f32 1.0, %v9355_v55  ;;  %2434 = vmatprep.mubr.bf16.mxu0 %v10548_v15  ;;  %7587 = vmatpush3.bf16.msra.mxu1 %v9181_v4  ;;  %v9183_v56 = vld [vmem:[%s13185_s5 + $0x30] sm:$0xff]   ;;  %v9201_v4 = vld [vmem:[%s13185_s5 + $0x1a8] sm:$0xff]  }
 0x1b2   : > { %9368 = vrcp.f32 %v1611_v60  ;;  %v1614_v14 = vadd.f32 1.0, %v9357_v26  ;;  %v10658_v23 = vpack.c.bf16 %v10626_v61, %v10615_v58  ;;  %v10661_v9 = vadd.f32 %v10191_v18, %v1454_v52  ;;  %7588 = vmatprep.subr.bf16.mxu1 %v9182_v51  ;;  %v9184_v52 = vld [vmem:[%s13185_s5 + $0x78] sm:$0xff]   ;;  %v9202_v51 = vld [vmem:[%s13185_s5 + $0x1f0] sm:$0xff]   ;;  %7723 = vmatpush3.bf16.msra.mxu0 %v9201_v4 }
 0x1b3   : > { %9370 = vrcp.f32 %v1612_v2  ;;  %v10667_v42 = vpack.c.bf16 %v2025_v19, %v10543_v20  ;;  %v1523_v60 = vsub.f32 0.0, %v10632_v38  ;;  %v13422_v32 = vsub.f32 %v9860_v50, %v10022_v11  ;;  %7724 = vmatprep.subr.bf16.mxu0 %v9202_v51  ;;  %v9204_v4 = vld [vmem:[%s13185_s5 + $0x1f8] sm:$0xff]  }
 0x1b4   : > { %9372 = vrcp.f32 %v1613_v63  ;;  %v1524_v13 = vsub.f32 0.0, %v10661_v9  ;;  %v1455_v2 = vmul.f32 %v10160_v6, %v1417_v47  ;;  %v1748_v26 = vrot.slane %v10615_v58, 7 }
 0x1b5   : > { %v1418_v55 = vmul.f32 %v10147_v10, %v13422_v32  ;;  %v9359_v20 = vpop.eup %9358  ;;  %9374 = vrcp.f32 %v1614_v14  ;;  %8385 = vmatmul.mubr.bf16.gmra.mrb[8].mxu1 %v10667_v42  ;;  %v1578_v63 = vmul.f32 1.442695, %v1523_v60  ;;  %v13269_v14 = vrot.slane %v10626_v61, 7 }
 0x1b6   : > { %v9361_v19 = vpop.eup %9360  ;;  %v1615_v48 = vadd.f32 1.0, %v9359_v20  ;;  %v1580_v25 = vmul.f32 1.442695, %v1524_v13  ;;  %v10690_v47 = vadd.f32 %v10191_v18, %v1455_v2  ;;  %v13423_v58 = vrot.slane %v10513_v28, 7  ;;  %7589 = vmatpush3.bf16.msra.mxu1 %v9183_v56  ;;  %v10712_v56 = vld [vmem:[%s13185_s5 + $0x80] sm:$0xff]  }
 0x1b7   : > { %v1456_v32 = vmul.f32 %v10160_v6, %v1418_v55  ;;  %v1616_v12 = vadd.f32 1.0, %v9361_v19  ;;  %v13424_v60 = vrot.slane %v10626_v61, 1  ;;  %v1751_v28 = vsel %vm1724_vm6, %v1748_v26, %v13269_v14  ;;  %7590 = vmatprep.subr.bf16.mxu1 %v9184_v52  ;;  %v13426_v52 = vld [vmem:[#allocation39_spill] sm:$0xff]  ;;  %v13428_v14 = vld [vmem:[#allocation64_spill] sm:$0xff] }
 0x1b8   : > { %v1749_v44 = vsel %vm1724_vm6, %v13423_v58, %v1748_v26  ;;  %9376 = vrcp.f32 %v1615_v48  ;;  %v1525_v2 = vsub.f32 0.0, %v10690_v47  ;;  %v13425_v19 = vsub.f32 %v9865_v57, %v10022_v11  ;;  %2435 = vmatmul.mubr.bf16.gmra.mrb[20].mxu0 %v10604_v54 }
 0x1b9   : > { %v10701_v55 = vsel %vm1821_vm7, %v1845_v7, %v13424_v60  ;;  %v10704_v20 = vadd.f32 %v10191_v18, %v1456_v32  ;;  %v9203_v7 = vld [vmem:[%s13185_s5 + $0x1b0] sm:$0xff]   ;;  %v9363_v13 = vpop.eup %9362  ;;  %9378 = vrcp.f32 %v1616_v12  ;;  %v13427_v48 = vsub.f32 %v13426_v52, %v10022_v11  ;;  %2442 = vmatprep.mubr.bf16.mxu0 %v10566_v59 }
 0x1ba   : > { %v1419_v26 = vmul.f32 %v10147_v10, %v13425_v19  ;;  %v9365_v58 = vpop.eup %9364  ;;  %v1617_v12 = vadd.f32 1.0, %v9363_v13  ;;  %9380 = vpow2.f32 %v1578_v63  ;;  %v1930_v34 = vmul.f32 %v13428_v14, %v1749_v44  ;;  %7591 = vmatpush3.bf16.msra.mxu1 %v9185_v39  ;;  %7725 = vmatpush3.bf16.msra.mxu0 %v9203_v7 }
 0x1bb   : > { %v1420_v32 = vmul.f32 %v10147_v10, %v13427_v48  ;;  %v1526_v60 = vsub.f32 0.0, %v10704_v20  ;;  %v9367_v19 = vpop.eup %9366  ;;  %v10733_v57 = vmul.f32 %v9365_v58, %v10311_v17  ;;  %9382 = vpow2.f32 %v1580_v25  ;;  %8408 = vmatprep.subr.bf16.mxu1 %v10712_v56  ;;  %v9205_v17 = vld [vmem:[%s13185_s5 + $0x1b8] sm:$0xff]   ;;  %7726 = vmatprep.subr.bf16.mxu0 %v9204_v4 }
 0x1bc   : > { %v1582_v51 = vmul.f32 1.442695, %v1525_v2  ;;  %v1457_v48 = vmul.f32 %v10160_v6, %v1419_v26  ;;  %v9369_v52 = vpop.eup %9368  ;;  %v1618_v50 = vadd.f32 1.0, %v9367_v19  ;;  %9384 = vrcp.f32 %v1617_v12  ;;  %v13429_v2 = vld [vmem:[#allocation68_spill] sm:$0xff]  ;;  %v13433_v4 = vld [vmem:[#allocation54_spill] sm:$0xff] }
 0x1bd   : > { %v1584_v13 = vmul.f32 1.442695, %v1526_v60  ;;  %v1458_v63 = vmul.f32 %v10160_v6, %v1420_v32  ;;  %v9371_v44 = vpop.eup %9370  ;;  %v1849_v25 = vrot.slane %v10733_v57, 1  ;;  %v10744_v58 = vmul.f32 %v9369_v52, %v13429_v2  ;;  %v13430_v32 = vld [vmem:[#allocation69_spill] sm:$0xff] }
 0x1be   : > { %9386 = vpow2.f32 %v1582_v51  ;;  %v10747_v39 = vadd.f32 %v10191_v18, %v1457_v48  ;;  %v9373_v26 = vpop.eup %9372  ;;  %v10750_v12 = vmul.f32 %v9371_v44, %v13430_v32  ;;  %v10752_v7 = vpack.c.bf16 %v1751_v28, %v1930_v34  ;;  %v13432_v48 = vld [vmem:[#allocation70_spill] sm:$0xff]  ;;  %v13434_v34 = vld [vmem:[#allocation71_spill] sm:$0xff]  ;;  %7727 = vmatpush3.bf16.msra.mxu0 %v9205_v17  ;;  %v13439_v17 = vld [vmem:[#allocation41_spill] sm:$0xff] }
 0x1bf   : > { %9388 = vrcp.f32 %v1618_v50  ;;  %v10755_v60 = vadd.f32 %v10191_v18, %v1458_v63  ;;  %v9375_v19 = vpop.eup %9374  ;;  %v13431_v22 = vrot.slane %v10626_v61, 1  ;;  %v1851_v51 = vrot.slane %v10744_v58, 1  ;;  %v13435_v63 = vld [vmem:[#allocation40_spill] sm:$0xff] }
 0x1c0   : > { %v10762_v2 = vmul.f32 %v9373_v26, %v13432_v48  ;;  %9390 = vpow2.f32 %v1584_v13  ;;  %v1853_v50 = vrot.slane %v10750_v12, 1  ;;  %v10767_v28 = vmul.f32 %v9375_v19, %v13434_v34  ;;  %2443 = vmatmul.mubr.bf16.gmra.mrb[24].mxu0 %v10647_v1 }
 0x1c1   : > { %v1850_v52 = vsel %vm1821_vm7, %v13431_v22, %v1849_v25  ;;  %v13436_v32 = vsub.f32 %v13435_v63, %v10022_v11  ;;  %v1852_v22 = vsel %vm1821_vm7, %v1849_v25, %v1851_v51  ;;  %v1527_v26 = vsub.f32 0.0, %v10747_v39  ;;  %2450 = vmatprep.mubr.bf16.mxu0 %v10658_v23 }
 0x1c2   : > { %v2027_v44 = vmul.f32 %v13433_v4, %v1850_v52  ;;  %v1855_v14 = vrot.slane %v10762_v2, 1  ;;  %v1528_v13 = vsub.f32 0.0, %v10755_v60  ;;  %v13437_v52 = vmov 0.0|0.0   ;;  %v9377_v48 = vpop.eup %9376 }
 0x1c3   : > { %v1421_v45 = vmul.f32 %v10147_v10, %v13436_v32  ;;  %8766 = vmatprep.subr.bf16.mxu0 %v13437_v52  ;;  %v1854_v34 = vsel %vm1821_vm7, %v1851_v51, %v1853_v50  ;;  %v1857_v63 = vrot.slane %v10767_v28, 1  ;;  %v13440_v25 = vsub.f32 %v13439_v17, %v10022_v11  ;;  %v9379_v5 = vpop.eup %9378 }
 0x1c4   : > { %v10779_v19 = vpack.c.bf16 %v2027_v44, %v10701_v55  ;;  %v2029_v37 = vmul.f32 %v13441_v53, %v1854_v34  ;;  %v1856_v4 = vsel %vm1821_vm7, %v1853_v50, %v1855_v14  ;;  %v10791_v46 = vmul.f32 %v9377_v48, %v10379_v24  ;;  %v9381_v51 = vpop.eup %9380  ;;  %v13443_v50 = vld [vmem:[#allocation57_spill] sm:$0xff] }
 0x1c5   : > { %v1422_v32 = vmul.f32 %v10147_v10, %v13440_v25  ;;  %v1586_v55 = vmul.f32 1.442695, %v1527_v26  ;;  %v1858_v44 = vsel %vm1821_vm7, %v1855_v14, %v1857_v63  ;;  %v10797_v17 = vmul.f32 %v9379_v5, %v10385_v21  ;;  %v9383_v34 = vpop.eup %9382 }
 0x1c6   : > { %13438 = vst [vmem:[#allocation68_spill] sm:$0xff] %v10779_v19  ;;  %8388 = vmatprep.mubr.bf16.mxu1 %v10779_v19  ;;  %v1588_v25 = vmul.f32 1.442695, %v1528_v13  ;;  %v1459_v3 = vmul.f32 %v10160_v6, %v1421_v45  ;;  %v10800_v53 = vpack.c.bf16 %v2029_v37, %v1852_v22  ;;  %v2031_v24 = vmul.f32 %v13443_v50, %v1858_v44  ;;  %v9385_v26 = vpop.eup %9384 }
 0x1c7   : > { %v1859_v48 = vrot.slane %v10791_v46, 1  ;;  %v1619_v31 = vadd.f32 1.0, %v9381_v51  ;;  %v1861_v27 = vrot.slane %v10797_v17, 1  ;;  %v1620_v19 = vadd.f32 1.0, %v9383_v34 }
 0x1c8   : > { %13442 = vst [vmem:[#allocation69_spill] sm:$0xff] %v10800_v53  ;;  %9392 = vpow2.f32 %v1586_v55  ;;  %v1460_v14 = vmul.f32 %v10160_v6, %v1422_v32  ;;  %v9387_v5 = vpop.eup %9386  ;;  %8389 = vmatmul.mubr.bf16.gmra.mrb[12].mxu1 %v10800_v53  ;;  %v10807_v21 = vpack.c.bf16 %v2031_v24, %v1856_v4  ;;  %v10810_v45 = vmul.f32 %v9385_v26, %v10577_v40  ;;  %v13445_v4 = vld [vmem:[#allocation60_spill] sm:$0xff]  ;;  %v13446_v26 = vld [vmem:[#allocation43_spill] sm:$0xff] }
 0x1c9   : > { %9394 = vrcp.f32 %v1619_v31  ;;  %v10814_v37 = vpack.c.bf16 %v10744_v58, %v10733_v57  ;;  %v9389_v22 = vpop.eup %9388  ;;  %v1862_v13 = vsel %vm1821_vm7, %v1859_v48, %v1861_v27  ;;  %v1621_v55 = vadd.f32 1.0, %v9387_v5  ;;  %2451 = vmatmul.mubr.bf16.gmra.mrb[28].mxu0 %v10752_v7 }
 0x1ca   : > { %13444 = vst [vmem:[#allocation70_spill] sm:$0xff] %v10807_v21  ;;  %9396 = vrcp.f32 %v1620_v19  ;;  %v10818_v6 = vadd.f32 %v10191_v18, %v1459_v3  ;;  %v9391_v32 = vpop.eup %9390  ;;  %8392 = vmatprep.mubr.bf16.mxu1 %v10807_v21  ;;  %v2033_v51 = vmul.f32 %v13445_v4, %v1862_v13  ;;  %v10823_v40 = vmul.f32 %v9389_v22, %v10597_v33  ;;  %v13456_v21 = vld [vmem:[#allocation67_spill] sm:$0xff] }
 0x1cb   : > { %v1863_v31 = vrot.slane %v10810_v45, 1  ;;  %9398 = vpow2.f32 %v1588_v25  ;;  %v1622_v44 = vadd.f32 1.0, %v9391_v32  ;;  %v10828_v19 = vadd.f32 %v10191_v18, %v1460_v14  ;;  %2458 = vmatprep.mubr.bf16.mxu0 %v10814_v37 }
 0x1cc   : > { %9400 = vrcp.f32 %v1621_v55  ;;  %v1529_v3 = vsub.f32 0.0, %v10818_v6  ;;  %v1860_v34 = vsel %vm1821_vm7, %v1857_v63, %v1859_v48  ;;  %v1865_v24 = vrot.slane %v10823_v40, 1  ;;  %v13447_v55 = vld [vmem:[#allocation59_spill] sm:$0xff] }
 0x1cd   : > { %v1752_v33 = vrot.slane %v10733_v57, 7  ;;  %v501_v5 = vadd.s32 144, %v13446_v26  ;;  %9402 = vrcp.f32 %v1622_v44  ;;  %v1530_v25 = vsub.f32 0.0, %v10828_v19  ;;  %v13452_v44 = vld [vmem:[#allocation42_spill] sm:$0xff] }
 0x1ce   : > { %v1590_v22 = vmul.f32 1.442695, %v1529_v3  ;;  %v1754_v13 = vrot.slane %v10744_v58, 7  ;;  %v10838_v18 = vpack.c.bf16 %v2033_v51, %v1860_v34  ;;  %v1866_v14 = vsel %vm1821_vm7, %v1863_v31, %v1865_v24  ;;  %v13454_v51 = vld [vmem:[#allocation61_spill] sm:$0xff] }
 0x1cf   : > { %v13448_v63 = vand.u32 15, %v13447_v55  ;;  %v13451_v57 = vrot.slane %v10626_v61, 7  ;;  %v13453_v4 = vsub.f32 %v13452_v44, %v10022_v11  ;;  %v1864_v58 = vsel %vm1821_vm7, %v1861_v27, %v1863_v31  ;;  %v13455_v55 = vld [vmem:[#allocation66_spill] sm:$0xff]  ;;  %v9550_v61 = vld [vmem:[%s13183_s3] ss:$0 sm:$0xff] }
 0x1d0   : > { %v2035_v34 = vmul.f32 %v13454_v51, %v1866_v14  ;;  %9404 = vpow2.f32 %v1590_v22  ;;  %v1592_v50 = vmul.f32 1.442695, %v1530_v25  ;;  %8393 = vmatmul.mubr.bf16.gmra.mrb[16].mxu1 %v10838_v18  ;;  %v631_v53 = vand.u32 15, %v13456_v21 }
 0x1d1   : > { %vm10843_vm8 = vcmp.lt.s32.totalorder %v13448_v63, 15  ;;  %v1753_v32 = vsel %vm1724_vm6, %v13451_v57, %v1752_v33  ;;  %v1423_v3 = vmul.f32 %v10147_v10, %v13453_v4  ;;  %v1756_v11 = vrot.slane %v10750_v12, 7 }
 0x1d2   : > { %v1932_v63 = vmul.f32 %v13455_v55, %v1753_v32  ;;  %v9393_v10 = vpop.eup %9392  ;;  %v10863_v4 = vpack.c.bf16 %v2035_v34, %v1864_v58  ;;  %9406 = vpow2.f32 %v1592_v50  ;;  %v1755_v27 = vsel %vm1724_vm6, %v1752_v33, %v1754_v13  ;;  %v9551_v32 = vld [vmem:[%s13184_s4] ss:$0 sm:$0xff] }
 0x1d3   : > { %v1461_v57 = vmul.f32 %v9550_v61, %v1423_v3  ;;  %v1758_v31 = vrot.slane %v10762_v2, 7  ;;  %v9395_v25 = vpop.eup %9394  ;;  %v1623_v22 = vadd.f32 1.0, %v9393_v10  ;;  %vm915_vm9 = vcmp.gt.s32.totalorder %v631_v53, 0 }
 0x1d4   : > { %v10867_v14 = vpack.c.bf16 %v1755_v27, %v1932_v63  ;;  %v9397_v21 = vpop.eup %9396  ;;  %8396 = vmatprep.mubr.bf16.mxu1 %v10863_v4  ;;  %v10876_v50 = vmul.f32 %v9395_v25, %v10632_v38  ;;  %v10880_v33 = vpack.c.bf16 %v10762_v2, %v10750_v12  ;;  %v13457_v58 = vmov 0.0  }
 0x1d5   : > { %v10872_v3 = vadd.f32 %v9551_v32, %v1461_v57  ;;  %v10883_v34 = vsel %vm915_vm9, 1.0, %v13457_v58  ;;  %v1757_v63 = vsel %vm1724_vm6, %v1754_v13, %v1756_v11  ;;  %v9399_v61 = vpop.eup %9398  ;;  %v10887_v57 = vmul.f32 %v9397_v21, %v10661_v9 }
 0x1d6   : > { %13458 = vst [vmem:[#allocation71_spill] sm:$0xff] %v10883_v34  ;;  %9408 = vrcp.f32 %v1623_v22  ;;  %2459 = vmatmul.mubr.bf16.gmra.mrb[32].mxu0 %v10867_v14  ;;  %v503_v38 = vadd.s32 160, %v13446_v26  ;;  %v9401_v10 = vpop.eup %9400  ;;  %v1867_v12 = vrot.slane %v10876_v50, 1  ;;  %v1624_v2 = vadd.f32 1.0, %v9399_v61 }
 0x1d7   : > { %v1531_v53 = vsub.f32 0.0, %v10872_v3  ;;  %2466 = vmatprep.mubr.bf16.mxu0 %v10880_v33  ;;  %v1934_v27 = vmul.f32 %v10883_v34, %v1757_v63  ;;  %v645_v13 = vand.u32 15, %v501_v5  ;;  %v1869_v25 = vrot.slane %v10887_v57, 1  ;;  %v9403_v21 = vpop.eup %9402 }
 0x1d8   : > { %v10897_v9 = vmul.f32 %v9401_v10, %v10690_v47  ;;  %v1759_v32 = vsel %vm1724_vm6, %v1756_v11, %v1758_v31  ;;  %v1868_v44 = vsel %vm1821_vm7, %v1865_v24, %v1867_v12  ;;  %9410 = vrcp.f32 %v1624_v2  ;;  %v13459_v10 = vld [vmem:[#allocation63_spill] sm:$0xff] }
 0x1d9   : > { %v1594_v22 = vmul.f32 1.442695, %v1531_v53  ;;  %vm917_vm10 = vcmp.gt.s32.totalorder %v645_v13, 0  ;;  %v1760_v61 = vrot.slane %v10767_v28, 7  ;;  %v1870_v55 = vsel %vm1821_vm7, %v1867_v12, %v1869_v25 }
 0x1da   : > { %v10904_v63 = vmul.f32 %v9403_v21, %v10704_v20  ;;  %v1871_v5 = vrot.slane %v10897_v9, 1  ;;  %v9405_v47 = vpop.eup %9404  ;;  %v2037_v53 = vmul.f32 %v13459_v10, %v1870_v55  ;;  %v10911_v11 = vsel %vm10843_vm8, 1.0, %v13457_v58  ;;  %v13462_v55 = vld [vmem:[#allocation65_spill] sm:$0xff] }
 0x1db   : > { %9412 = vpow2.f32 %v1594_v22  ;;  %13460 = vst [vmem:[#allocation43_spill] sm:$0xff] %v10911_v11  ;;  %v10913_v24 = vpack.c.bf16 %v1759_v32, %v1934_v27  ;;  %v505_v2 = vadd.s32 176, %v13446_v26  ;;  %v1625_v13 = vadd.f32 1.0, %v9405_v47 }
 0x1dc   : > { %v13289_v12 = vrot.slane %v10904_v63, 1  ;;  %v10918_v20 = vsel %vm917_vm10, 1.0, %v13457_v58  ;;  %v1761_v22 = vsel %vm1724_vm6, %v1758_v31, %v1760_v61  ;;  %v9407_v21 = vpop.eup %9406  ;;  %v10921_v34 = vpack.c.bf16 %v2037_v53, %v1868_v44 }
 0x1dd   : > { %13461 = vst [vmem:[#allocation59_spill] sm:$0xff] %v10918_v20  ;;  %v708_v10 = vand.u32 15, %v13462_v55  ;;  %v10926_v48 = vpack.c.bf16 %v10791_v46, %v10767_v28  ;;  %v1762_v27 = vrot.slane %v10791_v46, 7  ;;  %v1626_v47 = vadd.f32 1.0, %v9407_v21 }
 0x1de   : > { %v1874_v32 = vsel %vm1821_vm7, %v1871_v5, %v13289_v12  ;;  %9414 = vrcp.f32 %v1625_v13  ;;  %2467 = vmatmul.mubr.bf16.gmra.mrb[36].mxu0 %v10913_v24  ;;  %v659_v31 = vand.u32 15, %v503_v38  ;;  %8397 = vmatmul.mubr.bf16.gmra.mrb[20].mxu1 %v10921_v34  ;;  %v1872_v44 = vsel %vm1821_vm7, %v1869_v25, %v1871_v5 }
 0x1df   : > { %v2039_v53 = vmul.f32 %v10911_v11, %v1874_v32  ;;  %v512_v28 = vadd.s32 232, %v13446_v26  ;;  %2474 = vmatprep.mubr.bf16.mxu0 %v10926_v48  ;;  %v1936_v46 = vmul.f32 %v10918_v20, %v1761_v22  ;;  %9416 = vrcp.f32 %v1626_v47 }
 0x1e0   : > { %v9409_v55 = vpop.eup %9408  ;;  %v1766_v21 = vrot.slane %v10810_v45, 7  ;;  %v10942_v13 = vpack.c.bf16 %v10876_v50, %v10823_v40  ;;  %v673_v38 = vand.u32 15, %v505_v2  ;;  %v1763_v5 = vsel %vm1724_vm6, %v1760_v61, %v1762_v27 }
 0x1e1   : > { %v10944_v12 = vpack.c.bf16 %v2039_v53, %v1872_v44  ;;  %v10947_v25 = vmul.f32 %v9409_v55, %v10747_v39  ;;  %v1764_v32 = vrot.slane %v10797_v17, 7  ;;  %vm10951_vm11 = vcmp.gt.s32.totalorder %v659_v31, 0 }
 0x1e2   : > { %vm921_vm12 = vcmp.gt.s32.totalorder %v673_v38, 0  ;;  %v1768_v47 = vrot.slane %v10823_v40, 7  ;;  %v1770_v20 = vrot.slane %v10876_v50, 7  ;;  %v9411_v11 = vpop.eup %9410  ;;  %vm1022_vm13 = vcmp.lt.s32.totalorder %v708_v10, 15 }
 0x1e3   : > { %8400 = vmatprep.mubr.bf16.mxu1 %v10944_v12  ;;  %v10958_v2 = vpack.c.bf16 %v1763_v5, %v1936_v46  ;;  %v10962_v39 = vpack.c.bf16 %v10810_v45, %v10797_v17  ;;  %v10965_v61 = vsel %vm921_vm12, 1.0, %v13457_v58  ;;  %v10968_v44 = vmul.f32 %v9411_v11, %v10755_v60 }
 0x1e4   : > { %13465 = vst [vmem:[#allocation67_spill] sm:$0xff] %v10965_v61  ;;  %v1875_v40 = vrot.slane %v10947_v25, 1  ;;  %v1769_v50 = vsel %vm1724_vm6, %v1766_v21, %v1768_v47  ;;  %v1771_v53 = vsel %vm1724_vm6, %v1768_v47, %v1770_v20  ;;  %v10976_v46 = vsel %vm10951_vm11, 1.0, %v13457_v58 }
 0x1e5   : > { %v9413_v31 = vpop.eup %9412  ;;  %13466 = vst [vmem:[#allocation65_spill] sm:$0xff] %v10976_v46  ;;  %v1765_v17 = vsel %vm1724_vm6, %v1762_v27, %v1764_v32  ;;  %v1940_v45 = vmul.f32 %v10965_v61, %v1769_v50  ;;  %v10981_v55 = vsel %vm1022_vm13, 1.0, %v13457_v58  ;;  %v1877_v60 = vrot.slane %v10968_v44, 1 }
 0x1e6   : > { %v1627_v10 = vadd.f32 1.0, %v9413_v31  ;;  %13467 = vst [vmem:[#allocation74_spill] sm:$0xff] %v10981_v55  ;;  %v722_v11 = vand.u32 15, %v512_v28  ;;  %2475 = vmatmul.mubr.bf16.gmra.mrb[40].mxu0 %v10958_v2  ;;  %v1938_v27 = vmul.f32 %v10976_v46, %v1765_v17  ;;  %v514_v50 = vadd.s32 248, %v13446_v26 }
 0x1e7   : > { %2482 = vmatprep.mubr.bf16.mxu0 %v10962_v39  ;;  %v10986_v38 = vpack.c.bf16 %v1771_v53, %v1940_v45  ;;  %v1878_v22 = vsel %vm1821_vm7, %v1875_v40, %v1877_v60  ;;  %v13468_v61 = vrot.slane %v10904_v63, 1  ;;  %v507_v53 = vadd.s32 192, %v13446_v26 }
 0x1e8   : > { %9418 = vrcp.f32 %v1627_v10  ;;  %v9415_v5 = vpop.eup %9414  ;;  %v2041_v47 = vmul.f32 %v10981_v55, %v1878_v22  ;;  %vm1024_vm14 = vcmp.lt.s32.totalorder %v722_v11, 15  ;;  %v1776_v46 = vrot.slane %v10904_v63, 7 }
 0x1e9   : > { %v10992_v31 = vmul.f32 %v9415_v5, %v10818_v6  ;;  %v9417_v28 = vpop.eup %9416  ;;  %v1876_v10 = vsel %vm1821_vm7, %v13468_v61, %v1875_v40  ;;  %v1767_v6 = vsel %vm1724_vm6, %v1764_v32, %v1766_v21  ;;  %v11010_v22 = vsel %vm1024_vm14, 1.0, %v13457_v58 }
 0x1ea   : > { %v10999_v45 = vpack.c.bf16 %v2041_v47, %v1876_v10  ;;  %v11002_v51 = vmul.f32 %v9417_v28, %v10828_v19  ;;  %v11006_v5 = vpack.c.bf16 %v1767_v6, %v1938_v27  ;;  %13469 = vst [vmem:[#allocation75_spill] sm:$0xff] %v11010_v22  ;;  %v736_v40 = vand.u32 15, %v514_v50 }
 0x1eb   : > { %v1879_v17 = vrot.slane %v10992_v31, 1  ;;  %v687_v11 = vand.u32 15, %v507_v53  ;;  %v1772_v27 = vrot.slane %v10887_v57, 7  ;;  %v509_v50 = vadd.s32 208, %v13446_v26 }
 0x1ec   : > { %8401 = vmatmul.mubr.bf16.gmra.mrb[24].mxu1 %v10999_v45  ;;  %v1881_v61 = vrot.slane %v11002_v51, 1  ;;  %vm1026_vm15 = vcmp.lt.s32.totalorder %v736_v40, 15 }
 0x1ed   : > { %v1880_v32 = vsel %vm1821_vm7, %v1877_v60, %v1879_v17  ;;  %vm923_vm1 = vcmp.gt.s32.totalorder %v687_v11, 0  ;;  %v11027_v53 = vsel %vm1026_vm15, 1.0, %v13457_v58  ;;  %v11032_v60 = vpack.c.bf16 %v10897_v9, %v10887_v57 }
 0x1ee   : > { %2483 = vmatmul.mubr.bf16.gmra.mrb[44].mxu0 %v11006_v5  ;;  %v1882_v19 = vsel %vm1821_vm7, %v1879_v17, %v1881_v61  ;;  %13470 = vst [vmem:[#allocation76_spill] sm:$0xff] %v11027_v53  ;;  %v11035_v17 = vsel %vm923_vm1, 1.0, %v13457_v58  ;;  %v701_v11 = vand.u32 15, %v509_v50 }
 0x1ef   : > { %2490 = vmatprep.mubr.bf16.mxu0 %v10942_v13  ;;  %v2043_v47 = vmul.f32 %v11010_v22, %v1882_v19  ;;  %13471 = vst [vmem:[#allocation77_spill] sm:$0xff] %v11035_v17 }
 0x1f0   : > { %vm925_vm2 = vcmp.gt.s32.totalorder %v701_v11, 0 }
 0x1f1   : > { %v11019_v28 = vpack.c.bf16 %v2043_v47, %v1880_v32  ;;  %v1774_v47 = vrot.slane %v10897_v9, 7  ;;  %v11056_v9 = vpack.c.bf16 %v10947_v25, %v10904_v63  ;;  %v1780_v63 = vrot.slane %v10968_v44, 7 }
 0x1f2   : > { %v9419_v21 = vpop.eup %9418 }
 0x1f3   : > { %v11022_v10 = vmul.f32 %v9419_v21, %v10872_v3  ;;  %8404 = vmatprep.mubr.bf16.mxu1 %v11019_v28  ;;  %v1773_v3 = vsel %vm1724_vm6, %v1770_v20, %v1772_v27  ;;  %v511_v20 = vadd.s32 224, %v13446_v26  ;;  %v1775_v50 = vsel %vm1724_vm6, %v1772_v27, %v1774_v47 }
 0x1f4   : > { %v1942_v57 = vmul.f32 %v11035_v17, %v1773_v3  ;;  %v1778_v27 = vrot.slane %v10947_v25, 7 }
 0x1f5   : > { %v1883_v6 = vrot.slane %v11022_v10, 1  ;;  %v715_v3 = vand.u32 15, %v511_v20  ;;  %v9192_v20 = vld [vmem:[%s13185_s5 + $0x90] sm:$0xff]  }
 0x1f6   : > { %2491 = vmatmul.mubr.bf16.gmra.mrb[48].mxu0 %v10986_v38 }
 0x1f7   : > { %v1917_v40 = vsel %vm1821_vm7, %v1883_v6, 0.0  ;;  %2498 = vmatprep.mubr.bf16.mxu0 %v11032_v60  ;;  %v1884_v21 = vsel %vm1821_vm7, %v1881_v61, %v1883_v6  ;;  %v11059_v61 = vsel %vm925_vm2, 1.0, %v13457_v58  ;;  %v1777_v6 = vsel %vm1724_vm6, %v1774_v47, %v1776_v46 }
 0x1f8   : > { %v2045_v19 = vmul.f32 %v11027_v53, %v1917_v40  ;;  %v13295_v40 = vmov 0   ;;  %v11052_v53 = vpack.c.bf16 %v1775_v50, %v1942_v57  ;;  %13472 = vst [vmem:[#allocation78_spill] sm:$0xff] %v11059_v61  ;;  %v1944_v11 = vmul.f32 %v11059_v61, %v1777_v6  ;;  %v13473_v57 = vld [vmem:[#allocation72_spill] sm:$0xff] }
 0x1f9   : > { %vm927_vm3 = vcmp.gt.s32.totalorder %v715_v3, 0  ;;  %v1779_v47 = vsel %vm1724_vm6, %v1776_v46, %v1778_v27  ;;  %v11082_v50 = vpack.c.bf16 %v10992_v31, %v10968_v44  ;;  %v1781_v46 = vsel %vm1724_vm6, %v1778_v27, %v1780_v63  ;;  %v9197_v44 = vld [vmem:[%s13185_s5 + $0x98] sm:$0xff]  }
 0x1fa   : > { %v11045_v32 = vpack.c.bf16 %v2045_v19, %v1884_v21  ;;  %v9189_v19 = vld [vmem:[%s13185_s5 + $0x88] sm:$0xff]   ;;  %v513_v21 = vadd.s32 240, %v13446_v26  ;;  %v11075_v25 = vpack.c.bf16 %v1779_v47, %v1944_v11  ;;  %v11085_v26 = vsel %vm927_vm3, 1.0, %v13457_v58 }
 0x1fb   : > { %13474 = vst [vmem:[#allocation72_spill] sm:$0xff] %v11085_v26  ;;  %v1782_v6 = vrot.slane %v10992_v31, 7  ;;  %v1946_v3 = vmul.f32 %v11085_v26, %v1781_v46  ;;  %v1784_v11 = vrot.slane %v11002_v51, 7  ;;  %v11103_v31 = vpack.c.bf16 %v11022_v10, %v11002_v51  ;;  %v9207_v51 = vld [vmem:[%s13185_s5 + $0xa8] sm:$0xff]  }
 0x1fc   : > { %8405 = vmatmul.mubr.bf16.gmra.mrb[28].mxu1 %v11045_v32 }
 0x1fd   : > { %2868 = vmatprep.mubr.bf16.mxu1 %v13295_v40  ;;  %v1783_v27 = vsel %vm1724_vm6, %v1780_v63, %v1782_v6  ;;  %v1785_v47 = vsel %vm1724_vm6, %v1782_v6, %v1784_v11  ;;  %v1786_v63 = vrot.slane %v11022_v10, 7  ;;  %v9208_v10 = vld [vmem:[%s13185_s5 + $0xb0] sm:$0xff]   ;;  %v11137_v6 = vld [vmem:[%s13185_s5 + $0x200] sm:$0xff]  }
 0x1fe   : > { %2499 = vmatmul.mubr.bf16.gmra.mrb[52].mxu0 %v11052_v53 }
 0x1ff   : > { %2506 = vmatprep.mubr.bf16.mxu0 %v11056_v9 }
 0x204   : > { %2869 = vmatmul.mubr.bf16.vlgmr.msra.gmra.mrb[32].mxu1 %v13295_v40 }
 0x205   : > { %8409 = vmatpush3.bf16.msra.mxu1 %v10712_v56  ;;  %2876 = vmatprep.mubr.bf16.mxu1 %v13473_v57  ;;  %v729_v56 = vand.u32 15, %v513_v21  ;;  %v11099_v21 = vpack.c.bf16 %v1783_v27, %v1946_v3  ;;  %v13477_v3 = vld [vmem:[#allocation4_spill] sm:$0xff]  ;;  %v9213_v27 = vld [vmem:[%s13185_s5 + $0x218] sm:$0xff]  }
 0x206   : > { %8410 = vmatprep.subr.bf16.mxu1 %v9189_v19  ;;  %2507 = vmatmul.mubr.bf16.gmra.mrb[56].mxu0 %v11075_v25 }
 0x207   : > { %2514 = vmatprep.mubr.bf16.mxu0 %v11082_v50  ;;  %vm929_vm4 = vcmp.gt.s32.totalorder %v729_v56, 0  ;;  %v9209_v56 = vld [vmem:[%s13185_s5 + $0xb8] sm:$0xff]  }
 0x209   : > { %8411 = vmatpush3.bf16.msra.mxu1 %v9189_v19  ;;  %v11106_v19 = vsel %vm929_vm4, 1.0, %v13457_v58 }
 0x20a   : > { %8412 = vmatprep.subr.bf16.mxu1 %v9192_v20  ;;  %13475 = vst [vmem:[#allocation79_spill] sm:$0xff] %v11106_v19  ;;  %v1948_v57 = vmul.f32 %v11106_v19, %v1785_v47 }
 0x20c   : > { %2877 = vmatmul.mubr.bf16.gmra.mrb[36].mxu1 %v10419_v49  ;;  %v9206_v49 = vld [vmem:[%s13185_s5 + $0xa0] sm:$0xff]  }
 0x20d   : > { %2884 = vmatprep.mubr.bf16.mxu1 %v10427_v8  ;;  %8413 = vmatpush3.bf16.msra.mxu1 %v9192_v20  ;;  %v1787_v20 = vsel %vm1724_vm6, %v1784_v11, %v1786_v63 }
 0x20e   : > { %8414 = vmatprep.subr.bf16.mxu1 %v9197_v44  ;;  %2515 = vmatmul.mubr.bf16.gmra.mrb[60].mxu0 %v11099_v21  ;;  %v11122_v46 = vpack.c.bf16 %v1787_v20, %v1948_v57  ;;  %v9215_v20 = vld [vmem:[%s13185_s5 + $0x228] sm:$0xff]  }
 0x20f   : > { %2522 = vmatprep.mubr.bf16.mxu0 %v11103_v31 }
 0x211   : > { %8415 = vmatpush3.bf16.msra.mxu1 %v9197_v44  ;;  %v13480_v44 = vld [vmem:[#allocation10_spill] sm:$0xff] }
 0x212   : > { %8416 = vmatprep.subr.bf16.mxu1 %v9206_v49 }
 0x214   : > { %2885 = vmatmul.mubr.bf16.gmra.mrb[40].mxu1 %v10477_v43 }
 0x215   : > { %2892 = vmatprep.mubr.bf16.mxu1 %v10463_v41  ;;  %8417 = vmatpush3.bf16.msra.mxu1 %v9206_v49 }
 0x216   : > { %8418 = vmatprep.subr.bf16.mxu1 %v9207_v51  ;;  %2523 = vmatmul.mubr.bf16.gmra.mrb[64].mxu0 %v11122_v46 }
 0x217   : > { %3431 = vmatprep.mubr.bf16.mxu0 %v10427_v8  ;;  %v13476_v8 = vld [vmem:[#allocation3_spill] sm:$0xff] }
 0x219   : > { %8419 = vmatpush3.bf16.msra.mxu1 %v9207_v51 }
 0x21a   : > { %8420 = vmatprep.subr.bf16.mxu1 %v9208_v10 }
 0x21c   : > { %2893 = vmatmul.mubr.bf16.gmra.mrb[44].mxu1 %v10524_v35 }
 0x21d   : > { %2900 = vmatprep.mubr.bf16.mxu1 %v10491_v30  ;;  %8421 = vmatpush3.bf16.msra.mxu1 %v9208_v10 }
 0x21e   : > { %8422 = vmatprep.subr.bf16.mxu1 %v9209_v56  ;;  %3432 = vmatmul.mubr.bf16.vlgmr.msra.gmra.mrb[68].mxu0 %v10477_v43  ;;  %v13479_v43 = vld [vmem:[#allocation6_spill] sm:$0xff] }
 0x21f   : > { %3439 = vmatprep.mubr.bf16.mxu0 %v10463_v41  ;;  %8768 = vmatpush3.bf16.msra.mxu0 %v13476_v8  ;;  %v13478_v41 = vld [vmem:[#allocation5_spill] sm:$0xff] }
 0x220   : > { %8769 = vmatprep.subr.bf16.mxu0 %v13437_v52 }
 0x221   : > { %8423 = vmatpush3.bf16.msra.mxu1 %v9209_v56 }
 0x222   : > { %8456 = vmatprep.subr.bf16.mxu1 %v11137_v6 }
 0x223   : > { %8771 = vmatpush3.bf16.msra.mxu0 %v13477_v3 }
 0x224   : > { %2901 = vmatmul.mubr.bf16.gmra.mrb[48].mxu1 %v10569_v62  ;;  %8772 = vmatprep.subr.bf16.mxu0 %v13437_v52 }
 0x225   : > { %2908 = vmatprep.mubr.bf16.mxu1 %v10548_v15 }
 0x226   : > { %3440 = vmatmul.mubr.bf16.gmra.mrb[72].mxu0 %v10524_v35  ;;  %v13482_v35 = vld [vmem:[#allocation16_spill] sm:$0xff] }
 0x227   : > { %3447 = vmatprep.mubr.bf16.mxu0 %v10491_v30  ;;  %8774 = vmatpush3.bf16.msra.mxu0 %v13478_v41  ;;  %v13481_v30 = vld [vmem:[#allocation13_spill] sm:$0xff] }
 0x228   : > { %8775 = vmatprep.subr.bf16.mxu0 %v13437_v52 }
 0x22b   : > { %8777 = vmatpush3.bf16.msra.mxu0 %v13479_v43 }
 0x22c   : > { %2909 = vmatmul.mubr.bf16.gmra.mrb[52].mxu1 %v10604_v54  ;;  %8778 = vmatprep.subr.bf16.mxu0 %v13437_v52 }
 0x22d   : > { %2916 = vmatprep.mubr.bf16.mxu1 %v10566_v59 }
 0x22e   : > { %3448 = vmatmul.mubr.bf16.gmra.mrb[76].mxu0 %v10569_v62 }
 0x22f   : > { %3455 = vmatprep.mubr.bf16.mxu0 %v10548_v15  ;;  %8780 = vmatpush3.bf16.msra.mxu0 %v13480_v44  ;;  %v13483_v15 = vld [vmem:[#allocation19_spill] sm:$0xff] }
 0x230   : > { %8781 = vmatprep.subr.bf16.mxu0 %v13437_v52 }
 0x233   : > { %8783 = vmatpush3.bf16.msra.mxu0 %v13481_v30 }
 0x234   : > { %2917 = vmatmul.mubr.bf16.gmra.mrb[56].mxu1 %v10647_v1  ;;  %8784 = vmatprep.subr.bf16.mxu0 %v13437_v52 }
 0x235   : > { %2924 = vmatprep.mubr.bf16.mxu1 %v10658_v23 }
 0x236   : > { %3456 = vmatmul.mubr.bf16.gmra.mrb[80].mxu0 %v10604_v54 }
 0x237   : > { %3463 = vmatprep.mubr.bf16.mxu0 %v10566_v59  ;;  %8786 = vmatpush3.bf16.msra.mxu0 %v13482_v35 }
 0x238   : > { %8787 = vmatprep.subr.bf16.mxu0 %v13437_v52 }
 0x23b   : > { %8789 = vmatpush3.bf16.msra.mxu0 %v13483_v15 }
 0x23c   : > { %2925 = vmatmul.mubr.bf16.gmra.mrb[60].mxu1 %v10752_v7  ;;  %8790 = vmatprep.subr.bf16.mxu0 %v13437_v52 }
 0x23d   : > { %2932 = vmatprep.mubr.bf16.mxu1 %v10814_v37 }
 0x23e   : > { %3464 = vmatmul.mubr.bf16.gmra.mrb[84].mxu0 %v10647_v1 }
 0x23f   : > { %3471 = vmatprep.mubr.bf16.mxu0 %v10658_v23 }
 0x244   : > { %2933 = vmatmul.mubr.bf16.gmra.mrb[64].mxu1 %v10867_v14 }
 0x245   : > { %2940 = vmatprep.mubr.bf16.mxu1 %v10880_v33 }
 0x246   : > { %3472 = vmatmul.mubr.bf16.gmra.mrb[88].mxu0 %v10752_v7 }
 0x247   : > { %3479 = vmatprep.mubr.bf16.mxu0 %v10814_v37 }
 0x24c   : > { %2941 = vmatmul.mubr.bf16.gmra.mrb[68].mxu1 %v10913_v24 }
 0x24d   : > { %2948 = vmatprep.mubr.bf16.mxu1 %v10926_v48 }
 0x24e   : > { %3480 = vmatmul.mubr.bf16.gmra.mrb[92].mxu0 %v10867_v14 }
 0x24f   : > { %3487 = vmatprep.mubr.bf16.mxu0 %v10880_v33 }
 0x254   : > { %2949 = vmatmul.mubr.bf16.gmra.mrb[72].mxu1 %v10958_v2 }
 0x255   : > { %2956 = vmatprep.mubr.bf16.mxu1 %v10962_v39 }
 0x256   : > { %3488 = vmatmul.mubr.bf16.gmra.mrb[96].mxu0 %v10913_v24 }
 0x257   : > { %3495 = vmatprep.mubr.bf16.mxu0 %v10926_v48 }
 0x25c   : > { %2957 = vmatmul.mubr.bf16.gmra.mrb[76].mxu1 %v11006_v5 }
 0x25d   : > { %2964 = vmatprep.mubr.bf16.mxu1 %v10942_v13 }
 0x25e   : > { %3496 = vmatmul.mubr.bf16.gmra.mrb[100].mxu0 %v10958_v2 }
 0x25f   : > { %3503 = vmatprep.mubr.bf16.mxu0 %v10962_v39  ;;  %v9211_v39 = vld [vmem:[%s13185_s5 + $0x208] sm:$0xff]  }
 0x264   : > { %2965 = vmatmul.mubr.bf16.gmra.mrb[80].mxu1 %v10986_v38 }
 0x265   : > { %2972 = vmatprep.mubr.bf16.mxu1 %v11032_v60 }
 0x266   : > { %3504 = vmatmul.mubr.bf16.gmra.mrb[104].mxu0 %v11006_v5 }
 0x267   : > { %3511 = vmatprep.mubr.bf16.mxu0 %v10942_v13 }
 0x26b   : > { %v7456_v59 = vpop.f32.mrb[4].mxu0 }
 0x26c   : > { %2973 = vmatmul.mubr.bf16.gmra.mrb[84].mxu1 %v11052_v53  ;;  %v7457_v62 = vpop.f32.mrb[5].mxu0 }
 0x26d   : > { %2980 = vmatprep.mubr.bf16.mxu1 %v11056_v9  ;;  %v11198_v54 = vadd.f32 %v7457_v62, %v7456_v59  ;;  %v7459_v1 = vpop.f32.mrb[6].mxu0  ;;  %v9216_v62 = vld [vmem:[%s13185_s5 + $0x230] sm:$0xff]  }
 0x26e   : > { %3512 = vmatmul.mubr.bf16.gmra.mrb[108].mxu0 %v10986_v38  ;;  %v7460_v23 = vpop.f32.mrb[7].mxu0 }
 0x26f   : > { %3519 = vmatprep.mubr.bf16.mxu0 %v11032_v60  ;;  %v11202_v7 = vadd.f32 %v7460_v23, %v7459_v1  ;;  %v13484_v60 = vld [vmem:[#allocation73_spill] sm:$0xff]  ;;  %v9217_v23 = vld [vmem:[%s13185_s5 + $0x238] sm:$0xff]  }
 0x273   : > { %v7462_v37 = vpop.f32.mrb[8].mxu0 }
 0x274   : > { %2981 = vmatmul.mubr.bf16.gmra.mrb[88].mxu1 %v11075_v25  ;;  %v7463_v14 = vpop.f32.mrb[9].mxu0 }
 0x275   : > { %2988 = vmatprep.mubr.bf16.mxu1 %v11082_v50  ;;  %v11206_v33 = vadd.f32 %v7463_v14, %v7462_v37  ;;  %v7465_v24 = vpop.f32.mrb[10].mxu0 }
 0x276   : > { %3520 = vmatmul.mubr.bf16.gmra.mrb[112].mxu0 %v11052_v53  ;;  %v7466_v48 = vpop.f32.mrb[11].mxu0 }
 0x277   : > { %3527 = vmatprep.mubr.bf16.mxu0 %v11056_v9  ;;  %v11210_v13 = vadd.f32 %v7466_v48, %v7465_v24  ;;  %v13485_v48 = vld [vmem:[#allocation68_spill] sm:$0xff] }
 0x27b   : > { %v7468_v2 = vpop.f32.mrb[12].mxu0 }
 0x27c   : > { %2989 = vmatmul.mubr.bf16.gmra.mrb[92].mxu1 %v11099_v21  ;;  %v7469_v38 = vpop.f32.mrb[13].mxu0 }
 0x27d   : > { %8424 = vmatprep.mubr.bf16.mxu1 %v13295_v40  ;;  %v11217_v5 = vadd.f32 %v7469_v38, %v7468_v2  ;;  %v7471_v53 = vpop.f32.mrb[14].mxu0 }
 0x27e   : > { %3528 = vmatmul.mubr.bf16.gmra.mrb[116].mxu0 %v11075_v25  ;;  %v7472_v9 = vpop.f32.mrb[15].mxu0  ;;  %v9212_v25 = vld [vmem:[%s13185_s5 + $0x210] sm:$0xff]  }
 0x27f   : > { %3535 = vmatprep.mubr.bf16.mxu0 %v11082_v50  ;;  %v11222_v11 = vadd.f32 %v7472_v9, %v7471_v53 }
 0x283   : > { %v7474_v50 = vpop.f32.mrb[16].mxu0 }
 0x284   : > { %8425 = vmatmul.mubr.bf16.vlgmr.msra.gmra.mrb[0].mxu1 %v13484_v60  ;;  %v7475_v47 = vpop.f32.mrb[17].mxu0 }
 0x285   : > { %8457 = vmatpush3.bf16.msra.mxu1 %v11137_v6  ;;  %8428 = vmatprep.mubr.bf16.mxu1 %v10455_v29  ;;  %v11232_v49 = vadd.f32 %v7475_v47, %v7474_v50  ;;  %v7477_v63 = vpop.f32.mrb[18].mxu0  ;;  %v13487_v50 = vld [vmem:[#allocation70_spill] sm:$0xff] }
 0x286   : > { %8458 = vmatprep.subr.bf16.mxu1 %v9211_v39  ;;  %3536 = vmatmul.mubr.bf16.gmra.mrb[120].mxu0 %v11099_v21  ;;  %v7478_v57 = vpop.f32.mrb[19].mxu0 }
 0x287   : > { %3543 = vmatprep.mubr.bf16.mxu0 %v11103_v31  ;;  %v11236_v21 = vadd.f32 %v7478_v57, %v7477_v63  ;;  %v9214_v31 = vld [vmem:[%s13185_s5 + $0x220] sm:$0xff]  }
 0x289   : > { %8459 = vmatpush3.bf16.msra.mxu1 %v9211_v39  ;;  %v13486_v39 = vld [vmem:[#allocation69_spill] sm:$0xff] }
 0x28a   : > { %8460 = vmatprep.subr.bf16.mxu1 %v9212_v25 }
 0x28b   : > { %v7480_v51 = vpop.f32.mrb[20].mxu0 }
 0x28c   : > { %8429 = vmatmul.mubr.bf16.gmra.mrb[4].mxu1 %v10482_v16  ;;  %v7481_v10 = vpop.f32.mrb[21].mxu0 }
 0x28d   : > { %8432 = vmatprep.mubr.bf16.mxu1 %v10516_v0  ;;  %8461 = vmatpush3.bf16.msra.mxu1 %v9212_v25  ;;  %v11246_v56 = vadd.f32 %v7481_v10, %v7480_v51  ;;  %v7483_v6 = vpop.f32.mrb[22].mxu0 }
 0x28e   : > { %8462 = vmatprep.subr.bf16.mxu1 %v9213_v27  ;;  %3544 = vmatmul.mubr.bf16.gmra.mrb[124].mxu0 %v11122_v46  ;;  %v7484_v59 = vpop.f32.mrb[23].mxu0 }
 0x28f   : > { %3551 = vmatprep.mubr.bf16.mxu0 %v13295_v40  ;;  %v11250_v46 = vadd.f32 %v7484_v59, %v7483_v6 }
 0x291   : > { %8463 = vmatpush3.bf16.msra.mxu1 %v9213_v27 }
 0x292   : > { %8464 = vmatprep.subr.bf16.mxu1 %v9214_v31 }
 0x293   : > { %v7486_v1 = vpop.f32.mrb[24].mxu0 }
 0x294   : > { %8433 = vmatmul.mubr.bf16.gmra.mrb[8].mxu1 %v10534_v36  ;;  %v7487_v37 = vpop.f32.mrb[25].mxu0 }
 0x295   : > { %8436 = vmatprep.mubr.bf16.mxu1 %v10667_v42  ;;  %8465 = vmatpush3.bf16.msra.mxu1 %v9214_v31  ;;  %v11261_v14 = vadd.f32 %v7487_v37, %v7486_v1  ;;  %v7489_v24 = vpop.f32.mrb[26].mxu0 }
 0x296   : > { %8466 = vmatprep.subr.bf16.mxu1 %v9215_v20  ;;  %3552 = vmatmul.mubr.bf16.gmra.mrb[128].mxu0 %v13295_v40  ;;  %v7490_v2 = vpop.f32.mrb[27].mxu0 }
 0x297   : > { %8536 = vmatprep.mubr.msk.f32.mxu0 %vm9561_vm0, %v13457_v58  ;;  %v11265_v38 = vadd.f32 %v7490_v2, %v7489_v24 }
 0x299   : > { %8467 = vmatpush3.bf16.msra.mxu1 %v9215_v20 }
 0x29a   : > { %8468 = vmatprep.subr.bf16.mxu1 %v9216_v62 }
 0x29c   : > { %8437 = vmatmul.mubr.bf16.gmra.mrb[12].mxu1 %v13485_v48  ;;  %v7492_v53 = vpop.f32.mrb[28].mxu0 }
 0x29d   : > { %8440 = vmatprep.mubr.bf16.mxu1 %v13486_v39  ;;  %8469 = vmatpush3.bf16.msra.mxu1 %v9216_v62  ;;  %v7493_v60 = vpop.f32.mrb[29].mxu0 }
 0x29e   : > { %8470 = vmatprep.subr.bf16.mxu1 %v9217_v23  ;;  %v11267_v9 = vadd.f32 %v7493_v60, %v7492_v53  ;;  %v7495_v25 = vpop.f32.mrb[30].mxu0 }
 0x29f   : > { %v7496_v27 = vpop.f32.mrb[31].mxu0 }
 0x2a0   : > { %v11271_v47 = vadd.f32 %v7496_v27, %v7495_v25 }
 0x2a1   : > { %8471 = vmatpush3.bf16.msra.mxu1 %v9217_v23 }
 0x2a4   : > { %8441 = vmatmul.mubr.bf16.gmra.mrb[16].mxu1 %v13487_v50 }
 0x2a5   : > { %8444 = vmatprep.mubr.bf16.mxu1 %v10838_v18 }
 0x2a9   : > { %v7498_v63 = vpop.f32.mrb[32].mxu0 }
 0x2aa   : > { %v7499_v57 = vpop.f32.mrb[33].mxu0 }
 0x2ab   : > { %v11274_v31 = vadd.f32 %v7499_v57, %v7498_v63  ;;  %v7501_v51 = vpop.f32.mrb[34].mxu0 }
 0x2ac   : > { %8445 = vmatmul.mubr.bf16.gmra.mrb[20].mxu1 %v10863_v4  ;;  %v7502_v20 = vpop.f32.mrb[35].mxu0 }
 0x2ad   : > { %8448 = vmatprep.mubr.bf16.mxu1 %v10921_v34  ;;  %v11277_v10 = vadd.f32 %v7502_v20, %v7501_v51 }
 0x2b1   : > { %v7504_v6 = vpop.f32.mrb[36].mxu0 }
 0x2b2   : > { %v7505_v59 = vpop.f32.mrb[37].mxu0 }
 0x2b3   : > { %v11280_v62 = vadd.f32 %v7505_v59, %v7504_v6  ;;  %v7507_v1 = vpop.f32.mrb[38].mxu0 }
 0x2b4   : > { %8449 = vmatmul.mubr.bf16.gmra.mrb[24].mxu1 %v10944_v12  ;;  %v7508_v23 = vpop.f32.mrb[39].mxu0 }
 0x2b5   : > { %8452 = vmatprep.mubr.bf16.mxu1 %v10999_v45  ;;  %v11283_v37 = vadd.f32 %v7508_v23, %v7507_v1 }
 0x2b9   : > { %v7510_v24 = vpop.f32.mrb[40].mxu0 }
 0x2ba   : > { %v7511_v2 = vpop.f32.mrb[41].mxu0 }
 0x2bb   : > { %v11286_v53 = vadd.f32 %v7511_v2, %v7510_v24  ;;  %v7513_v60 = vpop.f32.mrb[42].mxu0 }
 0x2bc   : > { %8453 = vmatmul.mubr.bf16.gmra.mrb[28].mxu1 %v11019_v28  ;;  %v7514_v25 = vpop.f32.mrb[43].mxu0 }
 0x2bd   : > { %8472 = vmatprep.mubr.bf16.mxu1 %v10455_v29  ;;  %v11289_v27 = vadd.f32 %v7514_v25, %v7513_v60 }
 0x2c1   : > { %v7516_v63 = vpop.f32.mrb[44].mxu0 }
 0x2c2   : > { %v7517_v57 = vpop.f32.mrb[45].mxu0 }
 0x2c3   : > { %v11292_v51 = vadd.f32 %v7517_v57, %v7516_v63  ;;  %v7519_v20 = vpop.f32.mrb[46].mxu0 }
 0x2c4   : > { %8473 = vmatmul.mubr.bf16.vlgmr.msra.gmra.mrb[0].mxu1 %v10482_v16  ;;  %v7520_v6 = vpop.f32.mrb[47].mxu0 }
 0x2c5   : > { %8476 = vmatprep.mubr.bf16.mxu1 %v10516_v0  ;;  %v11295_v59 = vadd.f32 %v7520_v6, %v7519_v20 }
 0x2c9   : > { %v7522_v1 = vpop.f32.mrb[48].mxu0 }
 0x2ca   : > { %v7523_v23 = vpop.f32.mrb[49].mxu0 }
 0x2cb   : > { %v11298_v29 = vadd.f32 %v7523_v23, %v7522_v1  ;;  %v7525_v24 = vpop.f32.mrb[50].mxu0 }
 0x2cc   : > { %8477 = vmatmul.mubr.bf16.gmra.mrb[4].mxu1 %v10534_v36  ;;  %v7526_v2 = vpop.f32.mrb[51].mxu0 }
 0x2cd   : > { %8480 = vmatprep.mubr.bf16.mxu1 %v10667_v42  ;;  %v11301_v60 = vadd.f32 %v7526_v2, %v7525_v24 }
 0x2d1   : > { %v7528_v16 = vpop.f32.mrb[52].mxu0 }
 0x2d2   : > { %v7529_v25 = vpop.f32.mrb[53].mxu0 }
 0x2d3   : > { %v11304_v0 = vadd.f32 %v7529_v25, %v7528_v16  ;;  %v7531_v63 = vpop.f32.mrb[54].mxu0 }
 0x2d4   : > { %8481 = vmatmul.mubr.bf16.gmra.mrb[8].mxu1 %v13485_v48  ;;  %v7532_v57 = vpop.f32.mrb[55].mxu0 }
 0x2d5   : > { %8484 = vmatprep.mubr.bf16.mxu1 %v13486_v39  ;;  %v11307_v20 = vadd.f32 %v7532_v57, %v7531_v63 }
 0x2d7   : > { %v7592_v36 = vpop.f32.mrb[32].mxu1 }
 0x2d8   : > { %v7593_v6 = vpop.f32.mrb[33].mxu1 }
 0x2d9   : > { %v7594_v1 = vadd.f32 %v7593_v6, %v7592_v36  ;;  %v7595_v23 = vpop.f32.mrb[34].mxu1  ;;  %v7534_v40 = vpop.f32.mrb[56].mxu0 }
 0x2da   : > { %v7596_v42 = vpop.f32.mrb[35].mxu1  ;;  %v7535_v19 = vpop.f32.mrb[57].mxu0 }
 0x2db   : > { %v8817_v24 = vadd.f32 %v7594_v1, %v11198_v54  ;;  %v7597_v2 = vadd.f32 %v7596_v42, %v7595_v23  ;;  %v11311_v48 = vadd.f32 %v7535_v19, %v7534_v40  ;;  %v7537_v16 = vpop.f32.mrb[58].mxu0 }
 0x2dc   : > { %8485 = vmatmul.mubr.bf16.gmra.mrb[12].mxu1 %v13487_v50  ;;  %v7538_v25 = vpop.f32.mrb[59].mxu0 }
 0x2dd   : > { %v8823_v39 = vadd.f32 %v7597_v2, %v11202_v7  ;;  %8488 = vmatprep.mubr.bf16.mxu1 %v10838_v18  ;;  %v11315_v63 = vadd.f32 %v7538_v25, %v7537_v16 }
 0x2df   : > { %v7598_v57 = vpop.f32.mrb[36].mxu1 }
 0x2e0   : > { %v7599_v36 = vpop.f32.mrb[37].mxu1 }
 0x2e1   : > { %v7600_v6 = vadd.f32 %v7599_v36, %v7598_v57  ;;  %v7601_v26 = vpop.f32.mrb[38].mxu1  ;;  %v7540_v54 = vpop.f32.mrb[60].mxu0 }
 0x2e2   : > { %v7602_v61 = vpop.f32.mrb[39].mxu1  ;;  %v7541_v50 = vpop.f32.mrb[61].mxu0 }
 0x2e3   : > { %v8814_v1 = vadd.f32 %v7600_v6, %v11206_v33  ;;  %v7603_v23 = vadd.f32 %v7602_v61, %v7601_v26  ;;  %v11319_v40 = vadd.f32 %v7541_v50, %v7540_v54  ;;  %v7543_v19 = vpop.f32.mrb[62].mxu0 }
 0x2e4   : > { %8489 = vmatmul.mubr.bf16.gmra.mrb[16].mxu1 %v10863_v4  ;;  %v7544_v7 = vpop.f32.mrb[63].mxu0 }
 0x2e5   : > { %v8820_v18 = vadd.f32 %v7603_v23, %v11210_v13  ;;  %8492 = vmatprep.mubr.bf16.mxu1 %v10921_v34  ;;  %v11323_v42 = vadd.f32 %v7544_v7, %v7543_v19 }
 0x2e7   : > { %v7604_v2 = vpop.f32.mrb[40].mxu1 }
 0x2e8   : > { %v7605_v16 = vpop.f32.mrb[41].mxu1 }
 0x2e9   : > { %v7606_v25 = vadd.f32 %v7605_v16, %v7604_v2  ;;  %v7607_v57 = vpop.f32.mrb[42].mxu1  ;;  %v7546_v33 = vpop.f32.mrb[64].mxu0 }
 0x2ea   : > { %v7608_v36 = vpop.f32.mrb[43].mxu1  ;;  %v7547_v4 = vpop.f32.mrb[65].mxu0 }
 0x2eb   : > { %v8829_v61 = vadd.f32 %v7606_v25, %v11217_v5  ;;  %v7609_v26 = vadd.f32 %v7608_v36, %v7607_v57  ;;  %v11327_v6 = vadd.f32 %v7547_v4, %v7546_v33  ;;  %v7549_v13 = vpop.f32.mrb[66].mxu0 }
 0x2ec   : > { %8493 = vmatmul.mubr.bf16.gmra.mrb[20].mxu1 %v10944_v12  ;;  %v7550_v54 = vpop.f32.mrb[67].mxu0 }
 0x2ed   : > { %v8835_v34 = vadd.f32 %v7609_v26, %v11222_v11  ;;  %8496 = vmatprep.mubr.bf16.mxu1 %v10999_v45  ;;  %v11331_v23 = vadd.f32 %v7550_v54, %v7549_v13 }
 0x2ef   : > { %v7610_v50 = vpop.f32.mrb[44].mxu1 }
 0x2f0   : > { %v7611_v19 = vpop.f32.mrb[45].mxu1 }
 0x2f1   : > { %v7612_v7 = vadd.f32 %v7611_v19, %v7610_v50  ;;  %v7613_v2 = vpop.f32.mrb[46].mxu1  ;;  %v7728_v5 = vpop.f32.mrb[68].mxu0 }
 0x2f2   : > { %v7614_v16 = vpop.f32.mrb[47].mxu1  ;;  %v7729_v12 = vpop.f32.mrb[69].mxu0 }
 0x2f3   : > { %v8826_v25 = vadd.f32 %v7612_v7, %v11232_v49  ;;  %v7615_v57 = vadd.f32 %v7614_v16, %v7613_v2  ;;  %v7730_v36 = vadd.f32 %v7729_v12, %v7728_v5  ;;  %v7731_v33 = vpop.f32.mrb[70].mxu0  ;;  %v13488_v12 = vmov 0  }
 0x2f4   : > { %8497 = vmatmul.mubr.bf16.gmra.mrb[24].mxu1 %v11019_v28  ;;  %v7732_v45 = vpop.f32.mrb[71].mxu0 }
 0x2f5   : > { %v8832_v11 = vadd.f32 %v7615_v57, %v11236_v21  ;;  %8500 = vmatprep.mubr.bf16.mxu1 %v11045_v32  ;;  %v7733_v26 = vadd.f32 %v7732_v45, %v7731_v33  ;;  %v11337_v4 = vadd.f32 %v8817_v24, %v7730_v36 }
 0x2f7   : > { %v7616_v13 = vpop.f32.mrb[48].mxu1  ;;  %v11339_v50 = vadd.f32 %v8823_v39, %v7733_v26 }
 0x2f8   : > { %v7617_v54 = vpop.f32.mrb[49].mxu1 }
 0x2f9   : > { %v7618_v19 = vadd.f32 %v7617_v54, %v7616_v13  ;;  %v7619_v49 = vpop.f32.mrb[50].mxu1  ;;  %v7734_v2 = vpop.f32.mrb[72].mxu0 }
 0x2fa   : > { %v7620_v7 = vpop.f32.mrb[51].mxu1  ;;  %v7735_v5 = vpop.f32.mrb[73].mxu0 }
 0x2fb   : > { %v8841_v28 = vadd.f32 %v7618_v19, %v11246_v56  ;;  %v7621_v16 = vadd.f32 %v7620_v7, %v7619_v49  ;;  %v7736_v21 = vadd.f32 %v7735_v5, %v7734_v2  ;;  %v7737_v32 = vpop.f32.mrb[74].mxu0 }
 0x2fc   : > { %8501 = vmatmul.mubr.bf16.gmra.mrb[28].mxu1 %v13488_v12  ;;  %v7738_v24 = vpop.f32.mrb[75].mxu0 }
 0x2fd   : > { %v8847_v57 = vadd.f32 %v7621_v16, %v11250_v46  ;;  %v7739_v36 = vadd.f32 %v7738_v24, %v7737_v32  ;;  %v11344_v33 = vadd.f32 %v8814_v1, %v7736_v21 }
 0x2ff   : > { %v7622_v39 = vpop.f32.mrb[52].mxu1  ;;  %v11346_v26 = vadd.f32 %v8820_v18, %v7739_v36 }
 0x300   : > { %v7623_v45 = vpop.f32.mrb[53].mxu1 }
 0x301   : > { %v7624_v13 = vadd.f32 %v7623_v45, %v7622_v39  ;;  %v7625_v54 = vpop.f32.mrb[54].mxu1  ;;  %v7740_v56 = vpop.f32.mrb[76].mxu0 }
 0x302   : > { %v7626_v17 = vpop.f32.mrb[55].mxu1  ;;  %v7741_v7 = vpop.f32.mrb[77].mxu0 }
 0x303   : > { %v8838_v19 = vadd.f32 %v7624_v13, %v11261_v14  ;;  %v7627_v49 = vadd.f32 %v7626_v17, %v7625_v54  ;;  %v7742_v2 = vadd.f32 %v7741_v7, %v7740_v56  ;;  %v7743_v5 = vpop.f32.mrb[78].mxu0 }
 0x304   : > { %v7744_v16 = vpop.f32.mrb[79].mxu0 }
 0x305   : > { %v8844_v46 = vadd.f32 %v7627_v49, %v11265_v38  ;;  %v7745_v32 = vadd.f32 %v7744_v16, %v7743_v5  ;;  %v11350_v1 = vadd.f32 %v8829_v61, %v7742_v2 }
 0x307   : > { %v7628_v21 = vpop.f32.mrb[56].mxu1  ;;  %v11352_v18 = vadd.f32 %v8835_v34, %v7745_v32 }
 0x308   : > { %v7629_v24 = vpop.f32.mrb[57].mxu1 }
 0x309   : > { %v7630_v36 = vadd.f32 %v7629_v24, %v7628_v21  ;;  %v7631_v39 = vpop.f32.mrb[58].mxu1  ;;  %v7746_v12 = vpop.f32.mrb[80].mxu0 }
 0x30a   : > { %v7632_v45 = vpop.f32.mrb[59].mxu1  ;;  %v7747_v13 = vpop.f32.mrb[81].mxu0 }
 0x30b   : > { %v8853_v14 = vadd.f32 %v7630_v36, %v11267_v9  ;;  %v7633_v17 = vadd.f32 %v7632_v45, %v7631_v39  ;;  %v7748_v54 = vadd.f32 %v7747_v13, %v7746_v12  ;;  %v7749_v56 = vpop.f32.mrb[82].mxu0 }
 0x30c   : > { %v7750_v49 = vpop.f32.mrb[83].mxu0 }
 0x30d   : > { %v8859_v38 = vadd.f32 %v7633_v17, %v11271_v47  ;;  %v7751_v7 = vadd.f32 %v7750_v49, %v7749_v56  ;;  %v11356_v61 = vadd.f32 %v8826_v25, %v7748_v54 }
 0x30f   : > { %v7634_v2 = vpop.f32.mrb[60].mxu1  ;;  %v11358_v34 = vadd.f32 %v8832_v11, %v7751_v7 }
 0x310   : > { %v7635_v5 = vpop.f32.mrb[61].mxu1 }
 0x311   : > { %v7636_v16 = vadd.f32 %v7635_v5, %v7634_v2  ;;  %v7637_v32 = vpop.f32.mrb[62].mxu1  ;;  %v7752_v24 = vpop.f32.mrb[84].mxu0 }
 0x312   : > { %v7638_v21 = vpop.f32.mrb[63].mxu1  ;;  %v7753_v39 = vpop.f32.mrb[85].mxu0 }
 0x313   : > { %v8850_v9 = vadd.f32 %v7636_v16, %v11274_v31  ;;  %v7639_v36 = vadd.f32 %v7638_v21, %v7637_v32  ;;  %v7754_v12 = vadd.f32 %v7753_v39, %v7752_v24  ;;  %v7755_v45 = vpop.f32.mrb[86].mxu0 }
 0x314   : > { %v7756_v17 = vpop.f32.mrb[87].mxu0 }
 0x315   : > { %v8856_v47 = vadd.f32 %v7639_v36, %v11277_v10  ;;  %v7757_v13 = vadd.f32 %v7756_v17, %v7755_v45  ;;  %v11362_v25 = vadd.f32 %v8841_v28, %v7754_v12 }
 0x317   : > { %v7640_v54 = vpop.f32.mrb[64].mxu1  ;;  %v11364_v11 = vadd.f32 %v8847_v57, %v7757_v13 }
 0x318   : > { %v7641_v56 = vpop.f32.mrb[65].mxu1 }
 0x319   : > { %v7642_v49 = vadd.f32 %v7641_v56, %v7640_v54  ;;  %v7643_v7 = vpop.f32.mrb[66].mxu1  ;;  %v7758_v5 = vpop.f32.mrb[88].mxu0 }
 0x31a   : > { %v7644_v2 = vpop.f32.mrb[67].mxu1  ;;  %v7759_v32 = vpop.f32.mrb[89].mxu0 }
 0x31b   : > { %v8865_v31 = vadd.f32 %v7642_v49, %v11280_v62  ;;  %v7645_v16 = vadd.f32 %v7644_v2, %v7643_v7  ;;  %v7760_v21 = vadd.f32 %v7759_v32, %v7758_v5  ;;  %v7761_v24 = vpop.f32.mrb[90].mxu0 }
 0x31c   : > { %v7762_v36 = vpop.f32.mrb[91].mxu0 }
 0x31d   : > { %v8871_v10 = vadd.f32 %v7645_v16, %v11283_v37  ;;  %v7763_v39 = vadd.f32 %v7762_v36, %v7761_v24  ;;  %v11368_v28 = vadd.f32 %v8838_v19, %v7760_v21 }
 0x31f   : > { %v7646_v12 = vpop.f32.mrb[68].mxu1  ;;  %v11370_v57 = vadd.f32 %v8844_v46, %v7763_v39 }
 0x320   : > { %v7647_v45 = vpop.f32.mrb[69].mxu1 }
 0x321   : > { %v7648_v17 = vadd.f32 %v7647_v45, %v7646_v12  ;;  %v7649_v13 = vpop.f32.mrb[70].mxu1  ;;  %v7764_v56 = vpop.f32.mrb[92].mxu0 }
 0x322   : > { %v7650_v54 = vpop.f32.mrb[71].mxu1  ;;  %v7765_v7 = vpop.f32.mrb[93].mxu0 }
 0x323   : > { %v8862_v62 = vadd.f32 %v7648_v17, %v11286_v53  ;;  %v7651_v49 = vadd.f32 %v7650_v54, %v7649_v13  ;;  %v7766_v2 = vadd.f32 %v7765_v7, %v7764_v56  ;;  %v7767_v5 = vpop.f32.mrb[94].mxu0 }
 0x324   : > { %v7768_v16 = vpop.f32.mrb[95].mxu0 }
 0x325   : > { %v8868_v37 = vadd.f32 %v7651_v49, %v11289_v27  ;;  %v7769_v32 = vadd.f32 %v7768_v16, %v7767_v5  ;;  %v11374_v19 = vadd.f32 %v8853_v14, %v7766_v2 }
 0x327   : > { %v7652_v21 = vpop.f32.mrb[72].mxu1  ;;  %v11376_v46 = vadd.f32 %v8859_v38, %v7769_v32 }
 0x328   : > { %v7653_v24 = vpop.f32.mrb[73].mxu1 }
 0x329   : > { %v7654_v36 = vadd.f32 %v7653_v24, %v7652_v21  ;;  %v7655_v39 = vpop.f32.mrb[74].mxu1  ;;  %v7770_v45 = vpop.f32.mrb[96].mxu0 }
 0x32a   : > { %v7656_v12 = vpop.f32.mrb[75].mxu1  ;;  %v7771_v13 = vpop.f32.mrb[97].mxu0 }
 0x32b   : > { %v8877_v53 = vadd.f32 %v7654_v36, %v11292_v51  ;;  %v7657_v17 = vadd.f32 %v7656_v12, %v7655_v39  ;;  %v7772_v54 = vadd.f32 %v7771_v13, %v7770_v45  ;;  %v7773_v56 = vpop.f32.mrb[98].mxu0 }
 0x32c   : > { %v7774_v49 = vpop.f32.mrb[99].mxu0 }
 0x32d   : > { %v8883_v27 = vadd.f32 %v7657_v17, %v11295_v59  ;;  %v7775_v7 = vadd.f32 %v7774_v49, %v7773_v56  ;;  %v11380_v14 = vadd.f32 %v8850_v9, %v7772_v54 }
 0x32f   : > { %v7658_v2 = vpop.f32.mrb[76].mxu1  ;;  %v11382_v38 = vadd.f32 %v8856_v47, %v7775_v7 }
 0x330   : > { %v7659_v5 = vpop.f32.mrb[77].mxu1 }
 0x331   : > { %v7660_v16 = vadd.f32 %v7659_v5, %v7658_v2  ;;  %v7661_v32 = vpop.f32.mrb[78].mxu1  ;;  %v7776_v24 = vpop.f32.mrb[100].mxu0 }
 0x332   : > { %v7662_v21 = vpop.f32.mrb[79].mxu1  ;;  %v7777_v39 = vpop.f32.mrb[101].mxu0 }
 0x333   : > { %v8874_v51 = vadd.f32 %v7660_v16, %v11298_v29  ;;  %v7663_v36 = vadd.f32 %v7662_v21, %v7661_v32  ;;  %v7778_v12 = vadd.f32 %v7777_v39, %v7776_v24  ;;  %v7779_v45 = vpop.f32.mrb[102].mxu0 }
 0x334   : > { %v7780_v17 = vpop.f32.mrb[103].mxu0 }
 0x335   : > { %v8880_v59 = vadd.f32 %v7663_v36, %v11301_v60  ;;  %v7781_v13 = vadd.f32 %v7780_v17, %v7779_v45  ;;  %v11386_v9 = vadd.f32 %v8865_v31, %v7778_v12 }
 0x337   : > { %v7664_v54 = vpop.f32.mrb[80].mxu1  ;;  %v11388_v47 = vadd.f32 %v8871_v10, %v7781_v13 }
 0x338   : > { %v7665_v56 = vpop.f32.mrb[81].mxu1 }
 0x339   : > { %v7666_v49 = vadd.f32 %v7665_v56, %v7664_v54  ;;  %v7667_v7 = vpop.f32.mrb[82].mxu1  ;;  %v7782_v5 = vpop.f32.mrb[104].mxu0 }
 0x33a   : > { %v7668_v2 = vpop.f32.mrb[83].mxu1  ;;  %v7783_v32 = vpop.f32.mrb[105].mxu0 }
 0x33b   : > { %v8889_v29 = vadd.f32 %v7666_v49, %v11304_v0  ;;  %v7669_v16 = vadd.f32 %v7668_v2, %v7667_v7  ;;  %v7784_v21 = vadd.f32 %v7783_v32, %v7782_v5  ;;  %v7785_v24 = vpop.f32.mrb[106].mxu0 }
 0x33c   : > { %v7786_v36 = vpop.f32.mrb[107].mxu0 }
 0x33d   : > { %v8895_v60 = vadd.f32 %v7669_v16, %v11307_v20  ;;  %v7787_v39 = vadd.f32 %v7786_v36, %v7785_v24  ;;  %v11392_v31 = vadd.f32 %v8862_v62, %v7784_v21 }
 0x33f   : > { %v7670_v12 = vpop.f32.mrb[84].mxu1  ;;  %v11394_v10 = vadd.f32 %v8868_v37, %v7787_v39 }
 0x340   : > { %v7671_v45 = vpop.f32.mrb[85].mxu1 }
 0x341   : > { %v7672_v17 = vadd.f32 %v7671_v45, %v7670_v12  ;;  %v7673_v13 = vpop.f32.mrb[86].mxu1  ;;  %v7788_v56 = vpop.f32.mrb[108].mxu0 }
 0x342   : > { %v7674_v54 = vpop.f32.mrb[87].mxu1  ;;  %v7789_v7 = vpop.f32.mrb[109].mxu0 }
 0x343   : > { %v8886_v0 = vadd.f32 %v7672_v17, %v11311_v48  ;;  %v7675_v49 = vadd.f32 %v7674_v54, %v7673_v13  ;;  %v7790_v2 = vadd.f32 %v7789_v7, %v7788_v56  ;;  %v7791_v5 = vpop.f32.mrb[110].mxu0 }
 0x344   : > { %v7792_v16 = vpop.f32.mrb[111].mxu0 }
 0x345   : > { %v8892_v20 = vadd.f32 %v7675_v49, %v11315_v63  ;;  %v7793_v32 = vadd.f32 %v7792_v16, %v7791_v5  ;;  %v11398_v62 = vadd.f32 %v8877_v53, %v7790_v2 }
 0x347   : > { %v7676_v21 = vpop.f32.mrb[88].mxu1  ;;  %v11400_v37 = vadd.f32 %v8883_v27, %v7793_v32 }
 0x348   : > { %v7677_v24 = vpop.f32.mrb[89].mxu1 }
 0x349   : > { %v7678_v36 = vadd.f32 %v7677_v24, %v7676_v21  ;;  %v7679_v39 = vpop.f32.mrb[90].mxu1  ;;  %v7794_v45 = vpop.f32.mrb[112].mxu0 }
 0x34a   : > { %v7680_v12 = vpop.f32.mrb[91].mxu1  ;;  %v7795_v13 = vpop.f32.mrb[113].mxu0 }
 0x34b   : > { %v8901_v48 = vadd.f32 %v7678_v36, %v11319_v40  ;;  %v7681_v17 = vadd.f32 %v7680_v12, %v7679_v39  ;;  %v7796_v54 = vadd.f32 %v7795_v13, %v7794_v45  ;;  %v7797_v56 = vpop.f32.mrb[114].mxu0 }
 0x34c   : > { %v7798_v49 = vpop.f32.mrb[115].mxu0 }
 0x34d   : > { %v8907_v63 = vadd.f32 %v7681_v17, %v11323_v42  ;;  %v7799_v7 = vadd.f32 %v7798_v49, %v7797_v56  ;;  %v11404_v53 = vadd.f32 %v8874_v51, %v7796_v54 }
 0x34f   : > { %v7682_v2 = vpop.f32.mrb[92].mxu1  ;;  %v11406_v27 = vadd.f32 %v8880_v59, %v7799_v7 }
 0x350   : > { %v7683_v5 = vpop.f32.mrb[93].mxu1 }
 0x351   : > { %v7684_v16 = vadd.f32 %v7683_v5, %v7682_v2  ;;  %v7685_v32 = vpop.f32.mrb[94].mxu1  ;;  %v7800_v24 = vpop.f32.mrb[116].mxu0 }
 0x352   : > { %v7686_v21 = vpop.f32.mrb[95].mxu1  ;;  %v7801_v39 = vpop.f32.mrb[117].mxu0 }
 0x353   : > { %v8898_v40 = vadd.f32 %v7684_v16, %v11327_v6  ;;  %v7687_v36 = vadd.f32 %v7686_v21, %v7685_v32  ;;  %v7802_v12 = vadd.f32 %v7801_v39, %v7800_v24  ;;  %v7803_v45 = vpop.f32.mrb[118].mxu0 }
 0x354   : > { %v7804_v17 = vpop.f32.mrb[119].mxu0 }
 0x355   : > { %v8904_v42 = vadd.f32 %v7687_v36, %v11331_v23  ;;  %v7805_v13 = vadd.f32 %v7804_v17, %v7803_v45  ;;  %v11410_v51 = vadd.f32 %v8889_v29, %v7802_v12 }
 0x357   : > { %v11412_v54 = vadd.f32 %v8895_v60, %v7805_v13 }
 0x359   : > { %v7806_v59 = vpop.f32.mrb[120].mxu0 }
 0x35a   : > { %v7807_v56 = vpop.f32.mrb[121].mxu0 }
 0x35b   : > { %v7808_v49 = vadd.f32 %v7807_v56, %v7806_v59  ;;  %v7809_v7 = vpop.f32.mrb[122].mxu0 }
 0x35c   : > { %v7810_v2 = vpop.f32.mrb[123].mxu0 }
 0x35d   : > { %v7811_v5 = vadd.f32 %v7810_v2, %v7809_v7  ;;  %v11414_v22 = vadd.f32 %v8886_v0, %v7808_v49  ;;  %v11436_v7 = vld [vmem:[%s395_s14] ss:$0 sm:$0xff] }
 0x35f   : > { %v11416_v6 = vadd.f32 %v8892_v20, %v7811_v5 }
 0x361   : > { %v7812_v16 = vpop.f32.mrb[124].mxu0 }
 0x362   : > { %v7813_v32 = vpop.f32.mrb[125].mxu0 }
 0x363   : > { %v7814_v23 = vadd.f32 %v7813_v32, %v7812_v16  ;;  %v7815_v21 = vpop.f32.mrb[126].mxu0 }
 0x364   : > { %v7816_v24 = vpop.f32.mrb[127].mxu0 }
 0x365   : > { %v7817_v29 = vadd.f32 %v7816_v24, %v7815_v21  ;;  %v11418_v36 = vadd.f32 %v8901_v48, %v7814_v23  ;;  %v11433_v48 = vld [vmem:[%s13186_s6] ss:$0 sm:$0xff] }
 0x367   : > { %v11420_v60 = vadd.f32 %v8907_v63, %v7817_v29 }
 0x369   : > { %v7818_v39 = vpop.f32.mrb[128].mxu0 }
 0x36a   : > { %v7819_v12 = vpop.f32.mrb[129].mxu0 }
 0x36b   : > { %v7820_v45 = vadd.f32 %v7819_v12, %v7818_v39  ;;  %v7821_v17 = vpop.f32.mrb[130].mxu0 }
 0x36c   : > { %v7822_v13 = vpop.f32.mrb[131].mxu0 }
 0x36d   : > { %v7823_v0 = vadd.f32 %v7822_v13, %v7821_v17  ;;  %v11422_v59 = vadd.f32 %v8898_v40, %v7820_v45 }
 0x36f   : > { %v11424_v20 = vadd.f32 %v8904_v42, %v7823_v0 }
 0x397   : > { %v8474_v56 = vpop.f32.mrb[0].mxu1 }
 0x398   : > { %v8816_v63 = vadd.f32 %v11344_v33, %v8474_v56  ;;  %v3594_v49 = vpop.f32.mrb[1].mxu1 }
 0x399   : > { %v8819_v40 = vadd.f32 %v11337_v4, %v3594_v49  ;;  %v8475_v2 = vpop.f32.mrb[2].mxu1 }
 0x39a   : > { %v3762_v42 = vadd.f32 %v8816_v63, %v11433_v48  ;;  %v8822_v5 = vadd.f32 %v11346_v26, %v8475_v2  ;;  %v3597_v16 = vpop.f32.mrb[3].mxu1 }
 0x39b   : > { %v3760_v32 = vadd.f32 %v8819_v40, %v11433_v48  ;;  %v8825_v23 = vadd.f32 %v11339_v50, %v3597_v16 }
 0x39c   : > { %v11444_v21 = vadd.f32 %v11436_v7, %v3762_v42  ;;  %v3763_v33 = vadd.f32 %v8822_v5, %v11433_v48 }
 0x39d   : > { %v11448_v24 = vadd.f32 %v11436_v7, %v3760_v32  ;;  %v3761_v4 = vadd.f32 %v8825_v23, %v11433_v48 }
 0x39e   : > { %v11452_v29 = vadd.f32 %v11436_v7, %v3763_v33  ;;  %v3872_v63 = vmul.f32 %v11444_v21, %v11444_v21 }
 0x39f   : > { %v11455_v26 = vadd.f32 %v11436_v7, %v3761_v4  ;;  %v8478_v39 = vpop.f32.mrb[4].mxu1  ;;  %v3870_v45 = vmul.f32 %v11448_v24, %v11448_v24 }
 0x3a0   : > { %v8828_v12 = vadd.f32 %v11356_v61, %v8478_v39  ;;  %v3610_v50 = vpop.f32.mrb[5].mxu1  ;;  %v3873_v32 = vmul.f32 %v11452_v29, %v11452_v29 }
 0x3a1   : > { %v3833_v17 = vadd.f32 %v11455_v26, %v11448_v24  ;;  %v3871_v13 = vmul.f32 %v11455_v26, %v11455_v26  ;;  %v8831_v0 = vadd.f32 %v11350_v1, %v3610_v50  ;;  %v8479_v56 = vpop.f32.mrb[6].mxu1 }
 0x3a2   : > { %v3766_v49 = vadd.f32 %v8828_v12, %v11433_v48  ;;  %v8834_v61 = vadd.f32 %v11358_v34, %v8479_v56  ;;  %v3613_v40 = vpop.f32.mrb[7].mxu1 }
 0x3a3   : > { %v3834_v2 = vadd.f32 %v3833_v17, %v11444_v21  ;;  %v3902_v42 = vadd.f32 %v3871_v13, %v3870_v45  ;;  %v3764_v5 = vadd.f32 %v8831_v0, %v11433_v48  ;;  %v8837_v16 = vadd.f32 %v11352_v18, %v3613_v40 }
 0x3a4   : > { %v11475_v1 = vadd.f32 %v11436_v7, %v3766_v49  ;;  %v3767_v23 = vadd.f32 %v8834_v61, %v11433_v48 }
 0x3a5   : > { %v3903_v33 = vadd.f32 %v3902_v42, %v3872_v63  ;;  %v11479_v4 = vadd.f32 %v11436_v7, %v3764_v5  ;;  %v3835_v34 = vadd.f32 %v3834_v2, %v11452_v29  ;;  %v3765_v39 = vadd.f32 %v8837_v16, %v11433_v48 }
 0x3a6   : > { %v11484_v12 = vadd.f32 %v11436_v7, %v3767_v23  ;;  %v3876_v42 = vmul.f32 %v11475_v1, %v11475_v1 }
 0x3a7   : > { %v3836_v18 = vadd.f32 %v3835_v34, %v11479_v4  ;;  %v3874_v50 = vmul.f32 %v11479_v4, %v11479_v4  ;;  %v3904_v45 = vadd.f32 %v3903_v33, %v3873_v32  ;;  %v11490_v17 = vadd.f32 %v11436_v7, %v3765_v39  ;;  %v8482_v13 = vpop.f32.mrb[8].mxu1 }
 0x3a8   : > { %v8840_v0 = vadd.f32 %v11368_v28, %v8482_v13  ;;  %v3626_v56 = vpop.f32.mrb[9].mxu1  ;;  %v3877_v39 = vmul.f32 %v11484_v12, %v11484_v12 }
 0x3a9   : > { %v3905_v63 = vadd.f32 %v3904_v45, %v3874_v50  ;;  %v3837_v49 = vadd.f32 %v3836_v18, %v11490_v17  ;;  %v3875_v61 = vmul.f32 %v11490_v17, %v11490_v17  ;;  %v8843_v40 = vadd.f32 %v11362_v25, %v3626_v56  ;;  %v8483_v2 = vpop.f32.mrb[10].mxu1 }
 0x3aa   : > { %v3770_v5 = vadd.f32 %v8840_v0, %v11433_v48  ;;  %v8846_v16 = vadd.f32 %v11370_v57, %v8483_v2  ;;  %v3629_v32 = vpop.f32.mrb[11].mxu1 }
 0x3ab   : > { %v3838_v28 = vadd.f32 %v3837_v49, %v11475_v1  ;;  %v3906_v23 = vadd.f32 %v3905_v63, %v3875_v61  ;;  %v3768_v33 = vadd.f32 %v8843_v40, %v11433_v48  ;;  %v8849_v34 = vadd.f32 %v11364_v11, %v3629_v32 }
 0x3ac   : > { %v11507_v25 = vadd.f32 %v11436_v7, %v3770_v5  ;;  %v3771_v18 = vadd.f32 %v8846_v16, %v11433_v48 }
 0x3ad   : > { %v3907_v50 = vadd.f32 %v3906_v23, %v3876_v42  ;;  %v11511_v45 = vadd.f32 %v11436_v7, %v3768_v33  ;;  %v3839_v57 = vadd.f32 %v3838_v28, %v11484_v12  ;;  %v3769_v13 = vadd.f32 %v8849_v34, %v11433_v48 }
 0x3ae   : > { %v11516_v0 = vadd.f32 %v11436_v7, %v3771_v18  ;;  %v3880_v23 = vmul.f32 %v11507_v25, %v11507_v25 }
 0x3af   : > { %v3840_v11 = vadd.f32 %v3839_v57, %v11511_v45  ;;  %v3878_v56 = vmul.f32 %v11511_v45, %v11511_v45  ;;  %v3908_v63 = vadd.f32 %v3907_v50, %v3877_v39  ;;  %v11522_v49 = vadd.f32 %v11436_v7, %v3769_v13  ;;  %v8486_v61 = vpop.f32.mrb[12].mxu1 }
 0x3b0   : > { %v8852_v40 = vadd.f32 %v11380_v14, %v8486_v61  ;;  %v3642_v2 = vpop.f32.mrb[13].mxu1  ;;  %v3881_v13 = vmul.f32 %v11516_v0, %v11516_v0 }
 0x3b1   : > { %v3909_v42 = vadd.f32 %v3908_v63, %v3878_v56  ;;  %v3841_v5 = vadd.f32 %v3840_v11, %v11522_v49  ;;  %v3879_v16 = vmul.f32 %v11522_v49, %v11522_v49  ;;  %v8855_v32 = vadd.f32 %v11374_v19, %v3642_v2  ;;  %v8487_v28 = vpop.f32.mrb[14].mxu1 }
 0x3b2   : > { %v3774_v33 = vadd.f32 %v8852_v40, %v11433_v48  ;;  %v8858_v34 = vadd.f32 %v11382_v38, %v8487_v28  ;;  %v3645_v39 = vpop.f32.mrb[15].mxu1 }
 0x3b3   : > { %v3842_v14 = vadd.f32 %v3841_v5, %v11507_v25  ;;  %v3910_v18 = vadd.f32 %v3909_v42, %v3879_v16  ;;  %v3772_v50 = vadd.f32 %v8855_v32, %v11433_v48  ;;  %v8861_v57 = vadd.f32 %v11376_v46, %v3645_v39 }
 0x3b4   : > { %v11539_v19 = vadd.f32 %v11436_v7, %v3774_v33  ;;  %v3775_v11 = vadd.f32 %v8858_v34, %v11433_v48 }
 0x3b5   : > { %v3911_v56 = vadd.f32 %v3910_v18, %v3880_v23  ;;  %v11543_v63 = vadd.f32 %v11436_v7, %v3772_v50  ;;  %v3843_v38 = vadd.f32 %v3842_v14, %v11516_v0  ;;  %v3773_v61 = vadd.f32 %v8861_v57, %v11433_v48 }
 0x3b6   : > { %v11548_v40 = vadd.f32 %v11436_v7, %v3775_v11  ;;  %v3884_v18 = vmul.f32 %v11539_v19, %v11539_v19 }
 0x3b7   : > { %v3844_v46 = vadd.f32 %v3843_v38, %v11543_v63  ;;  %v3882_v2 = vmul.f32 %v11543_v63, %v11543_v63  ;;  %v3912_v42 = vadd.f32 %v3911_v56, %v3881_v13  ;;  %v11554_v5 = vadd.f32 %v11436_v7, %v3773_v61  ;;  %v8490_v16 = vpop.f32.mrb[16].mxu1 }
 0x3b8   : > { %v8864_v32 = vadd.f32 %v11392_v31, %v8490_v16  ;;  %v3658_v28 = vpop.f32.mrb[17].mxu1  ;;  %v3885_v61 = vmul.f32 %v11548_v40, %v11548_v40 }
 0x3b9   : > { %v3913_v23 = vadd.f32 %v3912_v42, %v3882_v2  ;;  %v3845_v33 = vadd.f32 %v3844_v46, %v11554_v5  ;;  %v3883_v34 = vmul.f32 %v11554_v5, %v11554_v5  ;;  %v8867_v39 = vadd.f32 %v11386_v9, %v3658_v28  ;;  %v8491_v14 = vpop.f32.mrb[18].mxu1 }
 0x3ba   : > { %v3778_v50 = vadd.f32 %v8864_v32, %v11433_v48  ;;  %v8870_v57 = vadd.f32 %v11394_v10, %v8491_v14  ;;  %v3661_v13 = vpop.f32.mrb[19].mxu1 }
 0x3bb   : > { %v3846_v31 = vadd.f32 %v3845_v33, %v11539_v19  ;;  %v3914_v11 = vadd.f32 %v3913_v23, %v3883_v34  ;;  %v3776_v56 = vadd.f32 %v8867_v39, %v11433_v48  ;;  %v8873_v38 = vadd.f32 %v11388_v47, %v3661_v13 }
 0x3bc   : > { %v11571_v9 = vadd.f32 %v11436_v7, %v3778_v50  ;;  %v3779_v46 = vadd.f32 %v8870_v57, %v11433_v48 }
 0x3bd   : > { %v3915_v2 = vadd.f32 %v3914_v11, %v3884_v18  ;;  %v11575_v42 = vadd.f32 %v11436_v7, %v3776_v56  ;;  %v3847_v10 = vadd.f32 %v3846_v31, %v11548_v40  ;;  %v3777_v16 = vadd.f32 %v8873_v38, %v11433_v48 }
 0x3be   : > { %v11580_v32 = vadd.f32 %v11436_v7, %v3779_v46  ;;  %v3888_v11 = vmul.f32 %v11571_v9, %v11571_v9 }
 0x3bf   : > { %v3848_v47 = vadd.f32 %v3847_v10, %v11575_v42  ;;  %v3886_v28 = vmul.f32 %v11575_v42, %v11575_v42  ;;  %v3916_v23 = vadd.f32 %v3915_v2, %v3885_v61  ;;  %v11586_v33 = vadd.f32 %v11436_v7, %v3777_v16  ;;  %v8494_v34 = vpop.f32.mrb[20].mxu1 }
 0x3c0   : > { %v8876_v39 = vadd.f32 %v11404_v53, %v8494_v34  ;;  %v3674_v14 = vpop.f32.mrb[21].mxu1  ;;  %v3889_v16 = vmul.f32 %v11580_v32, %v11580_v32 }
 0x3c1   : > { %v3917_v18 = vadd.f32 %v3916_v23, %v3886_v28  ;;  %v3849_v50 = vadd.f32 %v3848_v47, %v11586_v33  ;;  %v3887_v57 = vmul.f32 %v11586_v33, %v11586_v33  ;;  %v8879_v13 = vadd.f32 %v11398_v62, %v3674_v14  ;;  %v8495_v31 = vpop.f32.mrb[22].mxu1 }
 0x3c2   : > { %v3782_v56 = vadd.f32 %v8876_v39, %v11433_v48  ;;  %v8882_v38 = vadd.f32 %v11406_v27, %v8495_v31  ;;  %v3677_v61 = vpop.f32.mrb[23].mxu1 }
 0x3c3   : > { %v3850_v53 = vadd.f32 %v3849_v50, %v11571_v9  ;;  %v3918_v46 = vadd.f32 %v3917_v18, %v3887_v57  ;;  %v3780_v2 = vadd.f32 %v8879_v13, %v11433_v48  ;;  %v8885_v10 = vadd.f32 %v11400_v37, %v3677_v61 }
 0x3c4   : > { %v11603_v62 = vadd.f32 %v11436_v7, %v3782_v56  ;;  %v3783_v47 = vadd.f32 %v8882_v38, %v11433_v48 }
 0x3c5   : > { %v3919_v28 = vadd.f32 %v3918_v46, %v3888_v11  ;;  %v11607_v23 = vadd.f32 %v11436_v7, %v3780_v2  ;;  %v3851_v27 = vadd.f32 %v3850_v53, %v11580_v32  ;;  %v3781_v34 = vadd.f32 %v8885_v10, %v11433_v48 }
 0x3c6   : > { %v11612_v39 = vadd.f32 %v11436_v7, %v3783_v47  ;;  %v3892_v46 = vmul.f32 %v11603_v62, %v11603_v62 }
 0x3c7   : > { %v3852_v37 = vadd.f32 %v3851_v27, %v11607_v23  ;;  %v3890_v14 = vmul.f32 %v11607_v23, %v11607_v23  ;;  %v3920_v18 = vadd.f32 %v3919_v28, %v3889_v16  ;;  %v11618_v50 = vadd.f32 %v11436_v7, %v3781_v34  ;;  %v8498_v57 = vpop.f32.mrb[24].mxu1 }
 0x3c8   : > { %v8888_v13 = vadd.f32 %v11414_v22, %v8498_v57  ;;  %v3690_v31 = vpop.f32.mrb[25].mxu1  ;;  %v3893_v57 = vmul.f32 %v11612_v39, %v11612_v39 }
 0x3c9   : > { %v3921_v11 = vadd.f32 %v3920_v18, %v3890_v14  ;;  %v3853_v56 = vadd.f32 %v3852_v37, %v11618_v50  ;;  %v3891_v38 = vmul.f32 %v11618_v50, %v11618_v50  ;;  %v8891_v61 = vadd.f32 %v11410_v51, %v3690_v31  ;;  %v8499_v53 = vpop.f32.mrb[26].mxu1 }
 0x3ca   : > { %v3786_v2 = vadd.f32 %v8888_v13, %v11433_v48  ;;  %v8894_v10 = vadd.f32 %v11416_v6, %v8499_v53  ;;  %v3693_v16 = vpop.f32.mrb[27].mxu1 }
 0x3cb   : > { %v3854_v22 = vadd.f32 %v3853_v56, %v11603_v62  ;;  %v3922_v47 = vadd.f32 %v3921_v11, %v3891_v38  ;;  %v3784_v28 = vadd.f32 %v8891_v61, %v11433_v48  ;;  %v8897_v27 = vadd.f32 %v11412_v54, %v3693_v16 }
 0x3cc   : > { %v11633_v34 = vadd.f32 %v11436_v7, %v3786_v2  ;;  %v3787_v51 = vadd.f32 %v8894_v10, %v11433_v48 }
 0x3cd   : > { %v3923_v37 = vadd.f32 %v3922_v47, %v3892_v46  ;;  %v11637_v14 = vadd.f32 %v11436_v7, %v3784_v28  ;;  %v3855_v18 = vadd.f32 %v3854_v22, %v11612_v39  ;;  %v3785_v6 = vadd.f32 %v8897_v27, %v11433_v48 }
 0x3ce   : > { %v11644_v13 = vadd.f32 %v11436_v7, %v3787_v51 }
 0x3cf   : > { %v3856_v54 = vadd.f32 %v3855_v18, %v11637_v14  ;;  %v11648_v31 = vadd.f32 %v11436_v7, %v3785_v6  ;;  %v8502_v11 = vpop.f32.mrb[28].mxu1  ;;  %v3894_v56 = vmul.f32 %v11637_v14, %v11637_v14  ;;  %v3924_v38 = vadd.f32 %v3923_v37, %v3893_v57 }
 0x3d0   : > { %v8900_v61 = vadd.f32 %v11422_v59, %v8502_v11  ;;  %v3706_v53 = vpop.f32.mrb[29].mxu1 }
 0x3d1   : > { %v3857_v46 = vadd.f32 %v3856_v54, %v11648_v31  ;;  %v8903_v2 = vadd.f32 %v11418_v36, %v3706_v53  ;;  %v8503_v10 = vpop.f32.mrb[30].mxu1  ;;  %v3925_v37 = vadd.f32 %v3924_v38, %v3894_v56  ;;  %v3895_v36 = vmul.f32 %v11648_v31, %v11648_v31 }
 0x3d2   : > { %v3790_v16 = vadd.f32 %v8900_v61, %v11433_v48  ;;  %v8906_v22 = vadd.f32 %v11424_v20, %v8503_v10  ;;  %v3709_v47 = vpop.f32.mrb[31].mxu1  ;;  %v3896_v61 = vmul.f32 %v11633_v34, %v11633_v34 }
 0x3d3   : > { %v3858_v28 = vadd.f32 %v3857_v46, %v11633_v34  ;;  %v3788_v27 = vadd.f32 %v8903_v2, %v11433_v48  ;;  %v8909_v51 = vadd.f32 %v11420_v60, %v3709_v47  ;;  %v3926_v56 = vadd.f32 %v3925_v37, %v3895_v36 }
 0x3d4   : > { %v11661_v59 = vadd.f32 %v11436_v7, %v3790_v16  ;;  %v3791_v18 = vadd.f32 %v8906_v22, %v11433_v48 }
 0x3d5   : > { %v11667_v6 = vadd.f32 %v11436_v7, %v3788_v27  ;;  %v3859_v20 = vadd.f32 %v3858_v28, %v11644_v13  ;;  %v3789_v57 = vadd.f32 %v8909_v51, %v11433_v48  ;;  %v3927_v46 = vadd.f32 %v3926_v56, %v3896_v61 }
 0x3d6   : > { %v11672_v54 = vadd.f32 %v11436_v7, %v3791_v18  ;;  %v3897_v48 = vmul.f32 %v11644_v13, %v11644_v13 }
 0x3d7   : > { %v3860_v60 = vadd.f32 %v3859_v20, %v11667_v6  ;;  %v11676_v11 = vadd.f32 %v11436_v7, %v3789_v57  ;;  %v3898_v16 = vmul.f32 %v11667_v6, %v11667_v6  ;;  %v3900_v20 = vmul.f32 %v11661_v59, %v11661_v59 }
 0x3d8   : > { %v3928_v7 = vadd.f32 %v3927_v46, %v3897_v48  ;;  %v9225_v46 = vld [vmem:[%s13189_s9 + $0x108] sm:$0xff]   ;;  %v9227_v48 = vld [vmem:[%s13189_s9 + $0x110] sm:$0xff]  }
 0x3d9   : > { %v3861_v38 = vadd.f32 %v3860_v60, %v11676_v11  ;;  %v3899_v27 = vmul.f32 %v11676_v11, %v11676_v11  ;;  %v3901_v60 = vmul.f32 %v11672_v54, %v11672_v54 }
 0x3da   : > { %v3929_v28 = vadd.f32 %v3928_v7, %v3898_v16  ;;  %v9230_v16 = vld [vmem:[%s13189_s9 + $0x118] sm:$0xff]  }
 0x3db   : > { %v3862_v53 = vadd.f32 %v3861_v38, %v11661_v59  ;;  %v9221_v7 = vld [vmem:[%s13189_s9 + $0x158] sm:$0xff]  }
 0x3dc   : > { %v3930_v18 = vadd.f32 %v3929_v28, %v3899_v27  ;;  %v9232_v28 = vld [vmem:[%s13189_s9 + $0x120] sm:$0xff]  }
 0x3dd   : > { %v3863_v2 = vadd.f32 %v3862_v53, %v11672_v54  ;;  %v9224_v53 = vld [vmem:[%s13189_s9 + $0xc0] sm:$0xff]  }
 0x3de   : > { %v3931_v57 = vadd.f32 %v3930_v18, %v3900_v20  ;;  %v9234_v27 = vld [vmem:[%s13189_s9 + $0xe0] sm:$0xff]   ;;  %v9236_v18 = vld [vmem:[%s13189_s9 + $0xe8] sm:$0xff]   ;;  %v9233_v20 = vld [vmem:[%s13189_s9 + $0x170] sm:$0xff]  }
 0x3df   : > { %v3864_v10 = vrot.slane %v3863_v2, 4 }
 0x3e0   : > { %v3932_v56 = vadd.f32 %v3931_v57, %v3901_v60  ;;  %v9239_v57 = vld [vmem:[%s13189_s9 + $0xf0] sm:$0xff]   ;;  %v9238_v60 = vld [vmem:[%s13189_s9 + $0x178] sm:$0xff]  }
 0x3e1   : > { %v3865_v22 = vadd.f32 %v3864_v10, %v3863_v2  ;;  %v9226_v2 = vld [vmem:[%s13189_s9 + $0xc8] sm:$0xff]   ;;  %v9229_v10 = vld [vmem:[%s13189_s9 + $0xd0] sm:$0xff]  }
 0x3e2   : > { %v3933_v38 = vrot.slane %v3932_v56, 4 }
 0x3e3   : > { %v3866_v47 = vrot.slane %v3865_v22, 2 }
 0x3e5   : > { %v3867_v51 = vadd.f32 %v3866_v47, %v3865_v22  ;;  %v9231_v22 = vld [vmem:[%s13189_s9 + $0xd8] sm:$0xff]   ;;  %v9223_v47 = vld [vmem:[%s13189_s9 + $0x160] sm:$0xff]  }
 0x3e7   : > { %v3868_v37 = vrot.slane %v3867_v51, 1 }
 0x3e9   : > { %v3869_v36 = vadd.f32 %v3868_v37, %v3867_v51  ;;  %v9235_v51 = vld [vmem:[%s13189_s9 + $0x128] sm:$0xff]  }
 0x3ea   : > { %v9228_v37 = vld [vmem:[%s13189_s9 + $0x168] sm:$0xff]  }
 0x3eb   : > { %8537 = vmatmul.mubr.f32.vlgmr.msra.gmra.mrb[132].mxu0 %v3869_v36  ;;  %v9237_v36 = vld [vmem:[%s13189_s9 + $0x130] sm:$0xff]  }
 0x3ec   : > { %8792 = vmatpush3.bf16.msra.mxu0 %v13476_v8  ;;  %8571 = vmatprep.mubr.msk.f32.mxu0 %vm9561_vm0, %v13457_v58  ;;  %v3934_v58 = vadd.f32 %v3933_v38, %v3932_v56 }
 0x3ed   : > { %8793 = vmatprep.subr.bf16.mxu0 %v13437_v52 }
 0x3ee   : > { %v3935_v8 = vrot.slane %v3934_v58, 2 }
 0x3f0   : > { %8795 = vmatpush3.bf16.msra.mxu0 %v13477_v3  ;;  %v3936_v3 = vadd.f32 %v3935_v8, %v3934_v58 }
 0x3f1   : > { %8796 = vmatprep.subr.bf16.mxu0 %v13437_v52 }
 0x3f4   : > { %8798 = vmatpush3.bf16.msra.mxu0 %v13478_v41  ;;  %v3937_v41 = vrot.slane %v3936_v3, 1 }
 0x3f5   : > { %8799 = vmatprep.subr.bf16.mxu0 %v13437_v52 }
 0x3f8   : > { %8801 = vmatpush3.bf16.msra.mxu0 %v13479_v43  ;;  %v3938_v43 = vadd.f32 %v3937_v41, %v3936_v3 }
 0x3f9   : > { %8802 = vmatprep.subr.bf16.mxu0 %v13437_v52 }
 0x3fc   : > { %8804 = vmatpush3.bf16.msra.mxu0 %v13480_v44  ;;  %v9218_v44 = vld [vmem:[%s13189_s9 + $0x140] sm:$0xff]  }
 0x3fd   : > { %8805 = vmatprep.subr.bf16.mxu0 %v13437_v52  ;;  %8574 = vmatprep.subr.bf16.mxu1 %v9218_v44 }
 0x3fe   : > { %8575 = vmatpush3.bf16.msra.mxu1 %v9218_v44 }
 0x400   : > { %8807 = vmatpush3.bf16.msra.mxu0 %v13481_v30  ;;  %v9219_v30 = vld [vmem:[%s13189_s9 + $0x148] sm:$0xff]  }
 0x401   : > { %8808 = vmatprep.subr.bf16.mxu0 %v13437_v52  ;;  %8576 = vmatprep.subr.bf16.mxu1 %v9219_v30 }
 0x402   : > { %8577 = vmatpush3.bf16.msra.mxu1 %v9219_v30  ;;  %v13489_v30 = vld [vmem:[#allocation44_spill] sm:$0xff] }
 0x404   : > { %8810 = vmatpush3.bf16.msra.mxu0 %v13482_v35 }
 0x405   : > { %8811 = vmatprep.subr.bf16.mxu0 %v13437_v52  ;;  %v9220_v52 = vld [vmem:[%s13189_s9 + $0x150] sm:$0xff]  }
 0x406   : > { %8578 = vmatprep.subr.bf16.mxu1 %v9220_v52 }
 0x407   : > { %8579 = vmatpush3.bf16.msra.mxu1 %v9220_v52 }
 0x408   : > { %8813 = vmatpush3.bf16.msra.mxu0 %v13483_v15  ;;  %v9222_v15 = vld [vmem:[%s13189_s9 + $0x100] sm:$0xff]   ;;  %8580 = vmatprep.subr.bf16.mxu1 %v9221_v7 }
 0x409   : > { %7882 = vmatprep.subr.bf16.mxu0 %v9222_v15  ;;  %v9240_v15 = vld [vmem:[%s13189_s9 + $0x138] sm:$0xff]  }
 0x40b   : > { %8572 = vmatmul.mubr.f32.vlgmr.msra.gmra.mrb[134].mxu0 %v3938_v43  ;;  %8581 = vmatpush3.bf16.msra.mxu1 %v9221_v7 }
 0x40c   : > { %7883 = vmatpush3.bf16.msra.mxu0 %v9224_v53  ;;  %8582 = vmatprep.subr.bf16.mxu1 %v9223_v47 }
 0x40d   : > { %7884 = vmatprep.subr.bf16.mxu0 %v9225_v46 }
 0x40f   : > { %8583 = vmatpush3.bf16.msra.mxu1 %v9223_v47 }
 0x410   : > { %7885 = vmatpush3.bf16.msra.mxu0 %v9226_v2  ;;  %8584 = vmatprep.subr.bf16.mxu1 %v9228_v37 }
 0x411   : > { %7886 = vmatprep.subr.bf16.mxu0 %v9227_v48 }
 0x413   : > { %8585 = vmatpush3.bf16.msra.mxu1 %v9228_v37 }
 0x414   : > { %7887 = vmatpush3.bf16.msra.mxu0 %v9229_v10  ;;  %8586 = vmatprep.subr.bf16.mxu1 %v9233_v20 }
 0x415   : > { %7888 = vmatprep.subr.bf16.mxu0 %v9230_v16 }
 0x417   : > { %8587 = vmatpush3.bf16.msra.mxu1 %v9233_v20 }
 0x418   : > { %7889 = vmatpush3.bf16.msra.mxu0 %v9231_v22  ;;  %8588 = vmatprep.subr.bf16.mxu1 %v9238_v60 }
 0x419   : > { %7890 = vmatprep.subr.bf16.mxu0 %v9232_v28 }
 0x41b   : > { %8589 = vmatpush3.bf16.msra.mxu1 %v9238_v60 }
 0x41c   : > { %7891 = vmatpush3.bf16.msra.mxu0 %v9234_v27 }
 0x41d   : > { %7892 = vmatprep.subr.bf16.mxu0 %v9235_v51 }
 0x420   : > { %7893 = vmatpush3.bf16.msra.mxu0 %v9236_v18 }
 0x421   : > { %7894 = vmatprep.subr.bf16.mxu0 %v9237_v36 }
 0x424   : > { %7895 = vmatpush3.bf16.msra.mxu0 %v9239_v57 }
 0x425   : > { %7896 = vmatprep.subr.bf16.mxu0 %v9240_v15 }
 0x4be   : > { %v4005_v35 = vpop.f32.mrb[132].mxu0 }
 0x4bf   : > { %v8538_v61 = vpop.f32.mrb[133].mxu0  ;;  %v4079_v56 = vmul.f32 0.0009765625, %v4005_v35  ;;  %v9241_v35 = vld [vmem:[%s13189_s9 + $0xf8] sm:$0xff]  }
 0x4c0   : > { %7897 = vmatpush3.bf16.msra.mxu0 %v9241_v35 }
 0x4c1   : > { %v4081_v58 = vmul.f32 %v4079_v56, %v4079_v56  ;;  %v11777_v52 = vrot.slane %v4079_v56, %v13489_v30 }
 0x4c3   : > { %v4088_v61 = vsub.f32 %v11448_v24, %v11777_v52  ;;  %v4089_v53 = vsub.f32 %v11455_v26, %v11777_v52  ;;  %v4090_v46 = vsub.f32 %v11444_v21, %v11777_v52  ;;  %v4091_v2 = vsub.f32 %v11452_v29, %v11777_v52 }
 0x4c4   : > { %v4092_v48 = vsub.f32 %v11479_v4, %v11777_v52  ;;  %v4093_v10 = vsub.f32 %v11490_v17, %v11777_v52  ;;  %v4094_v24 = vsub.f32 %v11475_v1, %v11777_v52  ;;  %v4095_v16 = vsub.f32 %v11484_v12, %v11777_v52 }
 0x4c5   : > { %v4096_v26 = vsub.f32 %v11511_v45, %v11777_v52  ;;  %v4097_v21 = vsub.f32 %v11522_v49, %v11777_v52  ;;  %v4098_v29 = vsub.f32 %v11507_v25, %v11777_v52  ;;  %v4099_v4 = vsub.f32 %v11516_v0, %v11777_v52  ;;  %v9242_v25 = vld [vmem:[%s13189_s9 + $0x40] sm:$0xff]  }
 0x4c6   : > { %v4100_v17 = vsub.f32 %v11543_v63, %v11777_v52  ;;  %v4101_v1 = vsub.f32 %v11554_v5, %v11777_v52  ;;  %v4102_v12 = vsub.f32 %v11539_v19, %v11777_v52  ;;  %v4103_v45 = vsub.f32 %v11548_v40, %v11777_v52  ;;  %8018 = vmatprep.subr.bf16.mxu1 %v9242_v25 }
 0x4c7   : > { %v4104_v49 = vsub.f32 %v11575_v42, %v11777_v52  ;;  %v4105_v0 = vsub.f32 %v11586_v33, %v11777_v52  ;;  %v4106_v63 = vsub.f32 %v11571_v9, %v11777_v52  ;;  %v4107_v5 = vsub.f32 %v11580_v32, %v11777_v52 }
 0x4c8   : > { %v4108_v19 = vsub.f32 %v11607_v23, %v11777_v52  ;;  %v4109_v42 = vsub.f32 %v11618_v50, %v11777_v52  ;;  %v4110_v7 = vsub.f32 %v11603_v62, %v11777_v52  ;;  %v4111_v22 = vsub.f32 %v11612_v39, %v11777_v52 }
 0x4c9   : > { %v4112_v33 = vsub.f32 %v11637_v14, %v11777_v52  ;;  %v4113_v9 = vsub.f32 %v11648_v31, %v11777_v52  ;;  %v4114_v32 = vsub.f32 %v11633_v34, %v11777_v52  ;;  %v4115_v23 = vsub.f32 %v11644_v13, %v11777_v52 }
 0x4ca   : > { %v4116_v62 = vsub.f32 %v11667_v6, %v11777_v52  ;;  %v4117_v39 = vsub.f32 %v11676_v11, %v11777_v52  ;;  %v4118_v14 = vsub.f32 %v11661_v59, %v11777_v52  ;;  %v4119_v31 = vsub.f32 %v11672_v54, %v11777_v52 }
 0x4de   : > { %v4075_v38 = vpop.f32.mrb[134].mxu0 }
 0x4df   : > { %v4080_v8 = vmul.f32 0.0009765625, %v4075_v38  ;;  %v8573_v3 = vpop.f32.mrb[135].mxu0 }
 0x4e1   : > { %v4082_v41 = vsub.f32 %v4080_v8, %v4081_v58 }
 0x4e3   : > { %v4083_v43 = vmax.f32 %v4082_v41, 0.0 }
 0x4e5   : > { %v4120_v44 = vadd.f32 1e-06, %v4083_v43 }
 0x4e7   : > { %9420 = vrsqrt.f32 %v4120_v44 }
 0x4f1   : > { %v9421_v40 = vpop.eup %9420 }
 0x4f2   : > { %v4125_v50 = vrot.slane %v9421_v40, %v13489_v30 }
 0x4f4   : > { %v11853_v47 = vmul.f32 %v4125_v50, %v4088_v61  ;;  %v11855_v34 = vmul.f32 %v4125_v50, %v4089_v53  ;;  %v4128_v28 = vmul.f32 %v4125_v50, %v4090_v46  ;;  %v11857_v13 = vmul.f32 %v4125_v50, %v4091_v2 }
 0x4f5   : > { %v4130_v27 = vmul.f32 %v4125_v50, %v4092_v48  ;;  %v4131_v51 = vmul.f32 %v4125_v50, %v4093_v10  ;;  %v4132_v37 = vmul.f32 %v4125_v50, %v4094_v24  ;;  %v4133_v6 = vmul.f32 %v4125_v50, %v4095_v16  ;;  %v11862_v48 = vld [vmem:[%s13187_s7] ss:$0 sm:$0xff] }
 0x4f6   : > { %v4134_v18 = vmul.f32 %v4125_v50, %v4096_v26  ;;  %v4135_v36 = vmul.f32 %v4125_v50, %v4097_v21  ;;  %v4136_v11 = vmul.f32 %v4125_v50, %v4098_v29  ;;  %v4137_v20 = vmul.f32 %v4125_v50, %v4099_v4  ;;  %v11868_v24 = vld [vmem:[%s13188_s8] ss:$0 sm:$0xff] }
 0x4f7   : > { %v4138_v57 = vmul.f32 %v4125_v50, %v4100_v17  ;;  %v4139_v59 = vmul.f32 %v4125_v50, %v4101_v1  ;;  %v4140_v60 = vmul.f32 %v4125_v50, %v4102_v12  ;;  %v4141_v56 = vmul.f32 %v4125_v50, %v4103_v45 }
 0x4f8   : > { %v4142_v54 = vmul.f32 %v4125_v50, %v4104_v49  ;;  %v4143_v38 = vmul.f32 %v4125_v50, %v4105_v0  ;;  %v4144_v58 = vmul.f32 %v4125_v50, %v4106_v63  ;;  %v4145_v8 = vmul.f32 %v4125_v50, %v4107_v5 }
 0x4f9   : > { %v4146_v3 = vmul.f32 %v4125_v50, %v4108_v19  ;;  %v4147_v41 = vmul.f32 %v4125_v50, %v4109_v42  ;;  %v4148_v43 = vmul.f32 %v4125_v50, %v4110_v7  ;;  %v4149_v44 = vmul.f32 %v4125_v50, %v4111_v22 }
 0x4fa   : > { %v4150_v30 = vmul.f32 %v4125_v50, %v4112_v33  ;;  %v4151_v52 = vmul.f32 %v4125_v50, %v4113_v9  ;;  %v4152_v15 = vmul.f32 %v4125_v50, %v4114_v32  ;;  %v4153_v35 = vmul.f32 %v4125_v50, %v4115_v23 }
 0x4fb   : > { %v4154_v61 = vmul.f32 %v4125_v50, %v4116_v62  ;;  %v4155_v53 = vmul.f32 %v4125_v50, %v4117_v39  ;;  %v4156_v46 = vmul.f32 %v4125_v50, %v4118_v14  ;;  %v4157_v2 = vmul.f32 %v4125_v50, %v4119_v31 }
 0x4fc   : > { %v4166_v10 = vmul.f32 %v11862_v48, %v4128_v28  ;;  %v4168_v16 = vmul.f32 %v11862_v48, %v4130_v27  ;;  %v4169_v26 = vmul.f32 %v11862_v48, %v4131_v51  ;;  %v4170_v21 = vmul.f32 %v11862_v48, %v4132_v37 }
 0x4fd   : > { %v4171_v29 = vmul.f32 %v11862_v48, %v4133_v6  ;;  %v4172_v4 = vmul.f32 %v11862_v48, %v4134_v18  ;;  %v4173_v17 = vmul.f32 %v11862_v48, %v4135_v36  ;;  %v4174_v1 = vmul.f32 %v11862_v48, %v4136_v11 }
 0x4fe   : > { %v4175_v12 = vmul.f32 %v11862_v48, %v4137_v20  ;;  %v4176_v45 = vmul.f32 %v11862_v48, %v4138_v57  ;;  %v4177_v49 = vmul.f32 %v11862_v48, %v4139_v59  ;;  %v4178_v25 = vmul.f32 %v11862_v48, %v4140_v60 }
 0x4ff   : > { %v4179_v0 = vmul.f32 %v11862_v48, %v4141_v56  ;;  %v4180_v63 = vmul.f32 %v11862_v48, %v4142_v54  ;;  %v4181_v5 = vmul.f32 %v11862_v48, %v4143_v38  ;;  %v4182_v19 = vmul.f32 %v11862_v48, %v4144_v58 }
 0x500   : > { %v11886_v40 = vadd.f32 %v11868_v24, %v4166_v10  ;;  %v4183_v42 = vmul.f32 %v11862_v48, %v4145_v8  ;;  %v11890_v7 = vadd.f32 %v11868_v24, %v4168_v16  ;;  %v11893_v22 = vadd.f32 %v11868_v24, %v4169_v26 }
 0x501   : > { %v11896_v33 = vadd.f32 %v11868_v24, %v4170_v21  ;;  %v4184_v9 = vmul.f32 %v11862_v48, %v4146_v3  ;;  %v4185_v32 = vmul.f32 %v11862_v48, %v4147_v41  ;;  %v4186_v23 = vmul.f32 %v11862_v48, %v4148_v43 }
 0x502   : > { %v11902_v50 = vadd.f32 %v11868_v24, %v4171_v29  ;;  %v4187_v62 = vmul.f32 %v11862_v48, %v4149_v44  ;;  %v11906_v39 = vmul.f32 %v11862_v48, %v4150_v30  ;;  %v11909_v14 = vmul.f32 %v11862_v48, %v4151_v52 }
 0x503   : > { %v11912_v31 = vadd.f32 %v11868_v24, %v4172_v4  ;;  %v11915_v28 = vmul.f32 %v11862_v48, %v4152_v15  ;;  %v11918_v27 = vadd.f32 %v11868_v24, %v4173_v17  ;;  %v11921_v51 = vadd.f32 %v11868_v24, %v4174_v1 }
 0x504   : > { %v4236_v37 = vsub.f32 0.0, %v11886_v40  ;;  %v11925_v6 = vmul.f32 %v11862_v48, %v4153_v35  ;;  %v4238_v18 = vsub.f32 0.0, %v11890_v7  ;;  %v4239_v36 = vsub.f32 0.0, %v11893_v22 }
 0x505   : > { %v4240_v11 = vsub.f32 0.0, %v11896_v33  ;;  %v11931_v20 = vmul.f32 %v11862_v48, %v4154_v61  ;;  %v11934_v57 = vmul.f32 %v11862_v48, %v4155_v53  ;;  %v11937_v59 = vadd.f32 %v11868_v24, %v4175_v12 }
 0x506   : > { %v4241_v60 = vsub.f32 0.0, %v11902_v50  ;;  %v11941_v56 = vmul.f32 %v11862_v48, %v4156_v46  ;;  %v11944_v54 = vmul.f32 %v11862_v48, %v4157_v2  ;;  %v11947_v38 = vadd.f32 %v11868_v24, %v4176_v45 }
 0x507   : > { %v4242_v58 = vsub.f32 0.0, %v11912_v31  ;;  %v11951_v8 = vadd.f32 %v11868_v24, %v4177_v49  ;;  %v4243_v3 = vsub.f32 0.0, %v11918_v27  ;;  %v4244_v41 = vsub.f32 0.0, %v11921_v51 }
 0x508   : > { %v4270_v43 = vmul.f32 1.442695, %v4236_v37  ;;  %v11956_v44 = vadd.f32 %v11868_v24, %v4178_v25  ;;  %v4274_v30 = vmul.f32 1.442695, %v4238_v18  ;;  %v4276_v52 = vmul.f32 1.442695, %v4239_v36 }
 0x509   : > { %v4278_v15 = vmul.f32 1.442695, %v4240_v11  ;;  %v11959_v35 = vadd.f32 %v11868_v24, %v4179_v0  ;;  %v4245_v61 = vsub.f32 0.0, %v11937_v59  ;;  %v4280_v53 = vmul.f32 1.442695, %v4241_v60 }
 0x50a   : > { %9422 = vpow2.f32 %v4270_v43  ;;  %v11963_v46 = vadd.f32 %v11868_v24, %v4180_v63  ;;  %v4246_v2 = vsub.f32 0.0, %v11947_v38  ;;  %v4282_v10 = vmul.f32 1.442695, %v4242_v58 }
 0x50b   : > { %9424 = vpow2.f32 %v4274_v30  ;;  %v11967_v16 = vadd.f32 %v11868_v24, %v4181_v5  ;;  %v4247_v26 = vsub.f32 0.0, %v11951_v8  ;;  %v4284_v21 = vmul.f32 1.442695, %v4243_v3 }
 0x50c   : > { %9426 = vpow2.f32 %v4276_v52  ;;  %v11971_v29 = vadd.f32 %v11868_v24, %v4182_v19  ;;  %v4248_v4 = vsub.f32 0.0, %v11956_v44  ;;  %v4286_v17 = vmul.f32 1.442695, %v4244_v41 }
 0x50d   : > { %9428 = vpow2.f32 %v4278_v15  ;;  %v11975_v1 = vadd.f32 %v11868_v24, %v4183_v42  ;;  %v4249_v12 = vsub.f32 0.0, %v11959_v35  ;;  %v4288_v45 = vmul.f32 1.442695, %v4245_v61 }
 0x50e   : > { %9430 = vpow2.f32 %v4280_v53  ;;  %v11979_v49 = vadd.f32 %v11868_v24, %v4184_v9  ;;  %v4250_v25 = vsub.f32 0.0, %v11963_v46  ;;  %v4290_v0 = vmul.f32 1.442695, %v4246_v2 }
 0x50f   : > { %9432 = vpow2.f32 %v4282_v10  ;;  %v11983_v63 = vadd.f32 %v11868_v24, %v4185_v32  ;;  %v4251_v5 = vsub.f32 0.0, %v11967_v16  ;;  %v4292_v19 = vmul.f32 1.442695, %v4247_v26 }
 0x510   : > { %9434 = vpow2.f32 %v4284_v21  ;;  %v11987_v42 = vadd.f32 %v11868_v24, %v4186_v23  ;;  %v4252_v37 = vsub.f32 0.0, %v11971_v29  ;;  %v4294_v18 = vmul.f32 1.442695, %v4248_v4 }
 0x511   : > { %9436 = vpow2.f32 %v4286_v17  ;;  %v11991_v9 = vadd.f32 %v11868_v24, %v4187_v62  ;;  %v4253_v36 = vsub.f32 0.0, %v11975_v1  ;;  %v4296_v11 = vmul.f32 1.442695, %v4249_v12 }
 0x512   : > { %9438 = vpow2.f32 %v4288_v45  ;;  %v11996_v32 = vadd.f32 %v11868_v24, %v11906_v39  ;;  %v4254_v60 = vsub.f32 0.0, %v11979_v49  ;;  %v4298_v58 = vmul.f32 1.442695, %v4250_v25 }
 0x513   : > { %9440 = vpow2.f32 %v4290_v0  ;;  %v12003_v3 = vadd.f32 %v11868_v24, %v11909_v14  ;;  %v4255_v62 = vsub.f32 0.0, %v11983_v63  ;;  %v4300_v41 = vmul.f32 1.442695, %v4251_v5 }
 0x514   : > { %v11999_v23 = vpop.eup %9422  ;;  %9442 = vpow2.f32 %v4292_v19  ;;  %v12010_v39 = vadd.f32 %v11868_v24, %v11915_v28  ;;  %v4256_v30 = vsub.f32 0.0, %v11987_v42  ;;  %v4302_v52 = vmul.f32 1.442695, %v4252_v37 }
 0x515   : > { %v12006_v43 = vpop.eup %9424  ;;  %9444 = vpow2.f32 %v4294_v18  ;;  %v12017_v14 = vadd.f32 %v11868_v24, %v11925_v6  ;;  %v4257_v61 = vsub.f32 0.0, %v11991_v9  ;;  %v4304_v53 = vmul.f32 1.442695, %v4253_v36 }
 0x516   : > { %v12013_v15 = vpop.eup %9426  ;;  %9446 = vpow2.f32 %v4296_v11  ;;  %v12024_v28 = vadd.f32 %v11868_v24, %v11931_v20  ;;  %v4258_v10 = vsub.f32 0.0, %v11996_v32  ;;  %v4306_v26 = vmul.f32 1.442695, %v4254_v60 }
 0x517   : > { %v12020_v2 = vpop.eup %9428  ;;  %9448 = vpow2.f32 %v4298_v58  ;;  %v12031_v6 = vadd.f32 %v11868_v24, %v11934_v57  ;;  %v4259_v4 = vsub.f32 0.0, %v12003_v3  ;;  %v4308_v17 = vmul.f32 1.442695, %v4255_v62 }
 0x518   : > { %13490 = vst [vmem:[#allocation3_spill] sm:$0xff] %v12024_v28  ;;  %v12027_v21 = vpop.eup %9430  ;;  %9450 = vpow2.f32 %v4300_v41  ;;  %v12036_v45 = vadd.f32 %v11868_v24, %v11941_v56  ;;  %v4260_v20 = vsub.f32 0.0, %v12010_v39  ;;  %v4310_v25 = vmul.f32 1.442695, %v4256_v30 }
 0x519   : > { %13491 = vst [vmem:[#allocation4_spill] sm:$0xff] %v12031_v6  ;;  %v9433_v12 = vpop.eup %9432  ;;  %9452 = vpow2.f32 %v4302_v52  ;;  %v12041_v5 = vadd.f32 %v11868_v24, %v11944_v54  ;;  %v4261_v57 = vsub.f32 0.0, %v12017_v14  ;;  %v4312_v19 = vmul.f32 1.442695, %v4257_v61 }
 0x51a   : > { %13492 = vst [vmem:[#allocation5_spill] sm:$0xff] %v12036_v45  ;;  %v9435_v0 = vpop.eup %9434  ;;  %9454 = vpow2.f32 %v4304_v53  ;;  %v4262_v18 = vsub.f32 0.0, %v12024_v28  ;;  %v4314_v36 = vmul.f32 1.442695, %v4258_v10  ;;  %v4263_v11 = vsub.f32 0.0, %v12031_v6 }
 0x51b   : > { %13493 = vst [vmem:[#allocation6_spill] sm:$0xff] %v12041_v5  ;;  %v9437_v37 = vpop.eup %9436  ;;  %9456 = vpow2.f32 %v4306_v26  ;;  %v4316_v60 = vmul.f32 1.442695, %v4259_v4  ;;  %v4264_v62 = vsub.f32 0.0, %v12036_v45  ;;  %v4318_v41 = vmul.f32 1.442695, %v4260_v20 }
 0x51c   : > { %v9439_v56 = vpop.eup %9438  ;;  %9458 = vpow2.f32 %v4308_v17  ;;  %v4265_v30 = vsub.f32 0.0, %v12041_v5  ;;  %v4320_v52 = vmul.f32 1.442695, %v4261_v57  ;;  %v4322_v53 = vmul.f32 1.442695, %v4262_v18  ;;  %v9258_v26 = vld [vmem:[%s13189_s9 + $0x1c0] sm:$0xff]  }
 0x51d   : > { %v9441_v58 = vpop.eup %9440  ;;  %9460 = vpow2.f32 %v4310_v25  ;;  %v4164_v10 = vmul.f32 %v11862_v48, %v11853_v47  ;;  %v4324_v17 = vmul.f32 1.442695, %v4263_v11  ;;  %v4165_v20 = vmul.f32 %v11862_v48, %v11855_v34  ;;  %8154 = vmatprep.subr.bf16.mxu0 %v9258_v26 }
 0x51e   : > { %v9443_v54 = vpop.eup %9442  ;;  %9462 = vpow2.f32 %v4312_v19  ;;  %v4167_v25 = vmul.f32 %v11862_v48, %v11857_v13  ;;  %v4326_v19 = vmul.f32 1.442695, %v4264_v62  ;;  %v4332_v5 = vadd.f32 1.0, %v11999_v23 }
 0x51f   : > { %v9445_v61 = vpop.eup %9444  ;;  %9464 = vpow2.f32 %v4314_v36  ;;  %v4328_v36 = vmul.f32 1.442695, %v4265_v30  ;;  %v12059_v11 = vadd.f32 %v11868_v24, %v4164_v10  ;;  %v4334_v34 = vadd.f32 1.0, %v12006_v43 }
 0x520   : > { %v9447_v4 = vpop.eup %9446  ;;  %9466 = vpow2.f32 %v4316_v60  ;;  %v12063_v13 = vadd.f32 %v11868_v24, %v4165_v20  ;;  %v12066_v48 = vadd.f32 %v11868_v24, %v4167_v25  ;;  %v4336_v23 = vadd.f32 1.0, %v12020_v2 }
 0x521   : > { %v9449_v57 = vpop.eup %9448  ;;  %9468 = vpow2.f32 %v4318_v41  ;;  %13494 = vst [vmem:[#allocation10_spill] sm:$0xff] %v12059_v11  ;;  %v4335_v41 = vadd.f32 1.0, %v12013_v15  ;;  %v4234_v43 = vsub.f32 0.0, %v12059_v11  ;;  %v4338_v26 = vadd.f32 1.0, %v9433_v12 }
 0x522   : > { %v9451_v18 = vpop.eup %9450  ;;  %9470 = vpow2.f32 %v4320_v52  ;;  %13495 = vst [vmem:[#allocation13_spill] sm:$0xff] %v12063_v13  ;;  %13496 = vst [vmem:[#allocation16_spill] sm:$0xff] %v12066_v48  ;;  %v4235_v24 = vsub.f32 0.0, %v12063_v13  ;;  %v4339_v25 = vadd.f32 1.0, %v9435_v0  ;;  %v4342_v55 = vadd.f32 1.0, %v9441_v58 }
 0x523   : > { %v9453_v47 = vpop.eup %9452  ;;  %9472 = vpow2.f32 %v4322_v53  ;;  %v4337_v53 = vadd.f32 1.0, %v12027_v21  ;;  %v12074_v21 = vmul.f32 1.442695, %v4234_v43  ;;  %v4344_v11 = vadd.f32 1.0, %v9445_v61 }
 0x524   : > { %v9455_v60 = vpop.eup %9454  ;;  %9474 = vpow2.f32 %v4324_v17  ;;  %v4237_v17 = vsub.f32 0.0, %v12066_v48  ;;  %v12076_v12 = vmul.f32 1.442695, %v4235_v24  ;;  %v4343_v48 = vadd.f32 1.0, %v9443_v54 }
 0x525   : > { %v9457_v62 = vpop.eup %9456  ;;  %9476 = vpow2.f32 %v4326_v19  ;;  %v4340_v19 = vadd.f32 1.0, %v9437_v37  ;;  %v4345_v0 = vadd.f32 1.0, %v9447_v4  ;;  %v4346_v37 = vadd.f32 1.0, %v9449_v57 }
 0x526   : > { %v9459_v30 = vpop.eup %9458  ;;  %9478 = vpow2.f32 %v4328_v36  ;;  %v4341_v36 = vadd.f32 1.0, %v9439_v56  ;;  %v4348_v45 = vadd.f32 1.0, %v9453_v47  ;;  %v4350_v43 = vadd.f32 1.0, %v9457_v62 }
 0x527   : > { %v9461_v52 = vpop.eup %9460  ;;  %9480 = vrcp.f32 %v4332_v5  ;;  %v4351_v6 = vadd.f32 1.0, %v9459_v30 }
 0x528   : > { %v9463_v10 = vpop.eup %9462  ;;  %9482 = vrcp.f32 %v4334_v34  ;;  %v12078_v34 = vmul.f32 1.442695, %v4237_v17 }
 0x529   : > { %v9465_v20 = vpop.eup %9464  ;;  %9484 = vrcp.f32 %v4335_v41  ;;  %v4353_v24 = vadd.f32 1.0, %v9463_v10 }
 0x52a   : > { %v9467_v15 = vpop.eup %9466  ;;  %9486 = vrcp.f32 %v4336_v23  ;;  %v4347_v23 = vadd.f32 1.0, %v9451_v18  ;;  %v4354_v17 = vadd.f32 1.0, %v9465_v20 }
 0x52b   : > { %v9469_v2 = vpop.eup %9468  ;;  %9488 = vrcp.f32 %v4337_v53  ;;  %v4349_v53 = vadd.f32 1.0, %v9455_v60  ;;  %v4355_v54 = vadd.f32 1.0, %v9467_v15 }
 0x52c   : > { %v9471_v5 = vpop.eup %9470  ;;  %9490 = vrcp.f32 %v4338_v26  ;;  %v4352_v26 = vadd.f32 1.0, %v9461_v52  ;;  %v12080_v61 = vadd.f32 1.0, %v9469_v2 }
 0x52d   : > { %v9473_v13 = vpop.eup %9472  ;;  %9492 = vrcp.f32 %v4339_v25  ;;  %v12082_v4 = vadd.f32 1.0, %v9471_v5 }
 0x52e   : > { %v9475_v41 = vpop.eup %9474  ;;  %9494 = vrcp.f32 %v4340_v19  ;;  %v12084_v18 = vadd.f32 1.0, %v9473_v13 }
 0x52f   : > { %v9477_v56 = vpop.eup %9476  ;;  %9496 = vrcp.f32 %v4341_v36  ;;  %v12086_v47 = vadd.f32 1.0, %v9475_v41 }
 0x530   : > { %v9479_v58 = vpop.eup %9478  ;;  %9498 = vrcp.f32 %v4342_v55  ;;  %v12091_v30 = vadd.f32 1.0, %v9477_v56 }
 0x531   : > { %v9481_v28 = vpop.eup %9480  ;;  %9500 = vrcp.f32 %v4343_v48  ;;  %v12093_v55 = vadd.f32 1.0, %v9479_v58 }
 0x532   : > { %v9483_v57 = vpop.eup %9482  ;;  %9502 = vrcp.f32 %v4344_v11  ;;  %v12089_v60 = vmul.f32 %v9481_v28, %v11886_v40 }
 0x533   : > { %v9485_v62 = vpop.eup %9484  ;;  %9504 = vrcp.f32 %v4345_v0  ;;  %v12096_v52 = vmul.f32 %v9483_v57, %v11890_v7 }
 0x534   : > { %v9487_v10 = vpop.eup %9486  ;;  %9506 = vrcp.f32 %v4346_v37  ;;  %v12100_v48 = vmul.f32 %v9485_v62, %v11893_v22 }
 0x535   : > { %v9489_v40 = vpop.eup %9488  ;;  %9508 = vrcp.f32 %v4347_v23  ;;  %v13311_v28 = vrot.slane %v12096_v52, 1  ;;  %v12105_v20 = vmul.f32 %v9487_v10, %v11896_v33  ;;  %v13310_v25 = vrot.slane %v12096_v52, 7 }
 0x536   : > { %v9491_v7 = vpop.eup %9490  ;;  %9510 = vrcp.f32 %v4348_v45  ;;  %v4563_v15 = vrot.slane %v12100_v48, 1  ;;  %v12111_v19 = vpack.c.bf16 %v12100_v48, %v12096_v52  ;;  %v12114_v22 = vmul.f32 %v9489_v40, %v11902_v50  ;;  %v13498_v40 = vld [vmem:[#allocation50_spill] sm:$0xff] }
 0x537   : > { %v9493_v2 = vpop.eup %9492  ;;  %9512 = vrcp.f32 %v4349_v53  ;;  %v4565_v36 = vrot.slane %v12105_v20, 1  ;;  %v12118_v33 = vmul.f32 %v9491_v7, %v11912_v31  ;;  %v4467_v5 = vrot.slane %v12100_v48, 7 }
 0x538   : > { %v9495_v0 = vpop.eup %9494  ;;  %9514 = vrcp.f32 %v4350_v43  ;;  %v4564_v45 = vsel %vm1821_vm7, %v13311_v28, %v4563_v15  ;;  %v4567_v41 = vrot.slane %v12114_v22, 1  ;;  %v12126_v50 = vmul.f32 %v9493_v2, %v11918_v27  ;;  %v13497_v43 = vld [vmem:[#allocation48_spill] sm:$0xff] }
 0x539   : > { %v9497_v37 = vpop.eup %9496  ;;  %9516 = vrcp.f32 %v4351_v6  ;;  %v4566_v23 = vsel %vm1821_vm7, %v4563_v15, %v4565_v36  ;;  %v4569_v31 = vrot.slane %v12118_v33, 1  ;;  %v12131_v56 = vmul.f32 %v9495_v0, %v11921_v51 }
 0x53a   : > { %v9499_v53 = vpop.eup %9498  ;;  %9518 = vrcp.f32 %v4352_v26  ;;  %v4751_v58 = vmul.f32 %v13497_v43, %v4566_v23  ;;  %v4568_v57 = vsel %vm1821_vm7, %v4565_v36, %v4567_v41  ;;  %v4571_v62 = vrot.slane %v12126_v50, 1 }
 0x53b   : > { %v9501_v10 = vpop.eup %9500  ;;  %9520 = vrcp.f32 %v4353_v24  ;;  %v4570_v27 = vsel %vm1821_vm7, %v4567_v41, %v4569_v31  ;;  %v4573_v6 = vrot.slane %v12131_v56, 1  ;;  %v12141_v48 = vsel %vm1724_vm6, %v13310_v25, %v4467_v5  ;;  %v13505_v25 = vld [vmem:[#allocation57_spill] sm:$0xff] }
 0x53c   : > { %v9503_v51 = vpop.eup %9502  ;;  %9522 = vrcp.f32 %v4354_v17  ;;  %v12143_v26 = vpack.c.bf16 %v4751_v58, %v4564_v45  ;;  %v4753_v7 = vmul.f32 %v13498_v40, %v4570_v27  ;;  %v4572_v15 = vsel %vm1821_vm7, %v4569_v31, %v4571_v62  ;;  %v13499_v45 = vld [vmem:[#allocation51_spill] sm:$0xff] }
 0x53d   : > { %v9505_v2 = vpop.eup %9504  ;;  %9524 = vrcp.f32 %v4355_v54  ;;  %v4574_v24 = vsel %vm1821_vm7, %v4571_v62, %v4573_v6  ;;  %v12150_v36 = vpack.c.bf16 %v12114_v22, %v12105_v20  ;;  %v12153_v0 = vmul.f32 %v9497_v37, %v11937_v59 }
 0x53e   : > { %v9507_v41 = vpop.eup %9506  ;;  %9526 = vrcp.f32 %v12080_v61  ;;  %v12156_v17 = vpack.c.bf16 %v4753_v7, %v4568_v57  ;;  %v4755_v23 = vmul.f32 %v13499_v45, %v4574_v24  ;;  %v12160_v31 = vmul.f32 %v9499_v53, %v11947_v38  ;;  %v13502_v45 = vld [vmem:[#allocation55_spill] sm:$0xff] }
 0x53f   : > { %v9509_v54 = vpop.eup %9508  ;;  %9528 = vrcp.f32 %v12082_v4  ;;  %v4575_v43 = vrot.slane %v12153_v0, 1  ;;  %v12165_v58 = vmul.f32 %v9501_v10, %v11951_v8  ;;  %v12168_v59 = vmul.f32 %v9503_v51, %v11956_v44 }
 0x540   : > { %v9511_v37 = vpop.eup %9510  ;;  %9530 = vrcp.f32 %v12084_v18  ;;  %v12171_v61 = vpack.c.bf16 %v4755_v23, %v4572_v15  ;;  %v4577_v57 = vrot.slane %v12160_v31, 1  ;;  %v4469_v38 = vrot.slane %v12105_v20, 7  ;;  %v13500_v20 = vld [vmem:[#allocation53_spill] sm:$0xff]  ;;  %v13501_v15 = vld [vmem:[#allocation54_spill] sm:$0xff] }
 0x541   : > { %v9513_v53 = vpop.eup %9512  ;;  %9532 = vrcp.f32 %v12086_v47  ;;  %v4576_v4 = vsel %vm1821_vm7, %v4573_v6, %v4575_v43  ;;  %v4579_v8 = vrot.slane %v12165_v58, 1  ;;  %v4581_v62 = vrot.slane %v12168_v59, 1 }
 0x542   : > { %v9515_v44 = vpop.eup %9514  ;;  %9534 = vrcp.f32 %v12091_v30  ;;  %v4578_v18 = vsel %vm1821_vm7, %v4575_v43, %v4577_v57  ;;  %v4470_v10 = vsel %vm1724_vm6, %v4467_v5, %v4469_v38  ;;  %v4471_v27 = vrot.slane %v12114_v22, 7 }
 0x543   : > { %v9517_v51 = vpop.eup %9516  ;;  %9536 = vrcp.f32 %v12093_v55  ;;  %v4757_v47 = vmul.f32 %v13500_v20, %v4578_v18  ;;  %v4580_v6 = vsel %vm1821_vm7, %v4577_v57, %v4579_v8  ;;  %v4582_v40 = vsel %vm1821_vm7, %v4579_v8, %v4581_v62 }
 0x544   : > { %v9519_v7 = vpop.eup %9518  ;;  %9538 = vpow2.f32 %v12074_v21  ;;  %v4759_v30 = vmul.f32 %v13501_v15, %v4582_v40  ;;  %v4472_v24 = vsel %vm1724_vm6, %v4469_v38, %v4471_v27  ;;  %v4656_v5 = vmul.f32 %v13502_v45, %v4470_v10  ;;  %v13503_v40 = vld [vmem:[#allocation58_spill] sm:$0xff] }
 0x545   : > { %v12191_v23 = vpop.eup %9520  ;;  %9540 = vpow2.f32 %v12076_v12  ;;  %v12194_v55 = vpack.c.bf16 %v4757_v47, %v4576_v4  ;;  %v12198_v22 = vpack.c.bf16 %v12126_v50, %v12118_v33  ;;  %v12201_v43 = vmul.f32 %v9505_v2, %v11959_v35 }
 0x546   : > { %v12203_v21 = vpop.eup %9522  ;;  %9542 = vpow2.f32 %v12078_v34  ;;  %v12206_v57 = vpack.c.bf16 %v4759_v30, %v4580_v6  ;;  %v12208_v38 = vpack.c.bf16 %v4472_v24, %v4656_v5  ;;  %v12211_v8 = vmul.f32 %v9507_v41, %v11963_v46 }
 0x547   : > { %v9525_v12 = vpop.eup %9524  ;;  %v4583_v4 = vrot.slane %v12201_v43, 1  ;;  %v12215_v18 = vmul.f32 %v9509_v54, %v11967_v16  ;;  %v12218_v35 = vmul.f32 %v9511_v37, %v11971_v29  ;;  %v4473_v2 = vrot.slane %v12118_v33, 7 }
 0x548   : > { %v9527_v10 = vpop.eup %9526  ;;  %v4585_v34 = vrot.slane %v12211_v8, 1  ;;  %v4475_v20 = vrot.slane %v12126_v50, 7  ;;  %v12225_v46 = vpack.c.bf16 %v12153_v0, %v12131_v56  ;;  %v12228_v41 = vmul.f32 %v9513_v53, %v11975_v1 }
 0x549   : > { %v12230_v47 = vpop.eup %9528  ;;  %v4584_v16 = vsel %vm1821_vm7, %v4581_v62, %v4583_v4  ;;  %v4587_v29 = vrot.slane %v12215_v18, 1  ;;  %v4589_v33 = vrot.slane %v12218_v35, 1  ;;  %v4474_v54 = vsel %vm1724_vm6, %v4471_v27, %v4473_v2  ;;  %v13504_v62 = vld [vmem:[#allocation56_spill] sm:$0xff] }
 0x54a   : > { %v12236_v37 = vpop.eup %9530  ;;  %v4586_v50 = vsel %vm1821_vm7, %v4583_v4, %v4585_v34  ;;  %v4476_v6 = vsel %vm1724_vm6, %v4473_v2, %v4475_v20  ;;  %v4658_v15 = vmul.f32 %v13503_v40, %v4474_v54  ;;  %v12242_v1 = vmul.f32 %v9515_v44, %v11979_v49 }
 0x54b   : > { %v12244_v53 = vpop.eup %9532  ;;  %v4761_v30 = vmul.f32 %v13504_v62, %v4586_v50  ;;  %v4588_v24 = vsel %vm1821_vm7, %v4585_v34, %v4587_v29  ;;  %v4590_v45 = vsel %vm1821_vm7, %v4587_v29, %v4589_v33  ;;  %v4591_v27 = vrot.slane %v12228_v41, 1 }
 0x54c   : > { %v9535_v5 = vpop.eup %9534  ;;  %v4763_v4 = vmul.f32 %v13505_v25, %v4590_v45  ;;  %v12251_v11 = vpack.c.bf16 %v4476_v6, %v4658_v15  ;;  %v4593_v2 = vrot.slane %v12242_v1, 1  ;;  %v12255_v49 = vmul.f32 %v9517_v51, %v11983_v63 }
 0x54d   : > { %v12257_v44 = vpop.eup %9536  ;;  %v12259_v54 = vpack.c.bf16 %v4761_v30, %v4584_v16  ;;  %v4592_v34 = vsel %vm1821_vm7, %v4589_v33, %v4591_v27  ;;  %v12263_v29 = vmul.f32 %v9519_v7, %v11987_v42  ;;  %v4477_v50 = vrot.slane %v12131_v56, 7  ;;  %v13506_v16 = vld [vmem:[#allocation60_spill] sm:$0xff] }
 0x54e   : > { %v9539_v40 = vpop.eup %9538  ;;  %v12266_v25 = vpack.c.bf16 %v4763_v4, %v4588_v24  ;;  %v4594_v6 = vsel %vm1821_vm7, %v4591_v27, %v4593_v2  ;;  %v4595_v15 = vrot.slane %v12255_v49, 1  ;;  %v4479_v63 = vrot.slane %v12153_v0, 7  ;;  %v13507_v4 = vld [vmem:[#allocation62_spill] sm:$0xff] }
 0x54f   : > { %v9541_v51 = vpop.eup %9540  ;;  %v4330_v62 = vadd.f32 1.0, %v9539_v40  ;;  %v4765_v30 = vmul.f32 %v13506_v16, %v4594_v6  ;;  %v4597_v33 = vrot.slane %v12263_v29, 1  ;;  %v4478_v42 = vsel %vm1724_vm6, %v4475_v20, %v4477_v50  ;;  %v13508_v40 = vld [vmem:[#allocation61_spill] sm:$0xff] }
 0x550   : > { %v9543_v7 = vpop.eup %9542  ;;  %v4331_v45 = vadd.f32 1.0, %v9541_v51  ;;  %v4596_v56 = vsel %vm1821_vm7, %v4593_v2, %v4595_v15  ;;  %v4480_v24 = vsel %vm1724_vm6, %v4477_v50, %v4479_v63  ;;  %v4660_v27 = vmul.f32 %v13507_v4, %v4478_v42  ;;  %v13510_v42 = vld [vmem:[#allocation64_spill] sm:$0xff]  ;;  %v13512_v4 = vld [vmem:[#allocation3_spill] sm:$0xff] }
 0x551   : > { %9544 = vrcp.f32 %v4330_v62  ;;  %v4333_v28 = vadd.f32 1.0, %v9543_v7  ;;  %v12277_v13 = vpack.c.bf16 %v4765_v30, %v4592_v34  ;;  %v4598_v0 = vsel %vm1821_vm7, %v4595_v15, %v4597_v33 }
 0x552   : > { %9546 = vrcp.f32 %v4331_v45  ;;  %v4767_v6 = vmul.f32 %v13508_v40, %v4598_v0  ;;  %v12281_v16 = vpack.c.bf16 %v4480_v24, %v4660_v27  ;;  %v12285_v20 = vpack.c.bf16 %v12165_v58, %v12160_v31  ;;  %v13511_v45 = vld [vmem:[#allocation63_spill] sm:$0xff] }
 0x553   : > { %9548 = vrcp.f32 %v4333_v28  ;;  %v12289_v2 = vmul.f32 %v12191_v23, %v11991_v9  ;;  %v12293_v34 = vmul.f32 %v12203_v21, %v11996_v32  ;;  %v12296_v50 = vmul.f32 %v9525_v12, %v12003_v3 }
 0x554   : > { %v12298_v15 = vpack.c.bf16 %v4767_v6, %v4596_v56  ;;  %v12301_v51 = vmul.f32 %v9527_v10, %v12010_v39  ;;  %v4481_v62 = vrot.slane %v12160_v31, 7  ;;  %v4483_v28 = vrot.slane %v12165_v58, 7  ;;  %v13516_v6 = vld [vmem:[#allocation5_spill] sm:$0xff] }
 0x555   : > { %v4599_v30 = vrot.slane %v12289_v2, 1  ;;  %v4601_v9 = vrot.slane %v12293_v34, 1  ;;  %v4603_v23 = vrot.slane %v12296_v50, 1  ;;  %v12310_v32 = vpack.c.bf16 %v12201_v43, %v12168_v59 }
 0x556   : > { %v4605_v3 = vrot.slane %v12301_v51, 1  ;;  %v4482_v21 = vsel %vm1724_vm6, %v4479_v63, %v4481_v62  ;;  %v4484_v39 = vsel %vm1724_vm6, %v4481_v62, %v4483_v28  ;;  %v12317_v31 = vmul.f32 %v12230_v47, %v12017_v14  ;;  %v13513_v14 = vld [vmem:[#allocation43_spill] sm:$0xff] }
 0x557   : > { %13509 = vst [vmem:[#allocation19_spill] sm:$0xff] %v12310_v32  ;;  %v4600_v58 = vsel %vm1821_vm7, %v4597_v33, %v4599_v30  ;;  %v4602_v12 = vsel %vm1821_vm7, %v4599_v30, %v4601_v9  ;;  %v4604_v10 = vsel %vm1821_vm7, %v4601_v9, %v4603_v23  ;;  %v4662_v7 = vmul.f32 %v13510_v42, %v4482_v21  ;;  %v13515_v33 = vld [vmem:[#allocation4_spill] sm:$0xff] }
 0x558   : > { %v4769_v56 = vmul.f32 %v13511_v45, %v4602_v12  ;;  %v4606_v24 = vsel %vm1821_vm7, %v4603_v23, %v4605_v3  ;;  %v12327_v63 = vmul.f32 %v12236_v37, %v13512_v4  ;;  %v4607_v27 = vrot.slane %v12317_v31, 1  ;;  %v13521_v4 = vld [vmem:[#allocation74_spill] sm:$0xff] }
 0x559   : > { %v4771_v47 = vmul.f32 %v13513_v14, %v4606_v24  ;;  %v12331_v0 = vpack.c.bf16 %v4484_v39, %v4662_v7  ;;  %v12335_v40 = vmul.f32 %v12244_v53, %v13515_v33  ;;  %v12338_v62 = vmul.f32 %v9535_v5, %v13516_v6  ;;  %v13518_v5 = vld [vmem:[#allocation10_spill] sm:$0xff] }
 0x55a   : > { %v12340_v30 = vpack.c.bf16 %v4769_v56, %v4600_v58  ;;  %v4608_v9 = vsel %vm1821_vm7, %v4605_v3, %v4607_v27  ;;  %v4609_v37 = vrot.slane %v12327_v63, 1  ;;  %v4485_v23 = vrot.slane %v12168_v59, 7 }
 0x55b   : > { %13514 = vst [vmem:[#allocation73_spill] sm:$0xff] %v12331_v0  ;;  %v9545_v21 = vpop.eup %9544  ;;  %v12345_v12 = vpack.c.bf16 %v4771_v47, %v4604_v10  ;;  %v4611_v39 = vrot.slane %v12335_v40, 1  ;;  %v13316_v42 = vrot.slane %v12338_v62, 1  ;;  %v12355_v56 = vpack.c.bf16 %v12215_v18, %v12211_v8  ;;  %v13520_v10 = vld [vmem:[#allocation13_spill] sm:$0xff] }
 0x55c   : > { %v9547_v7 = vpop.eup %9546  ;;  %v4394_v45 = vmul.f32 %v9545_v21, %v13518_v5  ;;  %v4610_v58 = vsel %vm1821_vm7, %v4607_v27, %v4609_v37  ;;  %v4486_v3 = vsel %vm1724_vm6, %v4483_v28, %v4485_v23  ;;  %v13522_v27 = vld [vmem:[#allocation16_spill] sm:$0xff]  ;;  %v13523_v28 = vld [vmem:[#allocation75_spill] sm:$0xff] }
 0x55d   : > { %13517 = vst [vmem:[#allocation68_spill] sm:$0xff] %v12345_v12  ;;  %13519 = vst [vmem:[#allocation69_spill] sm:$0xff] %v12355_v56  ;;  %v9549_v59 = vpop.eup %9548  ;;  %v4395_v24 = vmul.f32 %v9547_v7, %v13520_v10  ;;  %v4773_v14 = vmul.f32 %v13521_v4, %v4610_v58  ;;  %v4612_v47 = vsel %vm1821_vm7, %v4609_v37, %v4611_v39 }
 0x55e   : > { %v4614_v33 = vsel %vm1821_vm7, %v4611_v39, %v13316_v42  ;;  %v4458_v6 = vrot.slane %v4394_v45, 7  ;;  %v4554_v21 = vrot.slane %v4394_v45, 1  ;;  %v4397_v5 = vmul.f32 %v9549_v59, %v13522_v27  ;;  %v13526_v59 = vld [vmem:[#allocation45_spill] sm:$0xff] }
 0x55f   : > { %v4775_v53 = vmul.f32 %v13523_v28, %v4614_v33  ;;  %v12365_v32 = vpack.c.bf16 %v4395_v24, %v4394_v45  ;;  %v4459_v56 = vrot.slane %v4395_v24, 7  ;;  %v4555_v0 = vrot.slane %v4395_v24, 1  ;;  %v13528_v24 = vld [vmem:[#allocation46_spill] sm:$0xff] }
 0x560   : > { %v12367_v12 = vpack.c.bf16 %v4773_v14, %v4608_v9  ;;  %v4553_v7 = vsel %vm1724_vm6, 0.0, %v4458_v6  ;;  %v4559_v58 = vrot.slane %v4397_v5, 1  ;;  %v12371_v37 = vpack.c.bf16 %v4397_v5, %v12089_v60 }
 0x561   : > { %13524 = vst [vmem:[#allocation70_spill] sm:$0xff] %v12365_v32  ;;  %v4463_v10 = vrot.slane %v4397_v5, 7  ;;  %5134 = vmatprep.mubr.bf16.mxu0 %v12365_v32  ;;  %v4460_v39 = vsel %vm1724_vm6, %v4458_v6, %v4459_v56  ;;  %v4650_v4 = vmul.f32 %v13526_v59, %v4553_v7  ;;  %v4556_v45 = vsel %vm1821_vm7, %v4554_v21, %v4555_v0  ;;  %v13532_v21 = vld [vmem:[#allocation47_spill] sm:$0xff] }
 0x562   : > { %13525 = vst [vmem:[#allocation44_spill] sm:$0xff] %v12367_v12  ;;  %v13527_v33 = vrot.slane %v12089_v60, 1  ;;  %v13530_v5 = vrot.slane %v12096_v52, 1  ;;  %v13531_v6 = vrot.slane %v12089_v60, 7  ;;  %v13536_v60 = vrot.slane %v12201_v43, 7 }
 0x563   : > { %v12390_v59 = vpack.c.bf16 %v4460_v39, %v4650_v4  ;;  %v12408_v39 = vpack.c.bf16 %v4775_v53, %v4612_v47  ;;  %v9261_v53 = vld [vmem:[%s13189_s9 + $0x1c8] sm:$0xff]   ;;  %v4489_v47 = vrot.slane %v12211_v8, 7 }
 0x564   : > { %v4558_v9 = vsel %vm1821_vm7, %v4555_v0, %v13527_v33  ;;  %v13529_v27 = vmov %v13527_v33  ;;  %v4562_v42 = vsel %vm1821_vm7, %v4559_v58, %v13530_v5  ;;  %v4462_v7 = vsel %vm1724_vm6, %v4459_v56, %v13531_v6  ;;  %v9243_v56 = vld [vmem:[%s13189_s9] sm:$0xff]   ;;  %v9262_v8 = vld [vmem:[%s13189_s9 + $0x188] sm:$0xff]  }
 0x565   : > { %v4747_v14 = vmul.f32 %v13528_v24, %v4558_v9  ;;  %v4560_v28 = vsel %vm1821_vm7, %v13529_v27, %v4559_v58  ;;  %v4749_v32 = vmul.f32 %v13532_v21, %v4562_v42  ;;  %v13533_v0 = vmov %v13531_v6  ;;  %v13534_v9 = vld [vmem:[#allocation49_spill] sm:$0xff]  ;;  %v9259_v27 = vld [vmem:[%s13189_s9 + $0x180] sm:$0xff]   ;;  %5135 = vmatmul.mubr.bf16.vlgmr.msra.gmra.mrb[136].mxu0 %v12390_v59  ;;  %v13537_v6 = vld [vmem:[#allocation52_spill] sm:$0xff] }
 0x566   : > { %v4464_v33 = vsel %vm1724_vm6, %v13533_v0, %v4463_v10  ;;  %v4652_v24 = vmul.f32 %v13534_v9, %v4462_v7  ;;  %v13535_v58 = vrot.slane %v12096_v52, 7  ;;  %v4488_v4 = vsel %vm1724_vm6, %v4485_v23, %v13536_v60  ;;  %v13538_v7 = vld [vmem:[#allocation66_spill] sm:$0xff]  ;;  %5142 = vmatprep.mubr.bf16.mxu0 %v12371_v37  ;;  %8155 = vmatpush3.bf16.msra.mxu0 %v9259_v27  ;;  %v9264_v27 = vld [vmem:[%s13189_s9 + $0x1d0] sm:$0xff]  }
 0x567   : > { %v12400_v12 = vpack.c.bf16 %v4747_v14, %v4556_v45  ;;  %v12414_v5 = vpack.c.bf16 %v4749_v32, %v4560_v28  ;;  %v9244_v14 = vld [vmem:[%s13189_s9 + $0x48] sm:$0xff]   ;;  %v13539_v32 = vld [vmem:[#allocation6_spill] sm:$0xff]  ;;  %v4491_v28 = vrot.slane %v12215_v18, 7  ;;  %v12436_v21 = vpack.c.bf16 %v12228_v41, %v12218_v35  ;;  %8156 = vmatprep.subr.bf16.mxu0 %v9261_v53  ;;  %v9265_v53 = vld [vmem:[%s13189_s9 + $0x190] sm:$0xff]  }
 0x568   : > { %v4466_v42 = vsel %vm1724_vm6, %v4463_v10, %v13535_v58  ;;  %v12416_v45 = vpack.c.bf16 %v4464_v33, %v4652_v24  ;;  %v4664_v10 = vmul.f32 %v13538_v7, %v4486_v3  ;;  %v12430_v23 = vmul.f32 %v12257_v44, %v13539_v32  ;;  %v9245_v18 = vld [vmem:[%s13189_s9 + $0x8] sm:$0xff]   ;;  %v13541_v58 = vld [vmem:[#allocation71_spill] sm:$0xff] }
 0x569   : > { %v4654_v52 = vmul.f32 %v13537_v6, %v4466_v42  ;;  %8590 = vmatprep.mubr.bf16.mxu1 %v12400_v12  ;;  %v4493_v33 = vrot.slane %v12218_v35, 7  ;;  %v4495_v44 = vrot.slane %v12228_v41, 7  ;;  %v13540_v9 = vmov %v13536_v60 }
 0x56a   : > { %8591 = vmatmul.mubr.bf16.vlgmr.msra.gmra.mrb[96].mxu1 %v12414_v5  ;;  %v12442_v0 = vpack.c.bf16 %v4488_v4, %v4664_v10  ;;  %v4490_v24 = vsel %vm1724_vm6, %v13540_v9, %v4489_v47  ;;  %v4492_v35 = vsel %vm1724_vm6, %v4489_v47, %v4491_v28  ;;  %v12460_v41 = vpack.c.bf16 %v12255_v49, %v12242_v1  ;;  %v13544_v47 = vld [vmem:[#allocation76_spill] sm:$0xff] }
 0x56b   : > { %v12440_v3 = vpack.c.bf16 %v12141_v48, %v4654_v52  ;;  %8019 = vmatpush3.bf16.msra.mxu1 %v9243_v56  ;;  %8594 = vmatprep.mubr.bf16.mxu1 %v12143_v26  ;;  %v4615_v48 = vrot.slane %v12430_v23, 1  ;;  %v9246_v56 = vld [vmem:[%s13189_s9 + $0x50] sm:$0xff]   ;;  %v4666_v42 = vmul.f32 %v13541_v58, %v4490_v24  ;;  %v4494_v43 = vsel %vm1724_vm6, %v4491_v28, %v4493_v33 }
 0x56c   : > { %8020 = vmatprep.subr.bf16.mxu1 %v9244_v14  ;;  %v4496_v60 = vsel %vm1724_vm6, %v4493_v33, %v4495_v44  ;;  %v4497_v4 = vrot.slane %v12242_v1, 7  ;;  %v13542_v6 = vrot.slane %v12338_v62, 1  ;;  %v13543_v14 = vld [vmem:[#allocation59_spill] sm:$0xff]  ;;  %v4499_v32 = vrot.slane %v12255_v49, 7  ;;  %8157 = vmatpush3.bf16.msra.mxu0 %v9262_v8  ;;  %v9247_v49 = vld [vmem:[%s13189_s9 + $0x10] sm:$0xff]  }
 0x56d   : > { %v4649_v7 = vsel %vm1821_vm7, %v4615_v48, 0.0  ;;  %v4668_v10 = vmul.f32 %v13543_v14, %v4494_v43  ;;  %v12479_v24 = vpack.c.bf16 %v4492_v35, %v4666_v42  ;;  %v12484_v1 = vpack.c.bf16 %v12289_v2, %v12263_v29  ;;  %v13545_v8 = vld [vmem:[#allocation65_spill] sm:$0xff]  ;;  %8158 = vmatprep.subr.bf16.mxu0 %v9264_v27  ;;  %5143 = vmatmul.mubr.bf16.gmra.mrb[140].mxu0 %v12416_v45 }
 0x56e   : > { %v4616_v52 = vsel %vm1821_vm7, %v13542_v6, %v4615_v48  ;;  %v4777_v9 = vmul.f32 %v13544_v47, %v4649_v7  ;;  %v4498_v28 = vsel %vm1724_vm6, %v4495_v44, %v4497_v4  ;;  %v4500_v48 = vsel %vm1724_vm6, %v4497_v4, %v4499_v32  ;;  %5150 = vmatprep.mubr.bf16.mxu0 %v12111_v19  ;;  %v13546_v6 = vld [vmem:[#allocation67_spill] sm:$0xff]  ;;  %v13547_v47 = vld [vmem:[#allocation77_spill] sm:$0xff] }
 0x56f   : > { %8021 = vmatpush3.bf16.msra.mxu1 %v9245_v18  ;;  %v12492_v33 = vpack.c.bf16 %v4496_v60, %v4668_v10  ;;  %v4670_v35 = vmul.f32 %v13545_v8, %v4498_v28  ;;  %v4501_v44 = vrot.slane %v12263_v29, 7  ;;  %v9248_v18 = vld [vmem:[%s13189_s9 + $0x58] sm:$0xff]   ;;  %v4503_v42 = vrot.slane %v12289_v2, 7 }
 0x570   : > { %8022 = vmatprep.subr.bf16.mxu1 %v9246_v56  ;;  %v12501_v58 = vpack.c.bf16 %v4777_v9, %v4616_v52  ;;  %v12506_v43 = vpack.c.bf16 %v12296_v50, %v12293_v34  ;;  %v4505_v60 = vrot.slane %v12293_v34, 7  ;;  %v9267_v29 = vld [vmem:[%s13189_s9 + $0x1d8] sm:$0xff]   ;;  %v4507_v4 = vrot.slane %v12296_v50, 7  ;;  %8159 = vmatpush3.bf16.msra.mxu0 %v9265_v53  ;;  %v9270_v53 = vld [vmem:[%s13189_s9 + $0x1e0] sm:$0xff]  }
 0x571   : > { %v12513_v27 = vpack.c.bf16 %v4500_v48, %v4670_v35  ;;  %v4502_v56 = vsel %vm1724_vm6, %v4499_v32, %v4501_v44  ;;  %v12519_v2 = vpack.c.bf16 %v12317_v31, %v12301_v51  ;;  %v4504_v34 = vsel %vm1724_vm6, %v4501_v44, %v4503_v42  ;;  %v9268_v10 = vld [vmem:[%s13189_s9 + $0x198] sm:$0xff]   ;;  %8160 = vmatprep.subr.bf16.mxu0 %v9267_v29 }
 0x572   : > { %8595 = vmatmul.mubr.bf16.gmra.mrb[100].mxu1 %v12156_v17  ;;  %v4672_v52 = vmul.f32 %v13546_v6, %v4502_v56  ;;  %v4506_v7 = vsel %vm1724_vm6, %v4503_v42, %v4505_v60  ;;  %v4509_v14 = vrot.slane %v12301_v51, 7  ;;  %v9249_v50 = vld [vmem:[%s13189_s9 + $0x18] sm:$0xff]   ;;  %v4508_v32 = vsel %vm1724_vm6, %v4505_v60, %v4507_v4  ;;  %v9251_v6 = vld [vmem:[%s13189_s9 + $0x20] sm:$0xff]  }
 0x573   : > { %8598 = vmatprep.mubr.bf16.mxu1 %v12171_v61  ;;  %8023 = vmatpush3.bf16.msra.mxu1 %v9247_v49  ;;  %v4674_v9 = vmul.f32 %v13547_v47, %v4506_v7  ;;  %v4511_v28 = vrot.slane %v12317_v31, 7  ;;  %v12538_v51 = vpack.c.bf16 %v12335_v40, %v12327_v63  ;;  %v9250_v49 = vld [vmem:[%s13189_s9 + $0x60] sm:$0xff]   ;;  %v4513_v31 = vrot.slane %v12327_v63, 7  ;;  %v13548_v60 = vld [vmem:[#allocation78_spill] sm:$0xff]  ;;  %v13549_v7 = vld [vmem:[#allocation72_spill] sm:$0xff] }
 0x574   : > { %8024 = vmatprep.subr.bf16.mxu1 %v9248_v18  ;;  %v12546_v48 = vpack.c.bf16 %v4504_v34, %v4672_v52  ;;  %v4510_v8 = vsel %vm1724_vm6, %v4507_v4, %v4509_v14  ;;  %v4515_v35 = vrot.slane %v12335_v40, 7  ;;  %v12557_v18 = vpack.c.bf16 %v12430_v23, %v12338_v62  ;;  %8161 = vmatpush3.bf16.msra.mxu0 %v9268_v10  ;;  %v9271_v63 = vld [vmem:[%s13189_s9 + $0x1a0] sm:$0xff]   ;;  %v9252_v10 = vld [vmem:[%s13189_s9 + $0x68] sm:$0xff]  }
 0x575   : > { %v12551_v44 = vpack.c.bf16 %v4508_v32, %v4674_v9  ;;  %v4512_v42 = vsel %vm1724_vm6, %v4509_v14, %v4511_v28  ;;  %v4676_v56 = vmul.f32 %v13548_v60, %v4510_v8  ;;  %v4514_v34 = vsel %vm1724_vm6, %v4511_v28, %v4513_v31  ;;  %8162 = vmatprep.subr.bf16.mxu0 %v9270_v53  ;;  %v13550_v47 = vld [vmem:[#allocation79_spill] sm:$0xff]  ;;  %v9273_v28 = vld [vmem:[%s13189_s9 + $0x1a8] sm:$0xff]   ;;  %v9274_v8 = vld [vmem:[%s13189_s9 + $0x1f0] sm:$0xff]  }
 0x576   : > { %v4516_v4 = vsel %vm1724_vm6, %v4513_v31, %v4515_v35  ;;  %v4517_v40 = vrot.slane %v12338_v62, 7  ;;  %v4519_v29 = vrot.slane %v12430_v23, 7  ;;  %v4678_v14 = vmul.f32 %v13549_v7, %v4514_v34  ;;  %5151 = vmatmul.mubr.bf16.gmra.mrb[144].mxu0 %v12440_v3  ;;  %v9272_v62 = vld [vmem:[%s13189_s9 + $0x1e8] sm:$0xff]   ;;  %v9254_v31 = vld [vmem:[%s13189_s9 + $0x70] sm:$0xff]   ;;  %v9256_v60 = vld [vmem:[%s13189_s9 + $0x78] sm:$0xff]  }
 0x577   : > { %8025 = vmatpush3.bf16.msra.mxu1 %v9249_v50  ;;  %v12569_v52 = vpack.c.bf16 %v4512_v42, %v4676_v56  ;;  %5158 = vmatprep.mubr.bf16.mxu0 %v12150_v36  ;;  %v9253_v53 = vld [vmem:[%s13189_s9 + $0x28] sm:$0xff]   ;;  %v9255_v42 = vld [vmem:[%s13189_s9 + $0x30] sm:$0xff]   ;;  %v9276_v56 = vld [vmem:[%s13189_s9 + $0x1f8] sm:$0xff]  }
 0x578   : > { %8026 = vmatprep.subr.bf16.mxu1 %v9250_v49  ;;  %v4518_v23 = vsel %vm1724_vm6, %v4515_v35, %v4517_v40  ;;  %v4520_v50 = vsel %vm1724_vm6, %v4517_v40, %v4519_v29  ;;  %v12582_v32 = vpack.c.bf16 %v4516_v4, %v4678_v14  ;;  %8163 = vmatpush3.bf16.msra.mxu0 %v9271_v63  ;;  %v9275_v35 = vld [vmem:[%s13189_s9 + $0x1b0] sm:$0xff]   ;;  %v9277_v34 = vld [vmem:[%s13189_s9 + $0x1b8] sm:$0xff]   ;;  %v9260_v63 = vld [vmem:[%s13189_s9 + $0x80] sm:$0xff]  }
 0x579   : > { %v4680_v9 = vmul.f32 %v13550_v47, %v4518_v23  ;;  %8164 = vmatprep.subr.bf16.mxu0 %v9272_v62  ;;  %v9257_v4 = vld [vmem:[%s13189_s9 + $0x38] sm:$0xff]   ;;  %v13551_v40 = vld [vmem:[#allocation68_spill] sm:$0xff]  ;;  %v13552_v29 = vld [vmem:[#allocation73_spill] sm:$0xff] }
 0x57a   : > { %8599 = vmatmul.mubr.bf16.gmra.mrb[104].mxu1 %v12194_v55  ;;  %v13554_v7 = vld [vmem:[#allocation44_spill] sm:$0xff]  ;;  %v13555_v14 = vld [vmem:[#allocation69_spill] sm:$0xff]  ;;  %v13557_v23 = vld [vmem:[#allocation70_spill] sm:$0xff] }
 0x57b   : > { %8602 = vmatprep.mubr.bf16.mxu1 %v12206_v57  ;;  %8027 = vmatpush3.bf16.msra.mxu1 %v9251_v6  ;;  %v12593_v49 = vpack.c.bf16 %v4520_v50, %v4680_v9  ;;  %v13553_v6 = vld [vmem:[#allocation19_spill] sm:$0xff]  ;;  %v9263_v62 = vld [vmem:[%s13189_s9 + $0x88] sm:$0xff]   ;;  %v9266_v50 = vld [vmem:[%s13189_s9 + $0x90] sm:$0xff]  }
 0x57c   : > { %8028 = vmatprep.subr.bf16.mxu1 %v9252_v10  ;;  %8165 = vmatpush3.bf16.msra.mxu0 %v9273_v28  ;;  %v13556_v10 = vmov 0   ;;  %v9269_v47 = vld [vmem:[%s13189_s9 + $0x98] sm:$0xff]   ;;  %v9278_v9 = vld [vmem:[%s13189_s9 + $0xa0] sm:$0xff]   ;;  %v9279_v28 = vld [vmem:[%s13189_s9 + $0xa8] sm:$0xff]  }
 0x57d   : > { %8166 = vmatprep.subr.bf16.mxu0 %v9274_v8  ;;  %v9282_v8 = vld [vmem:[%s13189_s9 + $0x200] sm:$0xff]  }
 0x57e   : > { %5159 = vmatmul.mubr.bf16.gmra.mrb[148].mxu0 %v12208_v38 }
 0x57f   : > { %8029 = vmatpush3.bf16.msra.mxu1 %v9253_v53  ;;  %5166 = vmatprep.mubr.bf16.mxu0 %v12198_v22  ;;  %v9281_v53 = vld [vmem:[%s13189_s9 + $0xb8] sm:$0xff]  }
 0x580   : > { %8030 = vmatprep.subr.bf16.mxu1 %v9254_v31  ;;  %8167 = vmatpush3.bf16.msra.mxu0 %v9275_v35 }
 0x581   : > { %8168 = vmatprep.subr.bf16.mxu0 %v9276_v56 }
 0x582   : > { %8603 = vmatmul.mubr.bf16.gmra.mrb[108].mxu1 %v12259_v54 }
 0x583   : > { %8606 = vmatprep.mubr.bf16.mxu1 %v12266_v25  ;;  %8031 = vmatpush3.bf16.msra.mxu1 %v9255_v42 }
 0x584   : > { %8032 = vmatprep.subr.bf16.mxu1 %v9256_v60  ;;  %8169 = vmatpush3.bf16.msra.mxu0 %v9277_v34 }
 0x586   : > { %5167 = vmatmul.mubr.bf16.gmra.mrb[152].mxu0 %v12251_v11 }
 0x587   : > { %8033 = vmatpush3.bf16.msra.mxu1 %v9257_v4  ;;  %5174 = vmatprep.mubr.bf16.mxu0 %v12225_v46 }
 0x588   : > { %8622 = vmatprep.subr.bf16.mxu1 %v9260_v63 }
 0x58a   : > { %8607 = vmatmul.mubr.bf16.gmra.mrb[112].mxu1 %v12277_v13 }
 0x58b   : > { %8610 = vmatprep.mubr.bf16.mxu1 %v12298_v15 }
 0x58e   : > { %5175 = vmatmul.mubr.bf16.gmra.mrb[156].mxu0 %v12281_v16 }
 0x58f   : > { %5182 = vmatprep.mubr.bf16.mxu0 %v12285_v20 }
 0x592   : > { %8611 = vmatmul.mubr.bf16.gmra.mrb[116].mxu1 %v12340_v30 }
 0x593   : > { %8614 = vmatprep.mubr.bf16.mxu1 %v13551_v40 }
 0x596   : > { %5183 = vmatmul.mubr.bf16.gmra.mrb[160].mxu0 %v13552_v29 }
 0x597   : > { %5190 = vmatprep.mubr.bf16.mxu0 %v13553_v6 }
 0x59a   : > { %8615 = vmatmul.mubr.bf16.gmra.mrb[120].mxu1 %v13554_v7 }
 0x59b   : > { %8618 = vmatprep.mubr.bf16.mxu1 %v12408_v39 }
 0x59e   : > { %5191 = vmatmul.mubr.bf16.gmra.mrb[164].mxu0 %v12442_v0 }
 0x59f   : > { %5198 = vmatprep.mubr.bf16.mxu0 %v13555_v14 }
 0x5a2   : > { %8619 = vmatmul.mubr.bf16.gmra.mrb[124].mxu1 %v12501_v58 }
 0x5a3   : > { %5600 = vmatprep.mubr.bf16.mxu1 %v13556_v10 }
 0x5a6   : > { %5199 = vmatmul.mubr.bf16.gmra.mrb[168].mxu0 %v12479_v24 }
 0x5a7   : > { %5206 = vmatprep.mubr.bf16.mxu0 %v12436_v21 }
 0x5aa   : > { %5601 = vmatmul.mubr.bf16.vlgmr.msra.gmra.mrb[128].mxu1 %v13556_v10 }
 0x5ab   : > { %8623 = vmatpush3.bf16.msra.mxu1 %v9260_v63  ;;  %5608 = vmatprep.mubr.bf16.mxu1 %v13557_v23 }
 0x5ac   : > { %8624 = vmatprep.subr.bf16.mxu1 %v9263_v62 }
 0x5ae   : > { %5207 = vmatmul.mubr.bf16.gmra.mrb[172].mxu0 %v12492_v33 }
 0x5af   : > { %8625 = vmatpush3.bf16.msra.mxu1 %v9263_v62  ;;  %5214 = vmatprep.mubr.bf16.mxu0 %v12460_v41 }
 0x5b0   : > { %8626 = vmatprep.subr.bf16.mxu1 %v9266_v50 }
 0x5b2   : > { %5609 = vmatmul.mubr.bf16.gmra.mrb[132].mxu1 %v12390_v59  ;;  %v9280_v59 = vld [vmem:[%s13189_s9 + $0xb0] sm:$0xff]  }
 0x5b3   : > { %5616 = vmatprep.mubr.bf16.mxu1 %v12371_v37  ;;  %8627 = vmatpush3.bf16.msra.mxu1 %v9266_v50 }
 0x5b4   : > { %8628 = vmatprep.subr.bf16.mxu1 %v9269_v47 }
 0x5b6   : > { %5215 = vmatmul.mubr.bf16.gmra.mrb[176].mxu0 %v12513_v27 }
 0x5b7   : > { %8629 = vmatpush3.bf16.msra.mxu1 %v9269_v47  ;;  %5222 = vmatprep.mubr.bf16.mxu0 %v12484_v1 }
 0x5b8   : > { %8630 = vmatprep.subr.bf16.mxu1 %v9278_v9 }
 0x5ba   : > { %5617 = vmatmul.mubr.bf16.gmra.mrb[136].mxu1 %v12416_v45 }
 0x5bb   : > { %5624 = vmatprep.mubr.bf16.mxu1 %v12111_v19  ;;  %8631 = vmatpush3.bf16.msra.mxu1 %v9278_v9 }
 0x5bc   : > { %8632 = vmatprep.subr.bf16.mxu1 %v9279_v28 }
 0x5be   : > { %5223 = vmatmul.mubr.bf16.gmra.mrb[180].mxu0 %v12546_v48 }
 0x5bf   : > { %8633 = vmatpush3.bf16.msra.mxu1 %v9279_v28  ;;  %5230 = vmatprep.mubr.bf16.mxu0 %v12506_v43 }
 0x5c0   : > { %8634 = vmatprep.subr.bf16.mxu1 %v9280_v59 }
 0x5c2   : > { %5625 = vmatmul.mubr.bf16.gmra.mrb[140].mxu1 %v12440_v3 }
 0x5c3   : > { %5632 = vmatprep.mubr.bf16.mxu1 %v12150_v36  ;;  %8635 = vmatpush3.bf16.msra.mxu1 %v9280_v59 }
 0x5c4   : > { %8636 = vmatprep.subr.bf16.mxu1 %v9281_v53 }
 0x5c6   : > { %5231 = vmatmul.mubr.bf16.gmra.mrb[184].mxu0 %v12551_v44 }
 0x5c7   : > { %8637 = vmatpush3.bf16.msra.mxu1 %v9281_v53  ;;  %5238 = vmatprep.mubr.bf16.mxu0 %v12519_v2 }
 0x5c8   : > { %8670 = vmatprep.subr.bf16.mxu1 %v9282_v8 }
 0x5ca   : > { %5633 = vmatmul.mubr.bf16.gmra.mrb[144].mxu1 %v12208_v38 }
 0x5cb   : > { %5640 = vmatprep.mubr.bf16.mxu1 %v12198_v22 }
 0x5ce   : > { %5239 = vmatmul.mubr.bf16.gmra.mrb[188].mxu0 %v12569_v52 }
 0x5cf   : > { %5246 = vmatprep.mubr.bf16.mxu0 %v12538_v51 }
 0x5d2   : > { %5641 = vmatmul.mubr.bf16.gmra.mrb[148].mxu1 %v12251_v11 }
 0x5d3   : > { %5648 = vmatprep.mubr.bf16.mxu1 %v12225_v46 }
 0x5d6   : > { %5247 = vmatmul.mubr.bf16.gmra.mrb[192].mxu0 %v12582_v32 }
 0x5d7   : > { %5254 = vmatprep.mubr.bf16.mxu0 %v12557_v18 }
 0x5da   : > { %5649 = vmatmul.mubr.bf16.gmra.mrb[152].mxu1 %v12281_v16 }
 0x5db   : > { %5656 = vmatprep.mubr.bf16.mxu1 %v12285_v20 }
 0x5de   : > { %5255 = vmatmul.mubr.bf16.gmra.mrb[196].mxu0 %v12593_v49 }
 0x5df   : > { %6163 = vmatprep.mubr.bf16.mxu0 %v12371_v37 }
 0x5e2   : > { %5657 = vmatmul.mubr.bf16.gmra.mrb[156].mxu1 %v13552_v29 }
 0x5e3   : > { %5664 = vmatprep.mubr.bf16.mxu1 %v13553_v6 }
 0x5e6   : > { %6164 = vmatmul.mubr.bf16.vlgmr.msra.gmra.mrb[200].mxu0 %v12416_v45 }
 0x5e7   : > { %6171 = vmatprep.mubr.bf16.mxu0 %v12111_v19  ;;  %v9284_v19 = vld [vmem:[%s13189_s9 + $0x210] sm:$0xff]  }
 0x5ea   : > { %5665 = vmatmul.mubr.bf16.gmra.mrb[160].mxu1 %v12442_v0 }
 0x5eb   : > { %5672 = vmatprep.mubr.bf16.mxu1 %v13555_v14 }
 0x5ee   : > { %6172 = vmatmul.mubr.bf16.gmra.mrb[204].mxu0 %v12440_v3  ;;  %v9289_v3 = vld [vmem:[%s13189_s9 + $0x238] sm:$0xff]  }
 0x5ef   : > { %6179 = vmatprep.mubr.bf16.mxu0 %v12150_v36  ;;  %v9285_v36 = vld [vmem:[%s13189_s9 + $0x218] sm:$0xff]  }
 0x5f2   : > { %5673 = vmatmul.mubr.bf16.gmra.mrb[164].mxu1 %v12479_v24 }
 0x5f3   : > { %5680 = vmatprep.mubr.bf16.mxu1 %v12436_v21 }
 0x5f6   : > { %6180 = vmatmul.mubr.bf16.gmra.mrb[208].mxu0 %v12208_v38  ;;  %v9287_v38 = vld [vmem:[%s13189_s9 + $0x228] sm:$0xff]  }
 0x5f7   : > { %6187 = vmatprep.mubr.bf16.mxu0 %v12198_v22  ;;  %v9286_v22 = vld [vmem:[%s13189_s9 + $0x220] sm:$0xff]  }
 0x5fa   : > { %5681 = vmatmul.mubr.bf16.gmra.mrb[168].mxu1 %v12492_v33 }
 0x5fb   : > { %5688 = vmatprep.mubr.bf16.mxu1 %v12460_v41 }
 0x5fe   : > { %6188 = vmatmul.mubr.bf16.gmra.mrb[212].mxu0 %v12251_v11  ;;  %v9283_v11 = vld [vmem:[%s13189_s9 + $0x208] sm:$0xff]  }
 0x5ff   : > { %6195 = vmatprep.mubr.bf16.mxu0 %v12225_v46 }
 0x602   : > { %5689 = vmatmul.mubr.bf16.gmra.mrb[172].mxu1 %v12513_v27 }
 0x603   : > { %5696 = vmatprep.mubr.bf16.mxu1 %v12484_v1 }
 0x606   : > { %6196 = vmatmul.mubr.bf16.gmra.mrb[216].mxu0 %v12281_v16 }
 0x607   : > { %6203 = vmatprep.mubr.bf16.mxu0 %v12285_v20  ;;  %v9288_v20 = vld [vmem:[%s13189_s9 + $0x230] sm:$0xff]  }
 0x60a   : > { %5697 = vmatmul.mubr.bf16.gmra.mrb[176].mxu1 %v12546_v48 }
 0x60b   : > { %5704 = vmatprep.mubr.bf16.mxu1 %v12506_v43 }
 0x60e   : > { %6204 = vmatmul.mubr.bf16.gmra.mrb[220].mxu0 %v13552_v29 }
 0x60f   : > { %6211 = vmatprep.mubr.bf16.mxu0 %v13553_v6 }
 0x612   : > { %5705 = vmatmul.mubr.bf16.gmra.mrb[180].mxu1 %v12551_v44 }
 0x613   : > { %5712 = vmatprep.mubr.bf16.mxu1 %v12519_v2 }
 0x616   : > { %6212 = vmatmul.mubr.bf16.gmra.mrb[224].mxu0 %v12442_v0 }
 0x617   : > { %6219 = vmatprep.mubr.bf16.mxu0 %v13555_v14 }
 0x61a   : > { %5713 = vmatmul.mubr.bf16.gmra.mrb[184].mxu1 %v12569_v52 }
 0x61b   : > { %5720 = vmatprep.mubr.bf16.mxu1 %v12538_v51 }
 0x61e   : > { %6220 = vmatmul.mubr.bf16.gmra.mrb[228].mxu0 %v12479_v24 }
 0x61f   : > { %6227 = vmatprep.mubr.bf16.mxu0 %v12436_v21 }
 0x622   : > { %5721 = vmatmul.mubr.bf16.gmra.mrb[188].mxu1 %v12582_v32 }
 0x623   : > { %8638 = vmatprep.mubr.bf16.mxu1 %v13556_v10 }
 0x626   : > { %6228 = vmatmul.mubr.bf16.gmra.mrb[232].mxu0 %v12492_v33 }
 0x627   : > { %6235 = vmatprep.mubr.bf16.mxu0 %v12460_v41 }
 0x62a   : > { %8639 = vmatmul.mubr.bf16.vlgmr.msra.gmra.mrb[96].mxu1 %v12400_v12 }
 0x62b   : > { %8671 = vmatpush3.bf16.msra.mxu1 %v9282_v8  ;;  %8642 = vmatprep.mubr.bf16.mxu1 %v12414_v5 }
 0x62c   : > { %8672 = vmatprep.subr.bf16.mxu1 %v9283_v11 }
 0x62e   : > { %6236 = vmatmul.mubr.bf16.gmra.mrb[236].mxu0 %v12513_v27 }
 0x62f   : > { %8673 = vmatpush3.bf16.msra.mxu1 %v9283_v11  ;;  %6243 = vmatprep.mubr.bf16.mxu0 %v12484_v1 }
 0x630   : > { %8674 = vmatprep.subr.bf16.mxu1 %v9284_v19 }
 0x632   : > { %8643 = vmatmul.mubr.bf16.gmra.mrb[100].mxu1 %v12143_v26 }
 0x633   : > { %8646 = vmatprep.mubr.bf16.mxu1 %v12156_v17  ;;  %8675 = vmatpush3.bf16.msra.mxu1 %v9284_v19 }
 0x634   : > { %8676 = vmatprep.subr.bf16.mxu1 %v9285_v36 }
 0x636   : > { %6244 = vmatmul.mubr.bf16.gmra.mrb[240].mxu0 %v12546_v48 }
 0x637   : > { %8677 = vmatpush3.bf16.msra.mxu1 %v9285_v36  ;;  %6251 = vmatprep.mubr.bf16.mxu0 %v12506_v43 }
 0x638   : > { %8678 = vmatprep.subr.bf16.mxu1 %v9286_v22  ;;  %v7898_v46 = vpop.f32.mrb[136].mxu0 }
 0x639   : > { %v7899_v16 = vpop.f32.mrb[137].mxu0 }
 0x63a   : > { %8647 = vmatmul.mubr.bf16.gmra.mrb[104].mxu1 %v12171_v61  ;;  %v12760_v12 = vadd.f32 %v7899_v16, %v7898_v46  ;;  %v7901_v37 = vpop.f32.mrb[138].mxu0 }
 0x63b   : > { %8650 = vmatprep.mubr.bf16.mxu1 %v12194_v55  ;;  %8679 = vmatpush3.bf16.msra.mxu1 %v9286_v22  ;;  %v7902_v45 = vpop.f32.mrb[139].mxu0 }
 0x63c   : > { %8680 = vmatprep.subr.bf16.mxu1 %v9287_v38  ;;  %v12762_v21 = vadd.f32 %v7902_v45, %v7901_v37 }
 0x63e   : > { %6252 = vmatmul.mubr.bf16.gmra.mrb[244].mxu0 %v12551_v44 }
 0x63f   : > { %8681 = vmatpush3.bf16.msra.mxu1 %v9287_v38  ;;  %6259 = vmatprep.mubr.bf16.mxu0 %v12519_v2 }
 0x640   : > { %8682 = vmatprep.subr.bf16.mxu1 %v9288_v20  ;;  %v7904_v0 = vpop.f32.mrb[140].mxu0 }
 0x641   : > { %v7905_v41 = vpop.f32.mrb[141].mxu0 }
 0x642   : > { %8651 = vmatmul.mubr.bf16.gmra.mrb[108].mxu1 %v12206_v57  ;;  %v12771_v24 = vadd.f32 %v7905_v41, %v7904_v0  ;;  %v7907_v1 = vpop.f32.mrb[142].mxu0 }
 0x643   : > { %8654 = vmatprep.mubr.bf16.mxu1 %v12259_v54  ;;  %8683 = vmatpush3.bf16.msra.mxu1 %v9288_v20  ;;  %v7908_v33 = vpop.f32.mrb[143].mxu0 }
 0x644   : > { %8684 = vmatprep.subr.bf16.mxu1 %v9289_v3  ;;  %v12773_v43 = vadd.f32 %v7908_v33, %v7907_v1 }
 0x646   : > { %6260 = vmatmul.mubr.bf16.gmra.mrb[248].mxu0 %v12569_v52 }
 0x647   : > { %8685 = vmatpush3.bf16.msra.mxu1 %v9289_v3  ;;  %6267 = vmatprep.mubr.bf16.mxu0 %v12538_v51 }
 0x649   : > { %v7910_v27 = vpop.f32.mrb[144].mxu0 }
 0x64a   : > { %8655 = vmatmul.mubr.bf16.gmra.mrb[112].mxu1 %v12266_v25  ;;  %v7911_v2 = vpop.f32.mrb[145].mxu0 }
 0x64b   : > { %8658 = vmatprep.mubr.bf16.mxu1 %v12277_v13  ;;  %v12779_v48 = vadd.f32 %v7911_v2, %v7910_v27  ;;  %v7913_v44 = vpop.f32.mrb[146].mxu0 }
 0x64c   : > { %v7914_v31 = vpop.f32.mrb[147].mxu0 }
 0x64d   : > { %v12781_v35 = vadd.f32 %v7914_v31, %v7913_v44 }
 0x64e   : > { %6268 = vmatmul.mubr.bf16.gmra.mrb[252].mxu0 %v12582_v32 }
 0x64f   : > { %6275 = vmatprep.mubr.bf16.mxu0 %v12557_v18 }
 0x651   : > { %v7916_v51 = vpop.f32.mrb[148].mxu0 }
 0x652   : > { %8659 = vmatmul.mubr.bf16.gmra.mrb[116].mxu1 %v12298_v15  ;;  %v7917_v52 = vpop.f32.mrb[149].mxu0 }
 0x653   : > { %8662 = vmatprep.mubr.bf16.mxu1 %v12340_v30  ;;  %v12787_v42 = vadd.f32 %v7917_v52, %v7916_v51  ;;  %v7919_v60 = vpop.f32.mrb[150].mxu0 }
 0x654   : > { %v7920_v56 = vpop.f32.mrb[151].mxu0 }
 0x655   : > { %v12789_v34 = vadd.f32 %v7920_v56, %v7919_v60 }
 0x656   : > { %6276 = vmatmul.mubr.bf16.gmra.mrb[0].mxu0 %v12593_v49 }
 0x657   : > { %6283 = vmatprep.mubr.bf16.mxu0 %v13556_v10 }
 0x659   : > { %v7922_v18 = vpop.f32.mrb[152].mxu0 }
 0x65a   : > { %8663 = vmatmul.mubr.bf16.gmra.mrb[120].mxu1 %v13551_v40  ;;  %v7923_v32 = vpop.f32.mrb[153].mxu0 }
 0x65b   : > { %8666 = vmatprep.mubr.bf16.mxu1 %v13554_v7  ;;  %v12795_v4 = vadd.f32 %v7923_v32, %v7922_v18  ;;  %v7925_v63 = vpop.f32.mrb[154].mxu0 }
 0x65c   : > { %v7926_v29 = vpop.f32.mrb[155].mxu0 }
 0x65d   : > { %v12797_v6 = vadd.f32 %v7926_v29, %v7925_v63 }
 0x65e   : > { %6284 = vmatmul.mubr.bf16.gmra.mrb[4].mxu0 %v13556_v10 }
 0x661   : > { %v7928_v49 = vpop.f32.mrb[156].mxu0 }
 0x662   : > { %8667 = vmatmul.mubr.bf16.gmra.mrb[124].mxu1 %v12408_v39  ;;  %v7929_v14 = vpop.f32.mrb[157].mxu0 }
 0x663   : > { %8686 = vmatprep.mubr.bf16.mxu1 %v12414_v5  ;;  %v12802_v62 = vadd.f32 %v7929_v14, %v7928_v49  ;;  %v7931_v23 = vpop.f32.mrb[158].mxu0 }
 0x664   : > { %v7932_v50 = vpop.f32.mrb[159].mxu0 }
 0x665   : > { %v12804_v47 = vadd.f32 %v7932_v50, %v7931_v23 }
 0x669   : > { %v7934_v9 = vpop.f32.mrb[160].mxu0 }
 0x66a   : > { %8687 = vmatmul.mubr.bf16.vlgmr.msra.gmra.mrb[96].mxu1 %v12143_v26  ;;  %v7935_v28 = vpop.f32.mrb[161].mxu0 }
 0x66b   : > { %8690 = vmatprep.mubr.bf16.mxu1 %v12156_v17  ;;  %v12808_v59 = vadd.f32 %v7935_v28, %v7934_v9  ;;  %v7937_v53 = vpop.f32.mrb[162].mxu0 }
 0x66c   : > { %v7938_v8 = vpop.f32.mrb[163].mxu0 }
 0x66d   : > { %v12810_v11 = vadd.f32 %v7938_v8, %v7937_v53 }
 0x671   : > { %v7940_v5 = vpop.f32.mrb[164].mxu0 }
 0x672   : > { %8691 = vmatmul.mubr.bf16.gmra.mrb[100].mxu1 %v12171_v61  ;;  %v7941_v19 = vpop.f32.mrb[165].mxu0 }
 0x673   : > { %8694 = vmatprep.mubr.bf16.mxu1 %v12194_v55  ;;  %v12814_v36 = vadd.f32 %v7941_v19, %v7940_v5  ;;  %v7943_v22 = vpop.f32.mrb[166].mxu0 }
 0x674   : > { %v7944_v26 = vpop.f32.mrb[167].mxu0 }
 0x675   : > { %v12816_v38 = vadd.f32 %v7944_v26, %v7943_v22 }
 0x679   : > { %v7946_v17 = vpop.f32.mrb[168].mxu0 }
 0x67a   : > { %8695 = vmatmul.mubr.bf16.gmra.mrb[104].mxu1 %v12206_v57  ;;  %v7947_v46 = vpop.f32.mrb[169].mxu0 }
 0x67b   : > { %8698 = vmatprep.mubr.bf16.mxu1 %v12259_v54  ;;  %v12820_v16 = vadd.f32 %v7947_v46, %v7946_v17  ;;  %v7949_v61 = vpop.f32.mrb[170].mxu0 }
 0x67c   : > { %v7950_v55 = vpop.f32.mrb[171].mxu0 }
 0x67d   : > { %v8034_v20 = vpop.f32.mrb[128].mxu1  ;;  %v12822_v3 = vadd.f32 %v7950_v55, %v7949_v61 }
 0x67e   : > { %v8035_v37 = vpop.f32.mrb[129].mxu1 }
 0x67f   : > { %v8036_v45 = vadd.f32 %v8035_v37, %v8034_v20  ;;  %v8037_v0 = vpop.f32.mrb[130].mxu1 }
 0x680   : > { %v8038_v41 = vpop.f32.mrb[131].mxu1 }
 0x681   : > { %v12825_v1 = vadd.f32 %v8036_v45, %v12760_v12  ;;  %v8039_v33 = vadd.f32 %v8038_v41, %v8037_v0  ;;  %v7952_v54 = vpop.f32.mrb[172].mxu0 }
 0x682   : > { %8699 = vmatmul.mubr.bf16.gmra.mrb[108].mxu1 %v12266_v25  ;;  %v7953_v27 = vpop.f32.mrb[173].mxu0 }
 0x683   : > { %v12829_v57 = vadd.f32 %v8039_v33, %v12762_v21  ;;  %8702 = vmatprep.mubr.bf16.mxu1 %v12277_v13  ;;  %v12832_v2 = vadd.f32 %v7953_v27, %v7952_v54  ;;  %v7955_v31 = vpop.f32.mrb[174].mxu0 }
 0x684   : > { %v7956_v52 = vpop.f32.mrb[175].mxu0 }
 0x685   : > { %v8040_v44 = vpop.f32.mrb[132].mxu1  ;;  %v12834_v56 = vadd.f32 %v7956_v52, %v7955_v31 }
 0x686   : > { %v8041_v51 = vpop.f32.mrb[133].mxu1 }
 0x687   : > { %v8042_v60 = vadd.f32 %v8041_v51, %v8040_v44  ;;  %v8043_v12 = vpop.f32.mrb[134].mxu1 }
 0x688   : > { %v8044_v18 = vpop.f32.mrb[135].mxu1 }
 0x689   : > { %v12837_v25 = vadd.f32 %v8042_v60, %v12771_v24  ;;  %v8045_v21 = vadd.f32 %v8044_v18, %v8043_v12  ;;  %v7958_v32 = vpop.f32.mrb[176].mxu0 }
 0x68a   : > { %8703 = vmatmul.mubr.bf16.gmra.mrb[112].mxu1 %v12298_v15  ;;  %v7959_v63 = vpop.f32.mrb[177].mxu0 }
 0x68b   : > { %v12841_v13 = vadd.f32 %v8045_v21, %v12773_v43  ;;  %8706 = vmatprep.mubr.bf16.mxu1 %v12340_v30  ;;  %v12844_v29 = vadd.f32 %v7959_v63, %v7958_v32  ;;  %v7961_v14 = vpop.f32.mrb[178].mxu0 }
 0x68c   : > { %v7962_v50 = vpop.f32.mrb[179].mxu0 }
 0x68d   : > { %v8046_v49 = vpop.f32.mrb[136].mxu1  ;;  %v12846_v28 = vadd.f32 %v7962_v50, %v7961_v14 }
 0x68e   : > { %v8047_v23 = vpop.f32.mrb[137].mxu1 }
 0x68f   : > { %v8048_v9 = vadd.f32 %v8047_v23, %v8046_v49  ;;  %v8049_v24 = vpop.f32.mrb[138].mxu1 }
 0x690   : > { %v8050_v53 = vpop.f32.mrb[139].mxu1 }
 0x691   : > { %v12849_v15 = vadd.f32 %v8048_v9, %v12779_v48  ;;  %v8051_v43 = vadd.f32 %v8050_v53, %v8049_v24  ;;  %v7964_v8 = vpop.f32.mrb[180].mxu0 }
 0x692   : > { %8707 = vmatmul.mubr.bf16.gmra.mrb[116].mxu1 %v13551_v40  ;;  %v7965_v5 = vpop.f32.mrb[181].mxu0 }
 0x693   : > { %v12853_v30 = vadd.f32 %v8051_v43, %v12781_v35  ;;  %8710 = vmatprep.mubr.bf16.mxu1 %v13554_v7  ;;  %v12856_v19 = vadd.f32 %v7965_v5, %v7964_v8  ;;  %v7967_v26 = vpop.f32.mrb[182].mxu0 }
 0x694   : > { %v7968_v46 = vpop.f32.mrb[183].mxu0 }
 0x695   : > { %v8052_v22 = vpop.f32.mrb[140].mxu1  ;;  %v12858_v61 = vadd.f32 %v7968_v46, %v7967_v26 }
 0x696   : > { %v8053_v17 = vpop.f32.mrb[141].mxu1 }
 0x697   : > { %v8054_v20 = vadd.f32 %v8053_v17, %v8052_v22  ;;  %v8055_v48 = vpop.f32.mrb[142].mxu1 }
 0x698   : > { %v8056_v37 = vpop.f32.mrb[143].mxu1 }
 0x699   : > { %v12861_v40 = vadd.f32 %v8054_v20, %v12787_v42  ;;  %v8057_v35 = vadd.f32 %v8056_v37, %v8055_v48  ;;  %v7970_v55 = vpop.f32.mrb[184].mxu0 }
 0x69a   : > { %8711 = vmatmul.mubr.bf16.gmra.mrb[120].mxu1 %v12408_v39  ;;  %v7971_v45 = vpop.f32.mrb[185].mxu0 }
 0x69b   : > { %v12865_v7 = vadd.f32 %v8057_v35, %v12789_v34  ;;  %8714 = vmatprep.mubr.bf16.mxu1 %v12501_v58  ;;  %v12868_v0 = vadd.f32 %v7971_v45, %v7970_v55  ;;  %v7973_v33 = vpop.f32.mrb[186].mxu0 }
 0x69c   : > { %v7974_v27 = vpop.f32.mrb[187].mxu0 }
 0x69d   : > { %v8058_v41 = vpop.f32.mrb[144].mxu1  ;;  %v12870_v31 = vadd.f32 %v7974_v27, %v7973_v33 }
 0x69e   : > { %v8059_v54 = vpop.f32.mrb[145].mxu1 }
 0x69f   : > { %v8060_v44 = vadd.f32 %v8059_v54, %v8058_v41  ;;  %v8061_v42 = vpop.f32.mrb[146].mxu1 }
 0x6a0   : > { %v8062_v51 = vpop.f32.mrb[147].mxu1 }
 0x6a1   : > { %v12873_v39 = vadd.f32 %v8060_v44, %v12795_v4  ;;  %v8063_v34 = vadd.f32 %v8062_v51, %v8061_v42  ;;  %v7976_v52 = vpop.f32.mrb[188].mxu0 }
 0x6a2   : > { %8715 = vmatmul.mubr.bf16.gmra.mrb[124].mxu1 %v13556_v10  ;;  %v7977_v60 = vpop.f32.mrb[189].mxu0 }
 0x6a3   : > { %v12877_v58 = vadd.f32 %v8063_v34, %v12797_v6  ;;  %v12879_v12 = vadd.f32 %v7977_v60, %v7976_v52  ;;  %v7979_v21 = vpop.f32.mrb[190].mxu0 }
 0x6a4   : > { %v7980_v63 = vpop.f32.mrb[191].mxu0 }
 0x6a5   : > { %v8064_v18 = vpop.f32.mrb[148].mxu1  ;;  %v12881_v14 = vadd.f32 %v7980_v63, %v7979_v21 }
 0x6a6   : > { %v8065_v32 = vpop.f32.mrb[149].mxu1 }
 0x6a7   : > { %v8066_v49 = vadd.f32 %v8065_v32, %v8064_v18  ;;  %v8067_v23 = vpop.f32.mrb[150].mxu1 }
 0x6a8   : > { %v8068_v4 = vpop.f32.mrb[151].mxu1 }
 0x6a9   : > { %v12884_v50 = vadd.f32 %v8066_v49, %v12802_v62  ;;  %v8069_v10 = vadd.f32 %v8068_v4, %v8067_v23  ;;  %v7982_v9 = vpop.f32.mrb[192].mxu0 }
 0x6aa   : > { %v7983_v24 = vpop.f32.mrb[193].mxu0 }
 0x6ab   : > { %v12887_v6 = vadd.f32 %v8069_v10, %v12804_v47  ;;  %v12889_v53 = vadd.f32 %v7983_v24, %v7982_v9  ;;  %v7985_v8 = vpop.f32.mrb[194].mxu0 }
 0x6ac   : > { %v7986_v22 = vpop.f32.mrb[195].mxu0 }
 0x6ad   : > { %v8070_v43 = vpop.f32.mrb[152].mxu1  ;;  %v12891_v17 = vadd.f32 %v7986_v22, %v7985_v8 }
 0x6ae   : > { %v8071_v5 = vpop.f32.mrb[153].mxu1 }
 0x6af   : > { %v8072_v26 = vadd.f32 %v8071_v5, %v8070_v43  ;;  %v8073_v46 = vpop.f32.mrb[154].mxu1 }
 0x6b0   : > { %v8074_v20 = vpop.f32.mrb[155].mxu1 }
 0x6b1   : > { %v12894_v62 = vadd.f32 %v8072_v26, %v12808_v59  ;;  %v8075_v48 = vadd.f32 %v8074_v20, %v8073_v46  ;;  %v7988_v37 = vpop.f32.mrb[196].mxu0 }
 0x6b2   : > { %v7989_v35 = vpop.f32.mrb[197].mxu0 }
 0x6b3   : > { %v12897_v47 = vadd.f32 %v8075_v48, %v12810_v11  ;;  %v12899_v55 = vadd.f32 %v7989_v35, %v7988_v37  ;;  %v7991_v41 = vpop.f32.mrb[198].mxu0 }
 0x6b4   : > { %v7992_v54 = vpop.f32.mrb[199].mxu0 }
 0x6b5   : > { %v8076_v45 = vpop.f32.mrb[156].mxu1  ;;  %v12901_v44 = vadd.f32 %v7992_v54, %v7991_v41 }
 0x6b6   : > { %v8077_v33 = vpop.f32.mrb[157].mxu1 }
 0x6b7   : > { %v8078_v27 = vadd.f32 %v8077_v33, %v8076_v45  ;;  %v8079_v42 = vpop.f32.mrb[158].mxu1 }
 0x6b8   : > { %v8080_v51 = vpop.f32.mrb[159].mxu1 }
 0x6b9   : > { %v12904_v59 = vadd.f32 %v8078_v27, %v12814_v36  ;;  %v8081_v34 = vadd.f32 %v8080_v51, %v8079_v42  ;;  %v8170_v52 = vpop.f32.mrb[200].mxu0 }
 0x6ba   : > { %v8171_v60 = vpop.f32.mrb[201].mxu0 }
 0x6bb   : > { %v12907_v11 = vadd.f32 %v8081_v34, %v12816_v38  ;;  %v8172_v21 = vadd.f32 %v8171_v60, %v8170_v52  ;;  %v8173_v32 = vpop.f32.mrb[202].mxu0 }
 0x6bc   : > { %v8174_v49 = vpop.f32.mrb[203].mxu0 }
 0x6bd   : > { %v8082_v18 = vpop.f32.mrb[160].mxu1  ;;  %v8175_v10 = vadd.f32 %v8174_v49, %v8173_v32  ;;  %v12910_v9 = vadd.f32 %v12825_v1, %v8172_v21 }
 0x6be   : > { %v8083_v63 = vpop.f32.mrb[161].mxu1 }
 0x6bf   : > { %v8084_v23 = vadd.f32 %v8083_v63, %v8082_v18  ;;  %v8085_v4 = vpop.f32.mrb[162].mxu1  ;;  %v12916_v38 = vadd.f32 %v12829_v57, %v8175_v10 }
 0x6c0   : > { %v8086_v24 = vpop.f32.mrb[163].mxu1 }
 0x6c1   : > { %v12913_v36 = vadd.f32 %v8084_v23, %v12820_v16  ;;  %v8087_v43 = vadd.f32 %v8086_v24, %v8085_v4  ;;  %v8176_v5 = vpop.f32.mrb[204].mxu0 }
 0x6c2   : > { %v8177_v22 = vpop.f32.mrb[205].mxu0 }
 0x6c3   : > { %v12919_v8 = vadd.f32 %v8087_v43, %v12822_v3  ;;  %v8178_v46 = vadd.f32 %v8177_v22, %v8176_v5  ;;  %v8179_v20 = vpop.f32.mrb[206].mxu0 }
 0x6c4   : > { %v8180_v37 = vpop.f32.mrb[207].mxu0 }
 0x6c5   : > { %v8088_v26 = vpop.f32.mrb[164].mxu1  ;;  %v8181_v45 = vadd.f32 %v8180_v37, %v8179_v20  ;;  %v12922_v16 = vadd.f32 %v12837_v25, %v8178_v46 }
 0x6c6   : > { %v8089_v48 = vpop.f32.mrb[165].mxu1 }
 0x6c7   : > { %v8090_v1 = vadd.f32 %v8089_v48, %v8088_v26  ;;  %v8091_v35 = vpop.f32.mrb[166].mxu1  ;;  %v12928_v3 = vadd.f32 %v12841_v13, %v8181_v45 }
 0x6c8   : > { %v8092_v41 = vpop.f32.mrb[167].mxu1 }
 0x6c9   : > { %v12925_v57 = vadd.f32 %v8090_v1, %v12832_v2  ;;  %v8093_v33 = vadd.f32 %v8092_v41, %v8091_v35  ;;  %v8182_v27 = vpop.f32.mrb[208].mxu0 }
 0x6ca   : > { %v8183_v42 = vpop.f32.mrb[209].mxu0 }
 0x6cb   : > { %v12931_v54 = vadd.f32 %v8093_v33, %v12834_v56  ;;  %v8184_v34 = vadd.f32 %v8183_v42, %v8182_v27  ;;  %v8185_v52 = vpop.f32.mrb[210].mxu0 }
 0x6cc   : > { %v8186_v18 = vpop.f32.mrb[211].mxu0 }
 0x6cd   : > { %v8094_v51 = vpop.f32.mrb[168].mxu1  ;;  %v8187_v32 = vadd.f32 %v8186_v18, %v8185_v52  ;;  %v12934_v2 = vadd.f32 %v12849_v15, %v8184_v34 }
 0x6ce   : > { %v8095_v60 = vpop.f32.mrb[169].mxu1 }
 0x6cf   : > { %v8096_v25 = vadd.f32 %v8095_v60, %v8094_v51  ;;  %v8097_v21 = vpop.f32.mrb[170].mxu1  ;;  %v12940_v56 = vadd.f32 %v12853_v30, %v8187_v32 }
 0x6d0   : > { %v8098_v63 = vpop.f32.mrb[171].mxu1 }
 0x6d1   : > { %v12937_v13 = vadd.f32 %v8096_v25, %v12844_v29  ;;  %v8099_v49 = vadd.f32 %v8098_v63, %v8097_v21  ;;  %v8188_v4 = vpop.f32.mrb[212].mxu0 }
 0x6d2   : > { %v8189_v10 = vpop.f32.mrb[213].mxu0 }
 0x6d3   : > { %v12943_v23 = vadd.f32 %v8099_v49, %v12846_v28  ;;  %v8190_v43 = vadd.f32 %v8189_v10, %v8188_v4  ;;  %v8191_v5 = vpop.f32.mrb[214].mxu0 }
 0x6d4   : > { %v8192_v26 = vpop.f32.mrb[215].mxu0 }
 0x6d5   : > { %v8100_v24 = vpop.f32.mrb[172].mxu1  ;;  %v8193_v20 = vadd.f32 %v8192_v26, %v8191_v5  ;;  %v12946_v29 = vadd.f32 %v12861_v40, %v8190_v43 }
 0x6d6   : > { %v8101_v22 = vpop.f32.mrb[173].mxu1 }
 0x6d7   : > { %v8102_v15 = vadd.f32 %v8101_v22, %v8100_v24  ;;  %v8103_v46 = vpop.f32.mrb[174].mxu1  ;;  %v12952_v28 = vadd.f32 %v12865_v7, %v8193_v20 }
 0x6d8   : > { %v8104_v48 = vpop.f32.mrb[175].mxu1 }
 0x6d9   : > { %v12949_v30 = vadd.f32 %v8102_v15, %v12856_v19  ;;  %v8105_v37 = vadd.f32 %v8104_v48, %v8103_v46  ;;  %v8194_v35 = vpop.f32.mrb[216].mxu0 }
 0x6da   : > { %v8195_v45 = vpop.f32.mrb[217].mxu0 }
 0x6db   : > { %v12955_v1 = vadd.f32 %v8105_v37, %v12858_v61  ;;  %v8196_v33 = vadd.f32 %v8195_v45, %v8194_v35  ;;  %v8197_v27 = vpop.f32.mrb[218].mxu0 }
 0x6dc   : > { %v8198_v51 = vpop.f32.mrb[219].mxu0 }
 0x6dd   : > { %v8106_v41 = vpop.f32.mrb[176].mxu1  ;;  %v8199_v52 = vadd.f32 %v8198_v51, %v8197_v27  ;;  %v12958_v19 = vadd.f32 %v12873_v39, %v8196_v33 }
 0x6de   : > { %v8107_v42 = vpop.f32.mrb[177].mxu1 }
 0x6df   : > { %v8108_v40 = vadd.f32 %v8107_v42, %v8106_v41  ;;  %v8109_v34 = vpop.f32.mrb[178].mxu1  ;;  %v12964_v61 = vadd.f32 %v12877_v58, %v8199_v52 }
 0x6e0   : > { %v8110_v60 = vpop.f32.mrb[179].mxu1 }
 0x6e1   : > { %v12961_v7 = vadd.f32 %v8108_v40, %v12868_v0  ;;  %v8111_v18 = vadd.f32 %v8110_v60, %v8109_v34  ;;  %v8200_v21 = vpop.f32.mrb[220].mxu0 }
 0x6e2   : > { %v8201_v32 = vpop.f32.mrb[221].mxu0 }
 0x6e3   : > { %v12967_v25 = vadd.f32 %v8111_v18, %v12870_v31  ;;  %v8202_v49 = vadd.f32 %v8201_v32, %v8200_v21  ;;  %v8203_v4 = vpop.f32.mrb[222].mxu0 }
 0x6e4   : > { %v8204_v24 = vpop.f32.mrb[223].mxu0 }
 0x6e5   : > { %v8112_v63 = vpop.f32.mrb[180].mxu1  ;;  %v8205_v5 = vadd.f32 %v8204_v24, %v8203_v4  ;;  %v12970_v0 = vadd.f32 %v12884_v50, %v8202_v49 }
 0x6e6   : > { %v8113_v10 = vpop.f32.mrb[181].mxu1 }
 0x6e7   : > { %v8114_v39 = vadd.f32 %v8113_v10, %v8112_v63  ;;  %v8115_v43 = vpop.f32.mrb[182].mxu1  ;;  %v12976_v31 = vadd.f32 %v12887_v6, %v8205_v5 }
 0x6e8   : > { %v8116_v22 = vpop.f32.mrb[183].mxu1 }
 0x6e9   : > { %v12973_v58 = vadd.f32 %v8114_v39, %v12879_v12  ;;  %v8117_v26 = vadd.f32 %v8116_v22, %v8115_v43  ;;  %v8206_v46 = vpop.f32.mrb[224].mxu0 }
 0x6ea   : > { %v8207_v20 = vpop.f32.mrb[225].mxu0 }
 0x6eb   : > { %v12979_v15 = vadd.f32 %v8117_v26, %v12881_v14  ;;  %v8208_v37 = vadd.f32 %v8207_v20, %v8206_v46  ;;  %v8209_v35 = vpop.f32.mrb[226].mxu0 }
 0x6ec   : > { %v8210_v41 = vpop.f32.mrb[227].mxu0 }
 0x6ed   : > { %v8118_v48 = vpop.f32.mrb[184].mxu1  ;;  %v8211_v27 = vadd.f32 %v8210_v41, %v8209_v35  ;;  %v12982_v12 = vadd.f32 %v12894_v62, %v8208_v37 }
 0x6ee   : > { %v8119_v45 = vpop.f32.mrb[185].mxu1 }
 0x6ef   : > { %v8120_v50 = vadd.f32 %v8119_v45, %v8118_v48  ;;  %v8121_v33 = vpop.f32.mrb[186].mxu1  ;;  %v12988_v14 = vadd.f32 %v12897_v47, %v8211_v27 }
 0x6f0   : > { %v8122_v42 = vpop.f32.mrb[187].mxu1 }
 0x6f1   : > { %v12985_v6 = vadd.f32 %v8120_v50, %v12889_v53  ;;  %v8123_v51 = vadd.f32 %v8122_v42, %v8121_v33  ;;  %v8212_v34 = vpop.f32.mrb[228].mxu0 }
 0x6f2   : > { %v8213_v52 = vpop.f32.mrb[229].mxu0 }
 0x6f3   : > { %v12991_v40 = vadd.f32 %v8123_v51, %v12891_v17  ;;  %v8214_v18 = vadd.f32 %v8213_v52, %v8212_v34  ;;  %v8215_v21 = vpop.f32.mrb[230].mxu0 }
 0x6f4   : > { %v8216_v63 = vpop.f32.mrb[231].mxu0 }
 0x6f5   : > { %v8124_v60 = vpop.f32.mrb[188].mxu1  ;;  %v8217_v4 = vadd.f32 %v8216_v63, %v8215_v21  ;;  %v12994_v53 = vadd.f32 %v12904_v59, %v8214_v18 }
 0x6f6   : > { %v8125_v32 = vpop.f32.mrb[189].mxu1 }
 0x6f7   : > { %v8126_v62 = vadd.f32 %v8125_v32, %v8124_v60  ;;  %v8127_v49 = vpop.f32.mrb[190].mxu1  ;;  %v13000_v17 = vadd.f32 %v12907_v11, %v8217_v4 }
 0x6f8   : > { %v8128_v10 = vpop.f32.mrb[191].mxu1 }
 0x6f9   : > { %v12997_v47 = vadd.f32 %v8126_v62, %v12899_v55  ;;  %v8129_v24 = vadd.f32 %v8128_v10, %v8127_v49  ;;  %v8218_v43 = vpop.f32.mrb[232].mxu0 }
 0x6fa   : > { %v8219_v5 = vpop.f32.mrb[233].mxu0 }
 0x6fb   : > { %v13003_v39 = vadd.f32 %v8129_v24, %v12901_v44  ;;  %v8220_v22 = vadd.f32 %v8219_v5, %v8218_v43  ;;  %v8221_v26 = vpop.f32.mrb[234].mxu0 }
 0x6fc   : > { %v8222_v46 = vpop.f32.mrb[235].mxu0 }
 0x6fd   : > { %v8223_v20 = vadd.f32 %v8222_v46, %v8221_v26  ;;  %v13006_v59 = vadd.f32 %v12913_v36, %v8220_v22 }
 0x6ff   : > { %v13009_v48 = vadd.f32 %v12919_v8, %v8223_v20 }
 0x701   : > { %v8224_v55 = vpop.f32.mrb[236].mxu0 }
 0x702   : > { %v8225_v37 = vpop.f32.mrb[237].mxu0 }
 0x703   : > { %v8226_v35 = vadd.f32 %v8225_v37, %v8224_v55  ;;  %v8227_v11 = vpop.f32.mrb[238].mxu0 }
 0x704   : > { %v8228_v45 = vpop.f32.mrb[239].mxu0 }
 0x705   : > { %v8229_v41 = vadd.f32 %v8228_v45, %v8227_v11  ;;  %v13012_v44 = vadd.f32 %v12925_v57, %v8226_v35 }
 0x707   : > { %v13015_v50 = vadd.f32 %v12931_v54, %v8229_v41 }
 0x709   : > { %v8230_v33 = vpop.f32.mrb[240].mxu0 }
 0x70a   : > { %v8231_v27 = vpop.f32.mrb[241].mxu0 }
 0x70b   : > { %v8232_v42 = vadd.f32 %v8231_v27, %v8230_v33  ;;  %v8233_v36 = vpop.f32.mrb[242].mxu0 }
 0x70c   : > { %v8234_v51 = vpop.f32.mrb[243].mxu0 }
 0x70d   : > { %v8235_v34 = vadd.f32 %v8234_v51, %v8233_v36  ;;  %v13018_v8 = vadd.f32 %v12937_v13, %v8232_v42 }
 0x70f   : > { %v13021_v52 = vadd.f32 %v12943_v23, %v8235_v34 }
 0x711   : > { %v8236_v60 = vpop.f32.mrb[244].mxu0 }
 0x712   : > { %v8237_v18 = vpop.f32.mrb[245].mxu0 }
 0x713   : > { %v8238_v21 = vadd.f32 %v8237_v18, %v8236_v60  ;;  %v8239_v57 = vpop.f32.mrb[246].mxu0 }
 0x714   : > { %v8240_v32 = vpop.f32.mrb[247].mxu0 }
 0x715   : > { %v8241_v63 = vadd.f32 %v8240_v32, %v8239_v57  ;;  %v13024_v54 = vadd.f32 %v12949_v30, %v8238_v21 }
 0x717   : > { %v13027_v62 = vadd.f32 %v12955_v1, %v8241_v63 }
 0x719   : > { %v8242_v49 = vpop.f32.mrb[248].mxu0 }
 0x71a   : > { %v8243_v4 = vpop.f32.mrb[249].mxu0 }
 0x71b   : > { %v8244_v10 = vadd.f32 %v8243_v4, %v8242_v49  ;;  %v8245_v13 = vpop.f32.mrb[250].mxu0 }
 0x71c   : > { %v8246_v24 = vpop.f32.mrb[251].mxu0 }
 0x71d   : > { %v8247_v43 = vadd.f32 %v8246_v24, %v8245_v13  ;;  %v13030_v23 = vadd.f32 %v12961_v7, %v8244_v10 }
 0x71f   : > { %v13033_v5 = vadd.f32 %v12967_v25, %v8247_v43  ;;  %v13558_v43 = vld [vmem:[#allocation9_spill] sm:$0xff] }
 0x721   : > { %v8248_v22 = vpop.f32.mrb[252].mxu0 }
 0x722   : > { %v8249_v26 = vpop.f32.mrb[253].mxu0 }
 0x723   : > { %v8250_v46 = vadd.f32 %v8249_v26, %v8248_v22  ;;  %v8251_v30 = vpop.f32.mrb[254].mxu0 }
 0x724   : > { %v8252_v20 = vpop.f32.mrb[255].mxu0 }
 0x725   : > { %v8253_v55 = vadd.f32 %v8252_v20, %v8251_v30  ;;  %v13036_v1 = vadd.f32 %v12973_v58, %v8250_v46  ;;  %v13561_v46 = vld [vmem:[#allocation8_spill] sm:$0xff] }
 0x727   : > { %v13039_v37 = vadd.f32 %v12979_v15, %v8253_v55 }
 0x729   : > { %v8254_v35 = vpop.f32.mrb[0].mxu0 }
 0x72a   : > { %v8255_v11 = vpop.f32.mrb[1].mxu0 }
 0x72b   : > { %v8256_v45 = vadd.f32 %v8255_v11, %v8254_v35  ;;  %v8257_v7 = vpop.f32.mrb[2].mxu0 }
 0x72c   : > { %v8258_v41 = vpop.f32.mrb[3].mxu0 }
 0x72d   : > { %v8259_v33 = vadd.f32 %v8258_v41, %v8257_v7  ;;  %v13042_v25 = vadd.f32 %v12985_v6, %v8256_v45  ;;  %v13056_v6 = vld [vmem:[%s13190_s10] ss:$0 sm:$0xff] }
 0x72f   : > { %v13045_v27 = vadd.f32 %v12991_v40, %v8259_v33 }
 0x731   : > { %v8260_v42 = vpop.f32.mrb[4].mxu0 }
 0x732   : > { %v8261_v36 = vpop.f32.mrb[5].mxu0 }
 0x733   : > { %v8262_v51 = vadd.f32 %v8261_v36, %v8260_v42  ;;  %v8263_v58 = vpop.f32.mrb[6].mxu0 }
 0x734   : > { %v8264_v34 = vpop.f32.mrb[7].mxu0 }
 0x735   : > { %v8265_v60 = vadd.f32 %v8264_v34, %v8263_v58  ;;  %v13048_v15 = vadd.f32 %v12997_v47, %v8262_v51  ;;  %v13562_v34 = vld [vmem:[#allocation15_spill] sm:$0xff] }
 0x737   : > { %v13051_v18 = vadd.f32 %v13003_v39, %v8265_v60  ;;  %v13563_v60 = vld [vmem:[#allocation17_spill] sm:$0xff] }
 0x73d   : > { %v8688_v21 = vpop.f32.mrb[96].mxu1 }
 0x73e   : > { %v8912_v40 = vadd.f32 %v12922_v16, %v8688_v21  ;;  %v6326_v57 = vpop.f32.mrb[97].mxu1  ;;  %v13559_v16 = vld [vmem:[#allocation11_spill] sm:$0xff] }
 0x73f   : > { %v8915_v32 = vadd.f32 %v12910_v9, %v6326_v57  ;;  %v8689_v63 = vpop.f32.mrb[98].mxu1  ;;  %v13560_v9 = vld [vmem:[#allocation7_spill] sm:$0xff] }
 0x740   : > { %v6494_v49 = vadd.f32 %v8912_v40, %v13056_v6  ;;  %v8918_v47 = vadd.f32 %v12928_v3, %v8689_v63  ;;  %v6329_v4 = vpop.f32.mrb[99].mxu1  ;;  %v13564_v40 = vld [vmem:[#allocation12_spill] sm:$0xff] }
 0x741   : > { %v6492_v39 = vadd.f32 %v8915_v32, %v13056_v6  ;;  %v8921_v10 = vadd.f32 %v12916_v38, %v6329_v4  ;;  %v13565_v32 = vld [vmem:[#allocation14_spill] sm:$0xff] }
 0x742   : > { %v6495_v13 = vadd.f32 %v8918_v47, %v13056_v6  ;;  %v6526_v22 = vadd.f32 %v13558_v43, %v6494_v49 }
 0x743   : > { %v6493_v24 = vadd.f32 %v8921_v10, %v13056_v6  ;;  %v6524_v3 = vadd.f32 %v13560_v9, %v6492_v39  ;;  %v13566_v9 = vld [vmem:[#allocation21_spill] sm:$0xff] }
 0x744   : > { %v6527_v26 = vadd.f32 %v13559_v16, %v6495_v13 }
 0x745   : > { %v6525_v38 = vadd.f32 %v13561_v46, %v6493_v24  ;;  %v8692_v30 = vpop.f32.mrb[100].mxu1 }
 0x746   : > { %v7304_v20 = vpack.c.bf16 %v6527_v26, %v6526_v22  ;;  %v8924_v55 = vadd.f32 %v12946_v29, %v8692_v30  ;;  %v6342_v35 = vpop.f32.mrb[101].mxu1 }
 0x747   : > { %v7299_v11 = vpack.c.bf16 %v6525_v38, %v6524_v3  ;;  %v8927_v45 = vadd.f32 %v12934_v2, %v6342_v35  ;;  %v8693_v7 = vpop.f32.mrb[102].mxu1  ;;  %v13567_v3 = vld [vmem:[#allocation22_spill] sm:$0xff] }
 0x748   : > { %7391 = vst [vmem:[%s13073_s27 + $0x8] sm:$0xff] %v7304_v20   ;;  %v6498_v41 = vadd.f32 %v8924_v55, %v13056_v6  ;;  %v8930_v33 = vadd.f32 %v12952_v28, %v8693_v7  ;;  %v6345_v42 = vpop.f32.mrb[103].mxu1  ;;  %v13568_v38 = vld [vmem:[#allocation18_spill] sm:$0xff]  ;;  %v13569_v20 = vld [vmem:[#allocation20_spill] sm:$0xff] }
 0x749   : > { %7300 = vst [vmem:[%s13073_s27] sm:$0xff] %v7299_v11   ;;  %v6496_v36 = vadd.f32 %v8927_v45, %v13056_v6  ;;  %v8933_v51 = vadd.f32 %v12940_v56, %v6345_v42 }
 0x74a   : > { %v6499_v58 = vadd.f32 %v8930_v33, %v13056_v6  ;;  %v6530_v2 = vadd.f32 %v13562_v34, %v6498_v41  ;;  %v13570_v34 = vld [vmem:[#allocation25_spill] sm:$0xff] }
 0x74b   : > { %v6497_v29 = vadd.f32 %v8933_v51, %v13056_v6  ;;  %v6528_v57 = vadd.f32 %v13564_v40, %v6496_v36 }
 0x74c   : > { %v6531_v21 = vadd.f32 %v13563_v60, %v6499_v58 }
 0x74d   : > { %v6529_v28 = vadd.f32 %v13565_v32, %v6497_v29  ;;  %v8696_v63 = vpop.f32.mrb[104].mxu1 }
 0x74e   : > { %v7314_v49 = vpack.c.bf16 %v6531_v21, %v6530_v2  ;;  %v8936_v47 = vadd.f32 %v12970_v0, %v8696_v63  ;;  %v6358_v4 = vpop.f32.mrb[105].mxu1  ;;  %v13571_v2 = vld [vmem:[#allocation26_spill] sm:$0xff]  ;;  %v13572_v21 = vld [vmem:[#allocation23_spill] sm:$0xff] }
 0x74f   : > { %v7309_v39 = vpack.c.bf16 %v6529_v28, %v6528_v57  ;;  %v8939_v56 = vadd.f32 %v12958_v19, %v6358_v4  ;;  %v8697_v10 = vpop.f32.mrb[106].mxu1  ;;  %v13573_v57 = vld [vmem:[#allocation24_spill] sm:$0xff] }
 0x750   : > { %7393 = vst [vmem:[%s13073_s27 + $0x18] sm:$0xff] %v7314_v49   ;;  %v6502_v13 = vadd.f32 %v8936_v47, %v13056_v6  ;;  %v8942_v24 = vadd.f32 %v12976_v31, %v8697_v10  ;;  %v6361_v43 = vpop.f32.mrb[107].mxu1 }
 0x751   : > { %7392 = vst [vmem:[%s13073_s27 + $0x10] sm:$0xff] %v7309_v39   ;;  %v6500_v22 = vadd.f32 %v8939_v56, %v13056_v6  ;;  %v8945_v16 = vadd.f32 %v12964_v61, %v6361_v43 }
 0x752   : > { %v6503_v26 = vadd.f32 %v8942_v24, %v13056_v6  ;;  %v6534_v19 = vadd.f32 %v13566_v9, %v6502_v13 }
 0x753   : > { %v6501_v0 = vadd.f32 %v8945_v16, %v13056_v6  ;;  %v6532_v30 = vadd.f32 %v13568_v38, %v6500_v22  ;;  %v13574_v22 = vld [vmem:[#allocation29_spill] sm:$0xff]  ;;  %v13575_v16 = vld [vmem:[#allocation30_spill] sm:$0xff] }
 0x754   : > { %v6535_v46 = vadd.f32 %v13567_v3, %v6503_v26 }
 0x755   : > { %v6533_v31 = vadd.f32 %v13569_v20, %v6501_v0  ;;  %v8700_v55 = vpop.f32.mrb[108].mxu1  ;;  %v13576_v0 = vld [vmem:[#allocation27_spill] sm:$0xff] }
 0x756   : > { %v7324_v35 = vpack.c.bf16 %v6535_v46, %v6534_v19  ;;  %v8948_v11 = vadd.f32 %v12994_v53, %v8700_v55  ;;  %v6374_v45 = vpop.f32.mrb[109].mxu1  ;;  %v13577_v19 = vld [vmem:[#allocation28_spill] sm:$0xff] }
 0x757   : > { %v7319_v7 = vpack.c.bf16 %v6533_v31, %v6532_v30  ;;  %v8951_v61 = vadd.f32 %v12982_v12, %v6374_v45  ;;  %v8701_v41 = vpop.f32.mrb[110].mxu1 }
 0x758   : > { %7395 = vst [vmem:[%s13073_s27 + $0x28] sm:$0xff] %v7324_v35   ;;  %v6506_v33 = vadd.f32 %v8948_v11, %v13056_v6  ;;  %v8954_v42 = vadd.f32 %v13000_v17, %v8701_v41  ;;  %v6377_v36 = vpop.f32.mrb[111].mxu1  ;;  %v13578_v41 = vld [vmem:[#allocation33_spill] sm:$0xff] }
 0x759   : > { %7394 = vst [vmem:[%s13073_s27 + $0x20] sm:$0xff] %v7319_v7   ;;  %v6504_v51 = vadd.f32 %v8951_v61, %v13056_v6  ;;  %v8957_v58 = vadd.f32 %v12988_v14, %v6377_v36  ;;  %v13580_v36 = vld [vmem:[#allocation31_spill] sm:$0xff] }
 0x75a   : > { %v6507_v29 = vadd.f32 %v8954_v42, %v13056_v6  ;;  %v6538_v12 = vadd.f32 %v13570_v34, %v6506_v33  ;;  %v13579_v33 = vld [vmem:[#allocation34_spill] sm:$0xff] }
 0x75b   : > { %v6505_v53 = vadd.f32 %v8957_v58, %v13056_v6  ;;  %v6536_v40 = vadd.f32 %v13572_v21, %v6504_v51  ;;  %v13581_v58 = vld [vmem:[#allocation32_spill] sm:$0xff] }
 0x75c   : > { %v6539_v60 = vadd.f32 %v13571_v2, %v6507_v29 }
 0x75d   : > { %v6537_v17 = vadd.f32 %v13573_v57, %v6505_v53  ;;  %v8704_v32 = vpop.f32.mrb[112].mxu1 }
 0x75e   : > { %v7334_v28 = vpack.c.bf16 %v6539_v60, %v6538_v12  ;;  %v8960_v63 = vadd.f32 %v13012_v44, %v8704_v32  ;;  %v6390_v49 = vpop.f32.mrb[113].mxu1 }
 0x75f   : > { %v7329_v47 = vpack.c.bf16 %v6537_v17, %v6536_v40  ;;  %v8963_v14 = vadd.f32 %v13006_v59, %v6390_v49  ;;  %v8705_v4 = vpop.f32.mrb[114].mxu1  ;;  %v13583_v49 = vld [vmem:[#allocation38_spill] sm:$0xff] }
 0x760   : > { %7397 = vst [vmem:[%s13073_s27 + $0x38] sm:$0xff] %v7334_v28   ;;  %v6510_v39 = vadd.f32 %v8960_v63, %v13056_v6  ;;  %v8966_v56 = vadd.f32 %v13015_v50, %v8705_v4  ;;  %v6393_v10 = vpop.f32.mrb[115].mxu1  ;;  %v13582_v63 = vld [vmem:[#allocation37_spill] sm:$0xff] }
 0x761   : > { %7396 = vst [vmem:[%s13073_s27 + $0x30] sm:$0xff] %v7329_v47   ;;  %v6508_v13 = vadd.f32 %v8963_v14, %v13056_v6  ;;  %v8969_v24 = vadd.f32 %v13009_v48, %v6393_v10  ;;  %v13584_v14 = vld [vmem:[#allocation35_spill] sm:$0xff] }
 0x762   : > { %v6511_v43 = vadd.f32 %v8966_v56, %v13056_v6  ;;  %v6542_v59 = vadd.f32 %v13574_v22, %v6510_v39  ;;  %v13585_v39 = vld [vmem:[#allocation36_spill] sm:$0xff] }
 0x763   : > { %v6509_v44 = vadd.f32 %v8969_v24, %v13056_v6  ;;  %v6540_v9 = vadd.f32 %v13576_v0, %v6508_v13 }
 0x764   : > { %v6543_v26 = vadd.f32 %v13575_v16, %v6511_v43 }
 0x765   : > { %v6541_v50 = vadd.f32 %v13577_v19, %v6509_v44  ;;  %v8708_v3 = vpop.f32.mrb[116].mxu1  ;;  %v13586_v19 = vld [vmem:[#allocation41_spill] sm:$0xff] }
 0x766   : > { %v7344_v46 = vpack.c.bf16 %v6543_v26, %v6542_v59  ;;  %v8972_v38 = vadd.f32 %v13024_v54, %v8708_v3  ;;  %v6406_v30 = vpop.f32.mrb[117].mxu1 }
 0x767   : > { %v7339_v20 = vpack.c.bf16 %v6541_v50, %v6540_v9  ;;  %v8975_v48 = vadd.f32 %v13018_v8, %v6406_v30  ;;  %v8709_v31 = vpop.f32.mrb[118].mxu1  ;;  %v13587_v50 = vld [vmem:[#allocation42_spill] sm:$0xff]  ;;  %v13589_v30 = vld [vmem:[#allocation40_spill] sm:$0xff] }
 0x768   : > { %7399 = vst [vmem:[%s13073_s27 + $0x48] sm:$0xff] %v7344_v46   ;;  %v6514_v55 = vadd.f32 %v8972_v38, %v13056_v6  ;;  %v8978_v35 = vadd.f32 %v13027_v62, %v8709_v31  ;;  %v6409_v11 = vpop.f32.mrb[119].mxu1  ;;  %v13588_v46 = vld [vmem:[#allocation39_spill] sm:$0xff] }
 0x769   : > { %7398 = vst [vmem:[%s13073_s27 + $0x40] sm:$0xff] %v7339_v20   ;;  %v6512_v45 = vadd.f32 %v8975_v48, %v13056_v6  ;;  %v8981_v7 = vadd.f32 %v13021_v52, %v6409_v11 }
 0x76a   : > { %v6515_v61 = vadd.f32 %v8978_v35, %v13056_v6  ;;  %v6546_v8 = vadd.f32 %v13578_v41, %v6514_v55 }
 0x76b   : > { %v6513_v54 = vadd.f32 %v8981_v7, %v13056_v6  ;;  %v6544_v51 = vadd.f32 %v13580_v36, %v6512_v45 }
 0x76c   : > { %v6547_v42 = vadd.f32 %v13579_v33, %v6515_v61 }
 0x76d   : > { %v6545_v62 = vadd.f32 %v13581_v58, %v6513_v54  ;;  %v8712_v29 = vpop.f32.mrb[120].mxu1 }
 0x76e   : > { %v7354_v53 = vpack.c.bf16 %v6547_v42, %v6546_v8  ;;  %v8984_v34 = vadd.f32 %v13036_v1, %v8712_v29  ;;  %v6422_v12 = vpop.f32.mrb[121].mxu1 }
 0x76f   : > { %v7349_v2 = vpack.c.bf16 %v6545_v62, %v6544_v51  ;;  %v8987_v52 = vadd.f32 %v13030_v23, %v6422_v12  ;;  %v8713_v60 = vpop.f32.mrb[122].mxu1 }
 0x770   : > { %7401 = vst [vmem:[%s13073_s27 + $0x58] sm:$0xff] %v7354_v53   ;;  %v6518_v21 = vadd.f32 %v8984_v34, %v13056_v6  ;;  %v8990_v40 = vadd.f32 %v13039_v37, %v8713_v60  ;;  %v6425_v57 = vpop.f32.mrb[123].mxu1 }
 0x771   : > { %7400 = vst [vmem:[%s13073_s27 + $0x50] sm:$0xff] %v7349_v2   ;;  %v6516_v17 = vadd.f32 %v8987_v52, %v13056_v6  ;;  %v8993_v32 = vadd.f32 %v13033_v5, %v6425_v57 }
 0x772   : > { %v6519_v28 = vadd.f32 %v8990_v40, %v13056_v6  ;;  %v6550_v23 = vadd.f32 %v13582_v63, %v6518_v21 }
 0x773   : > { %v6517_v1 = vadd.f32 %v8993_v32, %v13056_v6  ;;  %v6548_v4 = vadd.f32 %v13584_v14, %v6516_v17 }
 0x774   : > { %v6551_v47 = vadd.f32 %v13583_v49, %v6519_v28 }
 0x775   : > { %v6549_v37 = vadd.f32 %v13585_v39, %v6517_v1  ;;  %v8716_v56 = vpop.f32.mrb[124].mxu1 }
 0x776   : > { %v7364_v10 = vpack.c.bf16 %v6551_v47, %v6550_v23  ;;  %v8996_v13 = vadd.f32 %v13048_v15, %v8716_v56  ;;  %v6438_v24 = vpop.f32.mrb[125].mxu1 }
 0x777   : > { %v7359_v43 = vpack.c.bf16 %v6549_v37, %v6548_v4  ;;  %v8999_v5 = vadd.f32 %v13042_v25, %v6438_v24  ;;  %v8717_v44 = vpop.f32.mrb[126].mxu1 }
 0x778   : > { %7403 = vst [vmem:[%s13073_s27 + $0x68] sm:$0xff] %v7364_v10   ;;  %v6522_v22 = vadd.f32 %v8996_v13, %v13056_v6  ;;  %v9002_v59 = vadd.f32 %v13051_v18, %v8717_v44  ;;  %v6441_v16 = vpop.f32.mrb[127].mxu1 }
 0x779   : > { %7402 = vst [vmem:[%s13073_s27 + $0x60] sm:$0xff] %v7359_v43   ;;  %v6520_v26 = vadd.f32 %v8999_v5, %v13056_v6  ;;  %v9005_v0 = vadd.f32 %v13045_v27, %v6441_v16 }
 0x77a   : > { %v6523_v15 = vadd.f32 %v9002_v59, %v13056_v6  ;;  %v6554_v25 = vadd.f32 %v13586_v19, %v6522_v22 }
 0x77b   : > { %v6521_v9 = vadd.f32 %v9005_v0, %v13056_v6  ;;  %v6552_v38 = vadd.f32 %v13588_v46, %v6520_v26 }
 0x77c   : > { %v6555_v3 = vadd.f32 %v13587_v50, %v6523_v15 }
 0x77d   : > { %v6553_v20 = vadd.f32 %v13589_v30, %v6521_v9 }
 0x77e   : > { %v7374_v48 = vpack.c.bf16 %v6555_v3, %v6554_v25 }
 0x77f   : > { %v7369_v18 = vpack.c.bf16 %v6553_v20, %v6552_v38 }
 0x780   : > { %7405 = vst [vmem:[%s13073_s27 + $0x78] sm:$0xff] %v7374_v48  }
 0x781   : > { %7404 = vst [vmem:[%s13073_s27 + $0x70] sm:$0xff] %v7369_v18  }
 0x782 PF: > { %s21_s17 = sadd.s32 1, %s9558_s17  }
 0x783   : > { %p18_p4 = scmp.ge.s32.totalorder %s21_s17, 4  }
 0x785   :  { %20 = sbr.rel (!%p18_p4) target bundleno = 1 (0x1), region = 101 }

</bundles_post_ra>
